<compile_context>
chip_gen: v6e
topology: v6e:2x2x1
jax: 0.10.0
libtpu: 0.0.40
codegen_flags: <defaults>
</compile_context>

<pallas_src>
import functools

import jax
import jax.numpy as jnp
from jax.experimental import pallas as pl
from jax.experimental.pallas import tpu as pltpu

_EPS = 1e-5  # nn.BatchNorm2d default


def _vmem_capacity_bytes():
    """Physical VMEM capacity (falls back to the v7x per-core 64 MiB)."""
    try:
        info = pltpu.get_tpu_info()
        cap = getattr(info, "vmem_capacity_bytes", None)
        if cap:
            return int(cap)
    except Exception:
        pass
    return 64 * 1024 * 1024


def _pick_tile_h(h0, n_batch, dil_c, wc, w0, cp, out_bytes, fixed_bytes, budget):
    """Largest divisor of h0 whose per-tile VMEM footprint fits the budget.

    When n_batch == 1, additionally prefer >= 2 row slabs so a v7x megacore
    (2 TensorCores, both grid axes marked parallel) gets work on both cores.
    """
    def var_bytes(th):
        act = (th + 2 * dil_c) * wc * cp * 2          # bf16 BN+ReLU scratch
        slab = th * w0 * 9 * cp * 2                   # bf16 im2col scratch
        out = 2 * th * w0 * cp * out_bytes            # double-buffered out block
        return act + slab + out

    divs = [d for d in range(1, h0 + 1) if h0 % d == 0]
    feasible = [d for d in divs if fixed_bytes + var_bytes(d) <= budget] or [1]
    best = max(feasible)
    if n_batch == 1 and best == h0:
        smaller = [d for d in feasible if d < h0]
        if smaller:
            best = max(smaller)
    return best


def _dil3_kernel(tile_h, w0, dil_c, stride, h_in, w_in,
                 xc_ref, scale_ref, shift_ref, comb_ref,
                 out_ref, act_ref, slab_ref):
    """One (batch, H-row-slab) grid point of the fused Dil3 forward."""
    TH = tile_h
    RW = TH + 2 * dil_c                        # compact rows (incl. tap halo)
    Wc = xc_ref.shape[2]
    Cp = xc_ref.shape[3]
    row0 = pl.program_id(1) * TH               # first compact row of this slab

    # ---- BN (inference affine) + ReLU + padding-ring mask, one fused pass ----
    xw = xc_ref[:, pl.ds(row0, RW), :, :].astype(jnp.float32)   # (1, RW, Wc, Cp)
    y = jnp.maximum(xw * scale_ref[...] + shift_ref[...], 0.0)
    # Interior mask built in-registers (compact index * stride = padded index).
    # Padded positions must be exact zeros since torch pads *after* BN+ReLU.
    pr = (row0 + jax.lax.broadcasted_iota(jnp.int32, (1, RW, Wc, Cp), 1)) * stride
    pc = jax.lax.broadcasted_iota(jnp.int32, (1, RW, Wc, Cp), 2) * stride
    interior = (pr >= 2) & (pr < h_in + 2) & (pc >= 2) & (pc < w_in + 2)
    act_ref[...] = jnp.where(interior, y, 0.0).astype(jnp.bfloat16)

    # ---- im2col: the 9 dilation taps concatenated on the lane (channel) axis --
    for k in range(9):
        di, dj = k // 3, k % 3
        r0 = di * dil_c
        c0 = dj * dil_c
        slab_ref[:, :, :, k * Cp:(k + 1) * Cp] = \
            act_ref[:, r0:r0 + TH, c0:c0 + w0, :]

    # ---- one stacked matmul: (TH*W0, 9*Cp) @ (9*Cp, Cp), MXU f32 accumulation
    res = jnp.dot(slab_ref[...].reshape(TH * w0, 9 * Cp), comb_ref[...],
                  preferred_element_type=jnp.float32)
    out_ref[...] = res.reshape(1, TH, w0, Cp).astype(out_ref.dtype)


def init_dil3_params(key, C):
    """Deterministic synthetic parameters matching the torch module's shapes."""
    ks = jax.random.split(key, 6)
    return dict(
        gamma=1.0 + 0.1 * jax.random.normal(ks[0], (C,), jnp.float32),
        beta=0.1 * jax.random.normal(ks[1], (C,), jnp.float32),
        mean=0.1 * jax.random.normal(ks[2], (C,), jnp.float32),
        var=1.0 + 0.1 * jnp.abs(jax.random.normal(ks[3], (C,), jnp.float32)),
        # torch Conv2d(C, C, 3, dilation=2).weight -> (C_out, C_in, 3, 3)
        dil_w=0.2 * jax.random.normal(ks[4], (C, C, 3, 3), jnp.float32),
        # torch Conv2d(C, C, 1).weight -> (C_out, C_in)
        pw_w=0.3 * jax.random.normal(ks[5], (C, C), jnp.float32),
    )


def dil3_forward(x_nchw, params, reduction, out_dtype=jnp.float32):
    """Pallas implementation of Dil3.forward. Input/output are NCHW like torch."""
    stride = 2 if reduction else 1
    N, C, H, W = x_nchw.shape
    H0 = (H - 1) // stride + 1                 # output spatial size
    W0 = (W - 1) // stride + 1
    dil_c = 2 // stride                        # tap pitch in compact coordinates
    Cp = ((C + 127) // 128) * 128              # lane-dense channel count

    # NCHW -> NHWC, F.pad(2), de-interleave for stride 2 (dilation-2 taps only
    # touch even rows/cols), zero-pad channels to Cp, cast to bf16 — XLA fuses
    # this into one HBM pass feeding the kernel.
    x = jnp.transpose(x_nchw, (0, 2, 3, 1)).astype(jnp.float32)
    xp = jnp.pad(x, ((0, 0), (2, 2), (2, 2), (0, Cp - C)))
    xc = xp[:, ::stride, ::stride, :].astype(jnp.bfloat16)
    Hc, Wc = xc.shape[1], xc.shape[2]          # == H0 + 2*dil_c, W0 + 2*dil_c

    # Eval-mode BatchNorm folded into one per-channel affine (f32, lane-padded;
    # padded channels get scale=shift=0 so they stay exactly zero after ReLU).
    scale = params['gamma'] / jnp.sqrt(params['var'] + _EPS)
    shift = params['beta'] - params['mean'] * scale
    scale_p = jnp.pad(scale, (0, Cp - C)).reshape(1, Cp).astype(jnp.float32)
    shift_p = jnp.pad(shift, (0, Cp - C)).reshape(1, Cp).astype(jnp.float32)

    # Fold the dilated 3x3 conv with the trailing 1x1 conv:
    #   comb[k, i, o] = sum_m dil_w[m, i, kh, kw] * pw_w[o, m],   k = kh*3 + kw
    # stacked to (9*Cp, Cp) so the kernel does a single im2col matmul.
    wd = jnp.transpose(params['dil_w'], (2, 3, 1, 0)).reshape(9, C, C)  # k,i,m
    comb = jnp.einsum('kim,om->kio', wd, params['pw_w'],
                      precision=jax.lax.Precision.HIGHEST)
    comb_p = jnp.pad(comb, ((0, 0), (0, Cp - C), (0, Cp - C)))
    comb_p = comb_p.reshape(9 * Cp, Cp).astype(jnp.bfloat16)

    # Generation-aware VMEM limit and tile-height budget.
    out_bytes = jnp.dtype(out_dtype).itemsize
    vmem_cap = _vmem_capacity_bytes()
    vmem_limit = min(int(vmem_cap * 0.75), 100 * 1024 * 1024)
    fixed = (2 * Hc * Wc * Cp * 2          # double-buffered resident image (bf16)
             + 2 * 9 * Cp * Cp * 2         # double-buffered comb (bf16)
             + 4 * Cp * 4)                 # scale/shift
    TH = _pick_tile_h(H0, N, dil_c, Wc, W0, Cp, out_bytes,
                      fixed_bytes=fixed, budget=int(vmem_limit * 0.7))
    n_t = H0 // TH
    RW = TH + 2 * dil_c

    kernel = functools.partial(_dil3_kernel, TH, W0, dil_c, stride, H, W)

    out_nhwc = pl.pallas_call(
        kernel,
        out_shape=jax.ShapeDtypeStruct((N, H0, W0, Cp), out_dtype),
        grid=(N, n_t),
        in_specs=[
            # Per-batch compacted image stays VMEM-resident across the t axis
            # (block index only depends on n -> no re-fetch while t varies).
            pl.BlockSpec((1, Hc, Wc, Cp), lambda n, t: (n, 0, 0, 0)),
            pl.BlockSpec((1, Cp), lambda n, t: (0, 0)),
            pl.BlockSpec((1, Cp), lambda n, t: (0, 0)),
            pl.BlockSpec((9 * Cp, Cp), lambda n, t: (0, 0)),
        ],
        # Output row-slabs stream out lane-dense (last dim Cp = multiple of 128).
        out_specs=pl.BlockSpec((1, TH, W0, Cp), lambda n, t: (n, t, 0, 0)),
        scratch_shapes=[
            pltpu.VMEM((1, RW, Wc, Cp), jnp.bfloat16),       # BN+ReLU activations
            pltpu.VMEM((1, TH, W0, 9 * Cp), jnp.bfloat16),   # im2col slab
        ],
        compiler_params=pltpu.CompilerParams(
            dimension_semantics=("parallel", "parallel"),
            vmem_limit_bytes=vmem_limit,
        ),
    )(xc, scale_p, shift_p, comb_p)

    out = out_nhwc[..., :C]                       # drop channel lane-padding
    return jnp.transpose(out, (0, 3, 1, 2))       # NHWC -> NCHW


def dil3_reference(x_nchw, params, reduction):
    """Pure-JAX reference (eval-mode BN), used for correctness checking."""
    stride = 2 if reduction else 1
    x = jnp.transpose(x_nchw, (0, 2, 3, 1)).astype(jnp.float32)
    scale = params['gamma'] / jnp.sqrt(params['var'] + _EPS)
    y = (x - params['mean']) * scale + params['beta']
    y = jnp.maximum(y, 0.0)
    y = jnp.pad(y, ((0, 0), (2, 2), (2, 2), (0, 0)))
    w_hwio = jnp.transpose(params['dil_w'], (2, 3, 1, 0))       # (3,3,Cin,Cout)
    y = jax.lax.conv_general_dilated(
        y, w_hwio, window_strides=(stride, stride), padding='VALID',
        rhs_dilation=(2, 2), dimension_numbers=('NHWC', 'HWIO', 'NHWC'),
        precision=jax.lax.Precision.HIGHEST)
    y = jnp.einsum('nhwo,po->nhwp', y, params['pw_w'],
                   precision=jax.lax.Precision.HIGHEST)
    return jnp.transpose(y, (0, 3, 1, 2))


if __name__ == "__main__":
    key = jax.random.PRNGKey(0)
    kx, kp = jax.random.split(key)

    N, C, H, W = 2, 16, 16, 16
    x = jax.random.normal(kx, (N, C, H, W), jnp.float32)
    params = init_dil3_params(kp, C)

    for reduction in (False, True):
        out = jax.block_until_ready(dil3_forward(x, params, reduction))
        ref = dil3_reference(x, params, reduction)
        assert out.shape == ref.shape, (out.shape, ref.shape)
        err = float(jnp.max(jnp.abs(out - ref)))
        tol = 3e-2 * float(jnp.max(jnp.abs(ref))) + 1e-3    # bf16 matmul path
        assert err < tol, f"reduction={reduction}: max abs err {err} (tol {tol})"

    print("KERNEL_OK")
</pallas_src>

<mosaic_0001>
module attributes {stable_mosaic.version = 11 : i64} {
  func.func @_dil3_kernel(%arg0: i32, %arg1: i32, %arg2: memref<1x20x20x128xbf16, #tpu.memory_space<vmem>>, %arg3: memref<1x128xf32, #tpu.memory_space<vmem>>, %arg4: memref<1x128xf32, #tpu.memory_space<vmem>>, %arg5: memref<1152x128xbf16, #tpu.memory_space<vmem>>, %arg6: memref<1x16x16x128xf32, #tpu.memory_space<vmem>>, %arg7: memref<1x20x20x128xbf16, #tpu.memory_space<vmem>>, %arg8: memref<1x16x16x1152xbf16, #tpu.memory_space<vmem>>) attributes {dimension_semantics = [#tpu.dimension_semantics<parallel>, #tpu.dimension_semantics<parallel>], iteration_bounds = array<i64: 2, 1>, scalar_prefetch = 0 : i64, scratch_operands = 2 : i64, tpu.core_type = #tpu.core_type<tc>, window_params = [{transform_indices = @transform_0, window_bounds = array<i64: 1, 20, 20, 128>}, {pipeline_mode = #tpu.pipeline_mode<synchronous>, transform_indices = @transform_1, window_bounds = array<i64: 1, 128>}, {pipeline_mode = #tpu.pipeline_mode<synchronous>, transform_indices = @transform_2, window_bounds = array<i64: 1, 128>}, {pipeline_mode = #tpu.pipeline_mode<synchronous>, transform_indices = @transform_3, window_bounds = array<i64: 1152, 128>}, {transform_indices = @transform_4, window_bounds = array<i64: 1, 16, 16, 128>}]} {
    %c16_i32 = arith.constant 16 : i32
    %0 = arith.muli %arg1, %c16_i32 : i32
    %c0 = arith.constant 0 : index
    %1 = arith.index_cast %0 : i32 to index
    %c0_0 = arith.constant 0 : index
    %c0_1 = arith.constant 0 : index
    %2 = vector.load %arg2[%c0, %1, %c0_0, %c0_1] : memref<1x20x20x128xbf16, #tpu.memory_space<vmem>>, vector<1x20x20x128xbf16>
    %3 = arith.extf %2 : vector<1x20x20x128xbf16> to vector<1x20x20x128xf32>
    %c0_2 = arith.constant 0 : index
    %c0_3 = arith.constant 0 : index
    %4 = vector.load %arg3[%c0_2, %c0_3] : memref<1x128xf32, #tpu.memory_space<vmem>>, vector<1x128xf32>
    %5 = vector.shape_cast %4 : vector<1x128xf32> to vector<1x1x1x128xf32>
    %6 = vector.broadcast %5 : vector<1x1x1x128xf32> to vector<1x20x20x128xf32>
    %7 = arith.mulf %3, %6 : vector<1x20x20x128xf32>
    %c0_4 = arith.constant 0 : index
    %c0_5 = arith.constant 0 : index
    %8 = vector.load %arg4[%c0_4, %c0_5] : memref<1x128xf32, #tpu.memory_space<vmem>>, vector<1x128xf32>
    %9 = vector.shape_cast %8 : vector<1x128xf32> to vector<1x1x1x128xf32>
    %10 = vector.broadcast %9 : vector<1x1x1x128xf32> to vector<1x20x20x128xf32>
    %11 = arith.addf %7, %10 : vector<1x20x20x128xf32>
    %cst = arith.constant 0.000000e+00 : f32
    %12 = vector.broadcast %cst : f32 to vector<1x20x20x128xf32>
    %13 = arith.maximumf %11, %12 : vector<1x20x20x128xf32>
    %14 = tpu.iota {dimensions = array<i32: 1>} : vector<1x20x20x128xi32>
    %15 = vector.broadcast %0 : i32 to vector<1x20x20x128xi32>
    %16 = arith.addi %15, %14 : vector<1x20x20x128xi32>
    %c1_i32 = arith.constant 1 : i32
    %17 = vector.broadcast %c1_i32 : i32 to vector<1x20x20x128xi32>
    %18 = arith.muli %16, %17 : vector<1x20x20x128xi32>
    %19 = tpu.iota {dimensions = array<i32: 2>} : vector<1x20x20x128xi32>
    %c1_i32_6 = arith.constant 1 : i32
    %20 = vector.broadcast %c1_i32_6 : i32 to vector<1x20x20x128xi32>
    %21 = arith.muli %19, %20 : vector<1x20x20x128xi32>
    %c2_i32 = arith.constant 2 : i32
    %22 = vector.broadcast %c2_i32 : i32 to vector<1x20x20x128xi32>
    %23 = arith.cmpi sge, %18, %22 : vector<1x20x20x128xi32>
    %c18_i32 = arith.constant 18 : i32
    %24 = vector.broadcast %c18_i32 : i32 to vector<1x20x20x128xi32>
    %25 = arith.cmpi slt, %18, %24 : vector<1x20x20x128xi32>
    %26 = arith.andi %23, %25 : vector<1x20x20x128xi1>
    %c2_i32_7 = arith.constant 2 : i32
    %27 = vector.broadcast %c2_i32_7 : i32 to vector<1x20x20x128xi32>
    %28 = arith.cmpi sge, %21, %27 : vector<1x20x20x128xi32>
    %29 = arith.andi %26, %28 : vector<1x20x20x128xi1>
    %c18_i32_8 = arith.constant 18 : i32
    %30 = vector.broadcast %c18_i32_8 : i32 to vector<1x20x20x128xi32>
    %31 = arith.cmpi slt, %21, %30 : vector<1x20x20x128xi32>
    %32 = arith.andi %29, %31 : vector<1x20x20x128xi1>
    %cst_9 = arith.constant 0.000000e+00 : f32
    %33 = vector.broadcast %cst_9 : f32 to vector<1x20x20x128xf32>
    %34 = arith.select %32, %13, %33 : vector<1x20x20x128xi1>, vector<1x20x20x128xf32>
    %35 = arith.truncf %34 : vector<1x20x20x128xf32> to vector<1x20x20x128xbf16>
    %c0_10 = arith.constant 0 : index
    %c0_11 = arith.constant 0 : index
    %c0_12 = arith.constant 0 : index
    %c0_13 = arith.constant 0 : index
    %36 = vector.load %arg7[%c0_10, %c0_11, %c0_12, %c0_13] : memref<1x20x20x128xbf16, #tpu.memory_space<vmem>>, vector<1x20x20x128xbf16>
    tpu.vector_store %arg7[%c0_10, %c0_11, %c0_12, %c0_13], %35 {strides = array<i32>} : memref<1x20x20x128xbf16, #tpu.memory_space<vmem>>, vector<1x20x20x128xbf16>,
    %c0_14 = arith.constant 0 : index
    %c0_15 = arith.constant 0 : index
    %c0_16 = arith.constant 0 : index
    %c0_17 = arith.constant 0 : index
    %37 = vector.load %arg7[%c0_14, %c0_15, %c0_16, %c0_17] : memref<1x20x20x128xbf16, #tpu.memory_space<vmem>>, vector<1x16x16x128xbf16>
    %c0_18 = arith.constant 0 : index
    %c0_19 = arith.constant 0 : index
    %c0_20 = arith.constant 0 : index
    %c0_21 = arith.constant 0 : index
    %38 = vector.load %arg8[%c0_18, %c0_19, %c0_20, %c0_21] : memref<1x16x16x1152xbf16, #tpu.memory_space<vmem>>, vector<1x16x16x128xbf16>
    tpu.vector_store %arg8[%c0_18, %c0_19, %c0_20, %c0_21], %37 {strides = array<i32>} : memref<1x16x16x1152xbf16, #tpu.memory_space<vmem>>, vector<1x16x16x128xbf16>,
    %c0_22 = arith.constant 0 : index
    %c0_23 = arith.constant 0 : index
    %c2 = arith.constant 2 : index
    %c0_24 = arith.constant 0 : index
    %39 = vector.load %arg7[%c0_22, %c0_23, %c2, %c0_24] : memref<1x20x20x128xbf16, #tpu.memory_space<vmem>>, vector<1x16x16x128xbf16>
    %c0_25 = arith.constant 0 : index
    %c0_26 = arith.constant 0 : index
    %c0_27 = arith.constant 0 : index
    %c128 = arith.constant 128 : index
    %40 = vector.load %arg8[%c0_25, %c0_26, %c0_27, %c128] : memref<1x16x16x1152xbf16, #tpu.memory_space<vmem>>, vector<1x16x16x128xbf16>
    tpu.vector_store %arg8[%c0_25, %c0_26, %c0_27, %c128], %39 {strides = array<i32>} : memref<1x16x16x1152xbf16, #tpu.memory_space<vmem>>, vector<1x16x16x128xbf16>,
    %c0_28 = arith.constant 0 : index
    %c0_29 = arith.constant 0 : index
    %c4 = arith.constant 4 : index
    %c0_30 = arith.constant 0 : index
    %41 = vector.load %arg7[%c0_28, %c0_29, %c4, %c0_30] : memref<1x20x20x128xbf16, #tpu.memory_space<vmem>>, vector<1x16x16x128xbf16>
    %c0_31 = arith.constant 0 : index
    %c0_32 = arith.constant 0 : index
    %c0_33 = arith.constant 0 : index
    %c256 = arith.constant 256 : index
    %42 = vector.load %arg8[%c0_31, %c0_32, %c0_33, %c256] : memref<1x16x16x1152xbf16, #tpu.memory_space<vmem>>, vector<1x16x16x128xbf16>
    tpu.vector_store %arg8[%c0_31, %c0_32, %c0_33, %c256], %41 {strides = array<i32>} : memref<1x16x16x1152xbf16, #tpu.memory_space<vmem>>, vector<1x16x16x128xbf16>,
    %c0_34 = arith.constant 0 : index
    %c2_35 = arith.constant 2 : index
    %c0_36 = arith.constant 0 : index
    %c0_37 = arith.constant 0 : index
    %43 = vector.load %arg7[%c0_34, %c2_35, %c0_36, %c0_37] : memref<1x20x20x128xbf16, #tpu.memory_space<vmem>>, vector<1x16x16x128xbf16>
    %c0_38 = arith.constant 0 : index
    %c0_39 = arith.constant 0 : index
    %c0_40 = arith.constant 0 : index
    %c384 = arith.constant 384 : index
    %44 = vector.load %arg8[%c0_38, %c0_39, %c0_40, %c384] : memref<1x16x16x1152xbf16, #tpu.memory_space<vmem>>, vector<1x16x16x128xbf16>
    tpu.vector_store %arg8[%c0_38, %c0_39, %c0_40, %c384], %43 {strides = array<i32>} : memref<1x16x16x1152xbf16, #tpu.memory_space<vmem>>, vector<1x16x16x128xbf16>,
    %c0_41 = arith.constant 0 : index
    %c2_42 = arith.constant 2 : index
    %c2_43 = arith.constant 2 : index
    %c0_44 = arith.constant 0 : index
    %45 = vector.load %arg7[%c0_41, %c2_42, %c2_43, %c0_44] : memref<1x20x20x128xbf16, #tpu.memory_space<vmem>>, vector<1x16x16x128xbf16>
    %c0_45 = arith.constant 0 : index
    %c0_46 = arith.constant 0 : index
    %c0_47 = arith.constant 0 : index
    %c512 = arith.constant 512 : index
    %46 = vector.load %arg8[%c0_45, %c0_46, %c0_47, %c512] : memref<1x16x16x1152xbf16, #tpu.memory_space<vmem>>, vector<1x16x16x128xbf16>
    tpu.vector_store %arg8[%c0_45, %c0_46, %c0_47, %c512], %45 {strides = array<i32>} : memref<1x16x16x1152xbf16, #tpu.memory_space<vmem>>, vector<1x16x16x128xbf16>,
    %c0_48 = arith.constant 0 : index
    %c2_49 = arith.constant 2 : index
    %c4_50 = arith.constant 4 : index
    %c0_51 = arith.constant 0 : index
    %47 = vector.load %arg7[%c0_48, %c2_49, %c4_50, %c0_51] : memref<1x20x20x128xbf16, #tpu.memory_space<vmem>>, vector<1x16x16x128xbf16>
    %c0_52 = arith.constant 0 : index
    %c0_53 = arith.constant 0 : index
    %c0_54 = arith.constant 0 : index
    %c640 = arith.constant 640 : index
    %48 = vector.load %arg8[%c0_52, %c0_53, %c0_54, %c640] : memref<1x16x16x1152xbf16, #tpu.memory_space<vmem>>, vector<1x16x16x128xbf16>
    tpu.vector_store %arg8[%c0_52, %c0_53, %c0_54, %c640], %47 {strides = array<i32>} : memref<1x16x16x1152xbf16, #tpu.memory_space<vmem>>, vector<1x16x16x128xbf16>,
    %c0_55 = arith.constant 0 : index
    %c4_56 = arith.constant 4 : index
    %c0_57 = arith.constant 0 : index
    %c0_58 = arith.constant 0 : index
    %49 = vector.load %arg7[%c0_55, %c4_56, %c0_57, %c0_58] : memref<1x20x20x128xbf16, #tpu.memory_space<vmem>>, vector<1x16x16x128xbf16>
    %c0_59 = arith.constant 0 : index
    %c0_60 = arith.constant 0 : index
    %c0_61 = arith.constant 0 : index
    %c768 = arith.constant 768 : index
    %50 = vector.load %arg8[%c0_59, %c0_60, %c0_61, %c768] : memref<1x16x16x1152xbf16, #tpu.memory_space<vmem>>, vector<1x16x16x128xbf16>
    tpu.vector_store %arg8[%c0_59, %c0_60, %c0_61, %c768], %49 {strides = array<i32>} : memref<1x16x16x1152xbf16, #tpu.memory_space<vmem>>, vector<1x16x16x128xbf16>,
    %c0_62 = arith.constant 0 : index
    %c4_63 = arith.constant 4 : index
    %c2_64 = arith.constant 2 : index
    %c0_65 = arith.constant 0 : index
    %51 = vector.load %arg7[%c0_62, %c4_63, %c2_64, %c0_65] : memref<1x20x20x128xbf16, #tpu.memory_space<vmem>>, vector<1x16x16x128xbf16>
    %c0_66 = arith.constant 0 : index
    %c0_67 = arith.constant 0 : index
    %c0_68 = arith.constant 0 : index
    %c896 = arith.constant 896 : index
    %52 = vector.load %arg8[%c0_66, %c0_67, %c0_68, %c896] : memref<1x16x16x1152xbf16, #tpu.memory_space<vmem>>, vector<1x16x16x128xbf16>
    tpu.vector_store %arg8[%c0_66, %c0_67, %c0_68, %c896], %51 {strides = array<i32>} : memref<1x16x16x1152xbf16, #tpu.memory_space<vmem>>, vector<1x16x16x128xbf16>,
    %c0_69 = arith.constant 0 : index
    %c4_70 = arith.constant 4 : index
    %c4_71 = arith.constant 4 : index
    %c0_72 = arith.constant 0 : index
    %53 = vector.load %arg7[%c0_69, %c4_70, %c4_71, %c0_72] : memref<1x20x20x128xbf16, #tpu.memory_space<vmem>>, vector<1x16x16x128xbf16>
    %c0_73 = arith.constant 0 : index
    %c0_74 = arith.constant 0 : index
    %c0_75 = arith.constant 0 : index
    %c1024 = arith.constant 1024 : index
    %54 = vector.load %arg8[%c0_73, %c0_74, %c0_75, %c1024] : memref<1x16x16x1152xbf16, #tpu.memory_space<vmem>>, vector<1x16x16x128xbf16>
    tpu.vector_store %arg8[%c0_73, %c0_74, %c0_75, %c1024], %53 {strides = array<i32>} : memref<1x16x16x1152xbf16, #tpu.memory_space<vmem>>, vector<1x16x16x128xbf16>,
    %c0_76 = arith.constant 0 : index
    %c0_77 = arith.constant 0 : index
    %c0_78 = arith.constant 0 : index
    %c0_79 = arith.constant 0 : index
    %55 = vector.load %arg8[%c0_76, %c0_77, %c0_78, %c0_79] : memref<1x16x16x1152xbf16, #tpu.memory_space<vmem>>, vector<1x16x16x1152xbf16>
    %56 = vector.shape_cast %55 : vector<1x16x16x1152xbf16> to vector<256x1152xbf16>
    %c0_80 = arith.constant 0 : index
    %c0_81 = arith.constant 0 : index
    %57 = vector.load %arg5[%c0_80, %c0_81] : memref<1152x128xbf16, #tpu.memory_space<vmem>>, vector<1152x128xbf16>
    %cst_82 = arith.constant dense<0.000000e+00> : vector<256x128xf32>
    %58 = tpu.matmul %56, %57, %cst_82 {dimension_numbers = #tpu.dot_dimension_numbers<[1], [0], [0], [1], [0, 0, 1, 1], [], []>} : vector<256x1152xbf16>, vector<1152x128xbf16>, vector<256x128xf32> -> vector<256x128xf32>
    %59 = vector.shape_cast %58 : vector<256x128xf32> to vector<1x16x16x128xf32>
    %c0_83 = arith.constant 0 : index
    %c0_84 = arith.constant 0 : index
    %c0_85 = arith.constant 0 : index
    %c0_86 = arith.constant 0 : index
    %60 = vector.load %arg6[%c0_83, %c0_84, %c0_85, %c0_86] : memref<1x16x16x128xf32, #tpu.memory_space<vmem>>, vector<1x16x16x128xf32>
    tpu.vector_store %arg6[%c0_83, %c0_84, %c0_85, %c0_86], %59 {strides = array<i32>} : memref<1x16x16x128xf32, #tpu.memory_space<vmem>>, vector<1x16x16x128xf32>,
    return
  }
  func.func @transform_0(%arg0: i32, %arg1: i32) -> (i32, i32, i32, i32) {
    %c0_i32 = arith.constant 0 : i32
    %c0_i32_0 = arith.constant 0 : i32
    %c0_i32_1 = arith.constant 0 : i32
    %c0_i32_2 = arith.constant 0 : i32
    return %arg0, %c0_i32, %c0_i32_0, %c0_i32_1 : i32, i32, i32, i32
  }
  func.func @transform_1(%arg0: i32, %arg1: i32) -> (i32, i32) {
    %c0_i32 = arith.constant 0 : i32
    %c0_i32_0 = arith.constant 0 : i32
    %c0_i32_1 = arith.constant 0 : i32
    return %c0_i32, %c0_i32_0 : i32, i32
  }
  func.func @transform_2(%arg0: i32, %arg1: i32) -> (i32, i32) {
    %c0_i32 = arith.constant 0 : i32
    %c0_i32_0 = arith.constant 0 : i32
    %c0_i32_1 = arith.constant 0 : i32
    return %c0_i32, %c0_i32_0 : i32, i32
  }
  func.func @transform_3(%arg0: i32, %arg1: i32) -> (i32, i32) {
    %c0_i32 = arith.constant 0 : i32
    %c0_i32_0 = arith.constant 0 : i32
    %c0_i32_1 = arith.constant 0 : i32
    return %c0_i32, %c0_i32_0 : i32, i32
  }
  func.func @transform_4(%arg0: i32, %arg1: i32) -> (i32, i32, i32, i32) {
    %c0_i32 = arith.constant 0 : i32
    %c0_i32_0 = arith.constant 0 : i32
    %c0_i32_1 = arith.constant 0 : i32
    return %arg0, %arg1, %c0_i32, %c0_i32_0 : i32, i32, i32, i32
  }
}

</mosaic_0001>

<bundles_post_ra>
// kernel: tpu_custom_call.1
= control target key start
LH: loop header
LB: loop body
LE: loop exit
PB: predicated region body
PF: predicated region fallthrough
CT: control target
= control target key end

     0   :  { %9 = vsyncpa [#allocation5], 0  ;;  %s8305_s0 = inlined_call_operand.vmem [shape: bf16[2,20,20,128], index: 0, kind: input, shape index: {}]   ;;  %s8306_s1 = inlined_call_operand.vmem [shape: f32[1,128], index: 1, kind: input, shape index: {}]   ;;  %s8307_s2 = inlined_call_operand.vmem [shape: f32[1,128], index: 2, kind: input, shape index: {}]   ;;  %s8308_s3 = inlined_call_operand.vmem [shape: bf16[1152,128], index: 3, kind: input, shape index: {}]   ;;  %s8309_s4 = inlined_call_operand.hbm [shape: f32[2,16,16,128], index: 4, kind: output, shape index: {}]  }
   0x1   :  { %11 = vsyncpa [#allocation5 + $0x1], 0  ;;  %s6864_s15 = smov 0   ;;  %s6866_s16 = smov 0  }
   0x2   :  { %s6868_s17 = smov 0   ;;  %s6870_s18 = smov 0  }
   0x3   :  { %s6872_s19 = smov 0   ;;  %s6874_s20 = smov 0  }
   0x4 LB: > { %s5353_s21 = sadd.s32 4294967295, %s6833_s20   ;;  %s5354_s22 = sadd.s32 4294967294, %s6833_s20   ;;  %s6833_s20 = sphi %s6874_s20, %s17_s20   ;;  %s6829_s19 = sphi %s6872_s19, %s8346_s19   ;;  %s6825_s18 = sphi %s6870_s18, %s8345_s18   ;;  %s6821_s17 = sphi %s6868_s17, %s8344_s17   ;;  %s6817_s16 = sphi %s6866_s16, %s8343_s16   ;;  %s6813_s15 = sphi %s6864_s15, %s8342_s15  }
   0x5   : > { %s29_s23 = sadd.s32 1, %s6829_s19  ;;  %s127_s24 = sadd.s32 1, %s6821_s17 }
   0x6   : > { %p31_p0 = scmp.ge.s32.totalorder %s29_s23, 2  ;;  %p137_p1 = scmp.ne.s32.totalorder %s6821_s17, %s6817_s16 }
   0x7   : > { %p138_p2 = scmp.eq.s32.totalorder %s5353_s21, 1  ;;  %p143_p3 = scmp.ne.s32.totalorder %s6817_s16, %s6813_s15 }
   0x8   : > { %s8348_s23 = smov (%p31_p0, %s29_s23), 0  ;;  %p144_p5 = scmp.eq.s32.totalorder %s5354_s22, 1 }
   0x9   : > { %p6904_p4 = por %p138_p2, %p137_p1  ;;  %s122_s26 = ssub.s32 %s6829_s19, %s8348_s23 }
   0xa   : > { %p5357_p6 = scmp.ge.s32.totalorder %s6833_s20, 1  ;;  %p125_p7 = scmp.eq.s32.totalorder %s122_s26, 0 }
   0xb   : > { %p6911_p8 = por %p144_p5, %p143_p3  ;;  %p179_p9 = scmp.lt.s32.totalorder %s6833_s20, 3 }
   0xc   : > { %s6917_s28 = scalar_select %p125_p7, %s6821_s17, %s127_s24  }
   0xd   : > { %p180_p10 = pnand %p5357_p6, %p179_p9 }
   0xf   : > { %183 = sbr.rel (%p180_p10) target bundleno = 656 (0x290), region = 36 }
  0x14   : > { %v6471_v0 = vld [vmem:[%s8308_s3 + $0x78] sm:$0xff]   ;;  %v6835_v2 = vmov 0.0|0.0   ;;  %v6473_v5 = vld [vmem:[%s8308_s3 + $0x70] sm:$0xff]   ;;  %v6475_v7 = vld [vmem:[%s8308_s3 + $0x68] sm:$0xff]   ;;  %p205_p11 = scmp.lt.s32.totalorder %s6825_s18, 1  ;;  %v550_v10 = vlaneseq  ;;  %vm1280_vm0 = vcmask 1042432  }
  0x15   : > { %v6472_v1 = vld [vmem:[%s8308_s3 + $0x38] sm:$0xff]   ;;  %v5362_v3 = vcombine.low %v6835_v2, %v6835_v2  ;;  %v5363_v4 = vcombine.high %v6835_v2, %v6835_v2  ;;  %5876 = vmatprep.subr.bf16.mxu0 %v6471_v0  ;;  %6396 = vmatprep.subr.bf16.mxu1 %v6471_v0  ;;  %v6474_v6 = vld [vmem:[%s8308_s3 + $0x30] sm:$0xff]   ;;  %v6476_v8 = vld [vmem:[%s8308_s3 + $0x28] sm:$0xff]   ;;  %vm1281_vm1 = vcmask 1046532   ;;  %vm1555_vm5 = vcmask 1041408   ;;  %s5787_s29 = sshll.u32 %s6825_s18, 12 }
  0x16   : > { %5877 = vmatpush3.bf16.msra.mxu0 %v6472_v1  ;;  %6404 = vmatpush3.bf16.msra.mxu1 %v6472_v1  ;;  %v6477_v9 = vld [vmem:[%s8308_s3 + $0x60] sm:$0xff]   ;;  %s6942_s24 = scalar_select %p205_p11, %s6825_s18, 1  ;;  %v6479_v12 = vld [vmem:[%s8308_s3 + $0x58] sm:$0xff]   ;;  %v6951_v13 = vshrl.u32 %v550_v10, 7  ;;  %v6481_v15 = vld [vmem:[%s8308_s3 + $0x50] sm:$0xff]   ;;  %vm1556_vm6 = vcmask 1045508  }
  0x17   : > { %1060 = vst [vmem:[#allocation2] sm:$0xf] %v5362_v3  ;;  %1061 = vst [vmem:[#allocation2 + $0x4] sm:$0xf] %v5363_v4  ;;  %5878 = vmatprep.subr.bf16.mxu0 %v6473_v5  ;;  %6397 = vmatprep.subr.bf16.mxu1 %v6473_v5  ;;  %v6478_v11 = vld [vmem:[%s8308_s3 + $0x20] sm:$0xff]   ;;  %v6480_v14 = vld [vmem:[%s8308_s3 + $0x18] sm:$0xff]   ;;  %s8253_s7 = scalar_lea.hbm %s8309_s4, %s5787_s29 }
  0x18   : > { %1062 = vst [vmem:[#allocation2 + $0x8] sm:$0x3] %v5362_v3  ;;  %1063 = vst [vmem:[#allocation2 + $0xc] sm:$0xf] %v5362_v3  ;;  %s6412_s6 = smul.u32 240, %s6942_s24  ;;  %v6482_v19 = vld [vmem:[%s8308_s3 + $0x10] sm:$0xff]  }
  0x19   : > { %1064 = vst [vmem:[#allocation2 + $0x10] sm:$0xf] %v5363_v4  ;;  %1065 = vst [vmem:[#allocation2 + $0x14] sm:$0x3] %v5362_v3  ;;  %v6973_v24 = vadd.s32 16, %v6951_v13  ;;  %v6483_v25 = vld [vmem:[%s8308_s3 + $0x48] sm:$0xff]  }
  0x1a   : > { %1114 = vst [vmem:[#allocation2 + $0xd8] sm:$0xf] %v5362_v3  ;;  %1115 = vst [vmem:[#allocation2 + $0xdc] sm:$0xf] %v5363_v4  ;;  %5879 = vmatpush3.bf16.msra.mxu0 %v6474_v6  ;;  %6405 = vmatpush3.bf16.msra.mxu1 %v6474_v6  ;;  %s6970_s21 = scalar_lea.vmem %s8305_s0, %s6412_s6  ;;  %v6985_v43 = vld [vmem:[%s8306_s1] ss:$0 sm:$0xff] }
  0x1b   : > { %1116 = vst [vmem:[#allocation2 + $0xe0] sm:$0x3] %v5362_v3  ;;  %1117 = vst [vmem:[#allocation2 + $0xe4] sm:$0xf] %v5362_v3  ;;  %5880 = vmatprep.subr.bf16.mxu0 %v6475_v7  ;;  %6398 = vmatprep.subr.bf16.mxu1 %v6475_v7  ;;  %v5865_v37 = vld [vmem:[%s6970_s21 + $0x90] sm:$0xff]   ;;  %v6484_v45 = vld [vmem:[%s8308_s3 + $0x8] sm:$0xff]  }
  0x1c   : > { %1118 = vst [vmem:[#allocation2 + $0xe8] sm:$0xf] %v5363_v4  ;;  %1119 = vst [vmem:[#allocation2 + $0xec] sm:$0x3] %v5362_v3  ;;  %v254_v38 = vld [vmem:[%s6970_s21 + $0x98] sm:$0x3]  ;;  %v5810_v40 = vunpack.c.l.bf16 %v5865_v37  ;;  %v5811_v41 = vunpack.c.h.bf16 %v5865_v37 }
  0x1d   : > { %vm6963_vm2 = vmor %vm1280_vm0, %vm1281_vm1  ;;  %v314_v42 = vunpack.c.l.bf16 %v254_v38  ;;  %v6990_v44 = vld [vmem:[%s8307_s2] ss:$0 sm:$0xff]  ;;  %vm614_vm3 = vcmp.ge.s32.totalorder %v6951_v13, 2  ;;  %vm679_vm4 = vcmp.lt.s32.totalorder %v6973_v24, 18  ;;  %v6495_v58 = vld [vmem:[%s8308_s3 + $0xf8] sm:$0xff]   ;;  %s6836_s9 = smov [#allocation4]  }
  0x1e   : > { %5881 = vmatpush3.bf16.msra.mxu0 %v6476_v8  ;;  %6406 = vmatpush3.bf16.msra.mxu1 %v6476_v8  ;;  %v1120_v16 = vld [vmem:[#allocation2] sm:$0xf]  ;;  %v1121_v17 = vld [vmem:[#allocation2 + $0x4] sm:$0xf]  ;;  %v379_v49 = vmul.f32 %v5810_v40, %v6985_v43  ;;  %v380_v50 = vmul.f32 %v5811_v41, %v6985_v43  ;;  %v6499_v62 = vld [vmem:[%s8308_s3 + $0x178] sm:$0xff]   ;;  %s6761_s10 = sshll.u32 %s6836_s9, 4  ;;  %s6762_s10 = int_to_ptr.vmem [resolvable:$false] %s6761_s10 }
  0x1f   : > { %5882 = vmatprep.subr.bf16.mxu0 %v6477_v9  ;;  %6399 = vmatprep.subr.bf16.mxu1 %v6477_v9  ;;  %v1184_v18 = vld [vmem:[#allocation2] sm:$0xe]  ;;  %1152 = vst [vmem:[#allocation3] sm:$0xf] %v1120_v16  ;;  %1153 = vst [vmem:[#allocation3 + $0x24] sm:$0xf] %v1121_v17  ;;  %v381_v51 = vmul.f32 %v6985_v43, %v314_v42 }
  0x20   : > { %v1185_v20 = vld [vmem:[#allocation2 + $0x4] sm:$0xf]  ;;  %v1186_v21 = vld [vmem:[#allocation2 + $0x8] sm:$0x1]  ;;  %v5422_v23 = vrot.slane %v1184_v18, 9  ;;  %v446_v55 = vadd.f32 %v6990_v44, %v379_v49  ;;  %v447_v56 = vadd.f32 %v6990_v44, %v380_v50  ;;  %v5860_v63 = vld [vmem:[%s6970_s21 + $0x18] sm:$0xff]  }
  0x21   : > { %v1285_v26 = vrot.slane %v1185_v20, 5  ;;  %v1288_v27 = vrot.slane %v1186_v21, 5  ;;  %v1122_v28 = vld [vmem:[#allocation2 + $0xc] sm:$0xf]  ;;  %v1123_v29 = vld [vmem:[#allocation2 + $0x10] sm:$0xf]  ;;  %v448_v57 = vadd.f32 %v6990_v44, %v381_v51  ;;  %v5790_v4 = vunpack.c.l.bf16 %v5860_v63  ;;  %vm7182_vm7 = vmor %vm1555_vm5, %vm1556_vm6 }
  0x22   : > { %5883 = vmatpush3.bf16.msra.mxu0 %v6478_v11  ;;  %6407 = vmatpush3.bf16.msra.mxu1 %v6478_v11  ;;  %1154 = vst [vmem:[#allocation3 + $0x48] sm:$0xf] %v1122_v28  ;;  %1155 = vst [vmem:[#allocation3 + $0x6c] sm:$0xf] %v1123_v29  ;;  %v1187_v30 = vld [vmem:[#allocation2 + $0xc] sm:$0xe]  ;;  %v5791_v5 = vunpack.c.h.bf16 %v5860_v63 }
  0x23   : > { %5884 = vmatprep.subr.bf16.mxu0 %v6479_v12  ;;  %6400 = vmatprep.subr.bf16.mxu1 %v6479_v12  ;;  %v1188_v31 = vld [vmem:[#allocation2 + $0x10] sm:$0xf]  ;;  %v1189_v32 = vld [vmem:[#allocation2 + $0x14] sm:$0x1]  ;;  %v1286_v33 = vsel %vm6963_vm2, %v5422_v23, %v1285_v26  ;;  %v1287_v34 = vrot.slane %v1285_v26, 4  ;;  %v5423_v35 = vrot.slane %v1187_v30, 9 }
  0x24   : > { %v1292_v36 = vrot.slane %v1188_v31, 5  ;;  %1427 = vst [vmem:[#allocation3 + $0x4] sm:$0xf] %v1286_v33  ;;  %v1295_v39 = vrot.slane %v1189_v32, 5  ;;  %v6485_v52 = vld [vmem:[%s8308_s3 + $0x40] sm:$0xff]   ;;  %v506_v59 = vmax.f32 %v446_v55, 0.0  ;;  %v350_v16 = vmul.f32 %v5791_v5, %v6985_v43 }
  0x25   : > { %v1289_v46 = vsel %vm6963_vm2, %v1287_v34, %v1288_v27  ;;  %v6486_v54 = vld [vmem:[%s8308_s3] sm:$0xff]   ;;  %v507_v60 = vmax.f32 %v447_v56, 0.0  ;;  %v508_v61 = vmax.f32 %v448_v57, 0.0  ;;  %v6501_v3 = vld [vmem:[%s8308_s3 + $0x138] sm:$0xff]   ;;  %v227_v37 = vld [vmem:[%s6970_s21 + $0x2c] sm:$0x3] }
  0x26   : > { %5885 = vmatpush3.bf16.msra.mxu0 %v6480_v14  ;;  %6408 = vmatpush3.bf16.msra.mxu1 %v6480_v14  ;;  %v1293_v47 = vsel %vm6963_vm2, %v5423_v35, %v1292_v36  ;;  %v1294_v48 = vrot.slane %v1292_v36, 4  ;;  %1428 = vst [vmem:[#allocation3 + $0x28] sm:$0xf] %v1289_v46  ;;  %v224_v0 = vld [vmem:[%s6970_s21 + $0x20] sm:$0x3]  ;;  %v776_v1 = vsel %vm614_vm3, %v506_v59, 0.0  ;;  %v287_v57 = vunpack.c.l.bf16 %v227_v37 }
  0x27   : > { %5886 = vmatprep.subr.bf16.mxu0 %v6481_v15  ;;  %6401 = vmatprep.subr.bf16.mxu1 %v6481_v15  ;;  %1429 = vst [vmem:[#allocation3 + $0x4c] sm:$0xf] %v1293_v47  ;;  %v778_v2 = vsel %vm679_vm4, %v508_v61, 0.0  ;;  %v255_v6 = vld [vmem:[%s6970_s21 + $0x9c] sm:$0xff]   ;;  %v257_v7 = vld [vmem:[%s6970_s21 + $0xa4] sm:$0x3]  ;;  %v5848_v11 = vpack.c.bf16 %v507_v60, %v776_v1  ;;  %v284_v12 = vunpack.c.l.bf16 %v224_v0  ;;  %v349_v15 = vmul.f32 %v5790_v4, %v6985_v43 }
  0x28   : > { %v1296_v53 = vsel %vm6963_vm2, %v1294_v48, %v1295_v39  ;;  %v6487_v8 = vld [vmem:[#allocation3] ss:$36 sps:$4 sm:$0xff]   ;;  %v5771_v10 = vpack.c.bf16 %v778_v2, %v778_v2  ;;  %v315_v14 = vunpack.c.l.bf16 %v255_v6  ;;  %v316_v17 = vunpack.c.h.bf16 %v255_v6  ;;  %v225_v36 = vld [vmem:[%s6970_s21 + $0x24] sm:$0xff]   ;;  %s6763_s11 = scalar_lea.vmem %s6762_s10, 8192 }
  0x29   : > { %1430 = vst [vmem:[#allocation3 + $0x70] sm:$0xf] %v1296_v53  ;;  %v317_v18 = vunpack.c.l.bf16 %v257_v7  ;;  %5873 = vst [vmem:[#allocation2 + $0x90] sm:$0xff] %v5848_v11   ;;  %v351_v20 = vmul.f32 %v6985_v43, %v284_v12  ;;  %v416_v23 = vadd.f32 %v6990_v44, %v349_v15  ;;  %v6496_v38 = vld [vmem:[#allocation3 + $0x48] ss:$36 sps:$4 sm:$0xff]   ;;  %v285_v42 = vunpack.c.l.bf16 %v225_v36  ;;  %v6517_v4 = vld [vmem:[%s8308_s3 + $0x170] sm:$0xff]  }
  0x2a   : > { %5887 = vmatpush3.bf16.msra.mxu0 %v6482_v19  ;;  %6409 = vmatpush3.bf16.msra.mxu1 %v6482_v19  ;;  %1098 = vst [vmem:[#allocation2 + $0x98] sm:$0x3] %v5771_v10  ;;  %v382_v21 = vmul.f32 %v6985_v43, %v315_v14  ;;  %v383_v26 = vmul.f32 %v6985_v43, %v316_v17  ;;  %v286_v49 = vunpack.c.h.bf16 %v225_v36  ;;  %v260_v50 = vld [vmem:[%s6970_s21 + $0xb0] sm:$0x3] }
  0x2b   : > { %5888 = vmatprep.subr.bf16.mxu0 %v6483_v25  ;;  %6402 = vmatprep.subr.bf16.mxu1 %v6483_v25  ;;  %v417_v25 = vadd.f32 %v6990_v44, %v350_v16  ;;  %v384_v27 = vmul.f32 %v6985_v43, %v317_v18  ;;  %v418_v28 = vadd.f32 %v6990_v44, %v351_v20  ;;  %v476_v30 = vmax.f32 %v416_v23, 0.0  ;;  %v6521_v18 = vld [vmem:[%s8308_s3 + $0x130] sm:$0xff]  }
  0x2c   : > { %v449_v29 = vadd.f32 %v6990_v44, %v382_v21  ;;  %v450_v32 = vadd.f32 %v6990_v44, %v383_v26  ;;  %v353_v63 = vmul.f32 %v6985_v43, %v286_v49  ;;  %v320_v12 = vunpack.c.l.bf16 %v260_v50 }
  0x2d   : > { %v6489_v9 = vld [vmem:[#allocation3 + $0x4] ss:$36 sps:$4 sm:$0xff]   ;;  %v477_v31 = vmax.f32 %v417_v25, 0.0  ;;  %v451_v33 = vadd.f32 %v6990_v44, %v384_v27  ;;  %v478_v34 = vmax.f32 %v418_v28, 0.0  ;;  %v746_v39 = vsel %vm614_vm3, %v476_v30, 0.0 }
  0x2e   : > { %5889 = vmatpush3.bf16.msra.mxu0 %v6484_v45  ;;  %6410 = vmatpush3.bf16.msra.mxu1 %v6484_v45  ;;  %v509_v35 = vmax.f32 %v449_v29, 0.0  ;;  %v510_v40 = vmax.f32 %v450_v32, 0.0  ;;  %v5866_v45 = vld [vmem:[%s6970_s21 + $0xa8] sm:$0xff]   ;;  %v420_v6 = vadd.f32 %v6990_v44, %v353_v63  ;;  %v387_v21 = vmul.f32 %v6985_v43, %v320_v12  ;;  %v5861_v27 = vld [vmem:[%s6970_s21 + $0x30] sm:$0xff]   ;;  %v230_v28 = vld [vmem:[%s6970_s21 + $0x38] sm:$0x3] }
  0x2f   : > { %5890 = vmatprep.subr.bf16.mxu0 %v6485_v52  ;;  %6403 = vmatprep.subr.bf16.mxu1 %v6485_v52  ;;  %v511_v41 = vmax.f32 %v451_v33, 0.0  ;;  %v748_v46 = vsel %vm679_vm4, %v478_v34, 0.0  ;;  %v5823_v47 = vpack.c.bf16 %v477_v31, %v746_v39  ;;  %v5814_v7 = vunpack.c.l.bf16 %v5866_v45 }
  0x30   : > { %4456 = vmatprep.mubr.bf16.mxu0 %v6489_v9  ;;  %v6490_v19 = vld [vmem:[#allocation3 + $0x4c] ss:$36 sps:$4 sm:$0xff]   ;;  %v779_v48 = vsel %vm614_vm3, %v509_v35, 0.0  ;;  %v1144_v51 = vld [vmem:[#allocation2 + $0x90] sm:$0xf]  ;;  %v5773_v56 = vpack.c.bf16 %v510_v40, %v510_v40  ;;  %v480_v15 = vmax.f32 %v420_v6, 0.0  ;;  %v5794_v34 = vunpack.c.l.bf16 %v5861_v27 }
  0x31   : > { %v1145_v52 = vld [vmem:[#allocation2 + $0x94] sm:$0xf]  ;;  %v1220_v53 = vld [vmem:[#allocation2 + $0x90] sm:$0xe]  ;;  %v5772_v55 = vpack.c.bf16 %v779_v48, %v779_v48  ;;  %1176 = vst [vmem:[#allocation3 + $0x360] sm:$0xf] %v1144_v51  ;;  %v385_v16 = vmul.f32 %v5814_v7, %v6985_v43  ;;  %v5795_v35 = vunpack.c.h.bf16 %v5861_v27  ;;  %v454_v40 = vadd.f32 %v6990_v44, %v387_v21 }
  0x32   : > { %5891 = vmatpush3.bf16.msra.mxu0 %v6486_v54  ;;  %6411 = vmatpush3.bf16.msra.mxu1 %v6486_v54  ;;  %v5741_v54 = vpack.c.bf16 %v748_v46, %v748_v46  ;;  %1177 = vst [vmem:[#allocation3 + $0x384] sm:$0xf] %v1145_v52  ;;  %v1222_v59 = vld [vmem:[#allocation2 + $0x98] sm:$0x1]  ;;  %v5434_v60 = vrot.slane %v1220_v53, 9  ;;  %5868 = vst [vmem:[#allocation2 + $0x18] sm:$0xff] %v5823_v47   ;;  %v5743_v25 = vpack.c.bf16 %v480_v15, %v480_v15 }
  0x33   : > { %5988 = vmatprep.subr.bf16.mxu1 %v6495_v58  ;;  %6100 = vmatprep.subr.bf16.mxu0 %v6499_v62  ;;  %v1221_v58 = vld [vmem:[#allocation2 + $0x94] sm:$0xf]  ;;  %v781_v61 = vsel %vm679_vm4, %v511_v41, 0.0  ;;  %v352_v62 = vmul.f32 %v6985_v43, %v285_v42  ;;  %v1372_v1 = vrot.slane %v1222_v59, 5  ;;  %1099 = vst [vmem:[#allocation2 + $0x9c] sm:$0xf] %v5772_v55  ;;  %v452_v26 = vadd.f32 %v6990_v44, %v385_v16 }
  0x34   : > { %v1369_v0 = vrot.slane %v1221_v58, 5  ;;  %1068 = vst [vmem:[#allocation2 + $0x20] sm:$0x3] %v5741_v54  ;;  %v5774_v2 = vpack.c.bf16 %v781_v61, %v781_v61  ;;  %1100 = vst [vmem:[#allocation2 + $0xa0] sm:$0xf] %v5773_v56  ;;  %v290_v41 = vunpack.c.l.bf16 %v230_v28  ;;  %v355_v49 = vmul.f32 %v5794_v34, %v6985_v43  ;;  %v6497_v55 = vld [vmem:[%s8308_s3 + $0xb8] sm:$0xff]  }
  0x35   : > { %4457 = vmatmul.mubr.bf16.vlgmr.msra.gmra.mxu0 %v6487_v8  ;;  %v419_v5 = vadd.f32 %v6990_v44, %v352_v62  ;;  %v5815_v8 = vunpack.c.h.bf16 %v5866_v45  ;;  %1070 = vst [vmem:[#allocation2 + $0x28] sm:$0xf] %v5743_v25  ;;  %v356_v53 = vmul.f32 %v5795_v35, %v6985_v43  ;;  %v6498_v61 = vld [vmem:[%s8308_s3 + $0xf0] sm:$0xff]   ;;  %v512_v63 = vmax.f32 %v452_v26, 0.0 }
  0x36   : > { %4464 = vmatprep.mubr.bf16.mxu0 %v6490_v19  ;;  %6101 = vmatpush3.bf16.msra.mxu0 %v6501_v3  ;;  %v354_v3 = vmul.f32 %v6985_v43, %v287_v57  ;;  %v1370_v9 = vsel %vm6963_vm2, %v5434_v60, %v1369_v0  ;;  %v1371_v10 = vrot.slane %v1369_v0, 4  ;;  %1101 = vst [vmem:[#allocation2 + $0xa4] sm:$0x3] %v5774_v2  ;;  %v261_v60 = vld [vmem:[%s6970_s21 + $0xb4] sm:$0xff]   ;;  %v263_v2 = vld [vmem:[%s6970_s21 + $0xbc] sm:$0x3] }
  0x37   : > { %6102 = vmatprep.subr.bf16.mxu0 %v6517_v4  ;;  %1451 = vst [vmem:[#allocation3 + $0x364] sm:$0xf] %v1370_v9  ;;  %v479_v14 = vmax.f32 %v419_v5, 0.0  ;;  %v386_v17 = vmul.f32 %v5815_v8, %v6985_v43  ;;  %v357_v54 = vmul.f32 %v6985_v43, %v290_v41  ;;  %v422_v8 = vadd.f32 %v6990_v44, %v355_v49 }
  0x38   : > { %v421_v11 = vadd.f32 %v6990_v44, %v354_v3  ;;  %v1373_v19 = vsel %vm6963_vm2, %v1371_v10, %v1372_v1  ;;  %v514_v1 = vmax.f32 %v454_v40, 0.0  ;;  %v782_v9 = vsel %vm614_vm3, %v512_v63, 0.0  ;;  %v6509_v40 = vld [vmem:[%s8308_s3 + $0xa8] sm:$0xff]  }
  0x39   : > { %1452 = vst [vmem:[#allocation3 + $0x388] sm:$0xf] %v1373_v19  ;;  %v749_v23 = vsel %vm614_vm3, %v479_v14, 0.0  ;;  %v1124_v29 = vld [vmem:[#allocation2 + $0x18] sm:$0xf]  ;;  %v453_v33 = vadd.f32 %v6990_v44, %v386_v17  ;;  %v424_v12 = vadd.f32 %v6990_v44, %v357_v54  ;;  %v6500_v14 = vld [vmem:[%s8308_s3 + $0xb0] sm:$0xff]   ;;  %v321_v27 = vunpack.c.l.bf16 %v261_v60 }
  0x3a   : > { %v481_v20 = vmax.f32 %v421_v11, 0.0  ;;  %6103 = vmatpush3.bf16.msra.mxu0 %v6521_v18  ;;  %v1125_v30 = vld [vmem:[#allocation2 + $0x1c] sm:$0xf]  ;;  %v1190_v31 = vld [vmem:[#allocation2 + $0x18] sm:$0xe]  ;;  %v5742_v32 = vpack.c.bf16 %v749_v23, %v749_v23  ;;  %v784_v10 = vsel %vm679_vm4, %v514_v1, 0.0  ;;  %v423_v11 = vadd.f32 %v6990_v44, %v356_v53 }
  0x3b   : > { %1156 = vst [vmem:[#allocation3 + $0x90] sm:$0xf] %v1124_v29  ;;  %1157 = vst [vmem:[#allocation3 + $0xb4] sm:$0xf] %v1125_v30  ;;  %v1191_v36 = vld [vmem:[#allocation2 + $0x1c] sm:$0xf]  ;;  %v5777_v18 = vpack.c.bf16 %v784_v10, %v784_v10  ;;  %v322_v28 = vunpack.c.h.bf16 %v261_v60 }
  0x3c   : > { %v1192_v37 = vld [vmem:[#allocation2 + $0x20] sm:$0x1]  ;;  %v751_v39 = vsel %vm679_vm4, %v481_v20, 0.0  ;;  %v1299_v42 = vrot.slane %v1191_v36, 5  ;;  %v1146_v46 = vld [vmem:[#allocation2 + $0x9c] sm:$0xf] }
  0x3d   : > { %4465 = vmatmul.mubr.bf16.gmra.mxu0 %v6496_v38  ;;  %v5424_v38 = vrot.slane %v1190_v31, 9  ;;  %v1302_v45 = vrot.slane %v1192_v37, 5  ;;  %v1147_v47 = vld [vmem:[#allocation2 + $0xa0] sm:$0xf]  ;;  %v5744_v48 = vpack.c.bf16 %v751_v39, %v751_v39  ;;  %1069 = vst [vmem:[#allocation2 + $0x24] sm:$0xf] %v5742_v32  ;;  %v388_v37 = vmul.f32 %v6985_v43, %v321_v27 }
  0x3e   : > { %1178 = vst [vmem:[#allocation3 + $0x3a8] sm:$0xf] %v1146_v46  ;;  %1179 = vst [vmem:[#allocation3 + $0x3cc] sm:$0xf] %v1147_v47  ;;  %v1223_v50 = vld [vmem:[#allocation2 + $0x9c] sm:$0xe] }
  0x3f   : > { %v1224_v51 = vld [vmem:[#allocation2 + $0xa0] sm:$0xf]  ;;  %v1225_v52 = vld [vmem:[#allocation2 + $0xa4] sm:$0x1]  ;;  %v1300_v56 = vsel %vm6963_vm2, %v5424_v38, %v1299_v42  ;;  %v1301_v57 = vrot.slane %v1299_v42, 4  ;;  %v5435_v58 = vrot.slane %v1223_v50, 9  ;;  %v389_v38 = vmul.f32 %v6985_v43, %v322_v28 }
  0x40   : > { %v1376_v59 = vrot.slane %v1224_v51, 5  ;;  %1071 = vst [vmem:[#allocation2 + $0x2c] sm:$0x3] %v5744_v48  ;;  %1431 = vst [vmem:[#allocation3 + $0x94] sm:$0xf] %v1300_v56  ;;  %v1379_v62 = vrot.slane %v1225_v52, 5  ;;  %v455_v49 = vadd.f32 %v6990_v44, %v388_v37 }
  0x41   : > { %v513_v0 = vmax.f32 %v453_v33, 0.0  ;;  %v6492_v3 = vld [vmem:[#allocation3 + $0x360] ss:$36 sps:$4 sm:$0xff]   ;;  %v1303_v5 = vsel %vm6963_vm2, %v1301_v57, %v1302_v45  ;;  %v1127_v16 = vld [vmem:[#allocation2 + $0x28] sm:$0xf]  ;;  %v482_v20 = vmax.f32 %v422_v8, 0.0  ;;  %v323_v33 = vunpack.c.l.bf16 %v263_v2 }
  0x42   : > { %v6494_v4 = vld [vmem:[#allocation3 + $0x364] ss:$36 sps:$4 sm:$0xff]   ;;  %v1377_v6 = vsel %vm6963_vm2, %v5435_v58, %v1376_v59  ;;  %v1378_v7 = vrot.slane %v1376_v59, 4  ;;  %1432 = vst [vmem:[#allocation3 + $0xb8] sm:$0xf] %v1303_v5  ;;  %v483_v26 = vmax.f32 %v423_v11, 0.0  ;;  %v456_v50 = vadd.f32 %v6990_v44, %v389_v38 }
  0x43   : > { %1453 = vst [vmem:[#allocation3 + $0x3ac] sm:$0xf] %v1377_v6  ;;  %4552 = vmatprep.mubr.bf16.mxu1 %v6494_v4  ;;  %v1194_v17 = vld [vmem:[#allocation2 + $0x28] sm:$0xf]  ;;  %v5853_v19 = vpack.c.bf16 %v513_v0, %v782_v9  ;;  %1159 = vst [vmem:[#allocation3 + $0xfc] sm:$0xf] %v1127_v16  ;;  %v390_v46 = vmul.f32 %v6985_v43, %v323_v33 }
  0x44   : > { %v1380_v15 = vsel %vm6963_vm2, %v1378_v7, %v1379_v62  ;;  %4553 = vmatmul.mubr.bf16.vlgmr.msra.gmra.mxu1 %v6492_v3  ;;  %v1126_v21 = vld [vmem:[#allocation2 + $0x24] sm:$0xf]  ;;  %v1306_v25 = vrot.slane %v1194_v17, 5  ;;  %v6506_v29 = vld [vmem:[%s8308_s3 + $0xe8] sm:$0xff]   ;;  %1104 = vst [vmem:[#allocation2 + $0xb0] sm:$0x3] %v5777_v18 }
  0x45   : > { %1454 = vst [vmem:[#allocation3 + $0x3d0] sm:$0xf] %v1380_v15  ;;  %v1193_v23 = vld [vmem:[#allocation2 + $0x24] sm:$0xe]  ;;  %5989 = vmatpush3.bf16.msra.mxu1 %v6497_v55  ;;  %1158 = vst [vmem:[#allocation3 + $0xd8] sm:$0xf] %v1126_v21  ;;  %v457_v53 = vadd.f32 %v6990_v44, %v390_v46 }
  0x46   : > { %v5425_v30 = vrot.slane %v1193_v23, 9  ;;  %5874 = vst [vmem:[#allocation2 + $0xa8] sm:$0xff] %v5853_v19   ;;  %v484_v31 = vmax.f32 %v424_v12, 0.0  ;;  %v752_v32 = vsel %vm614_vm3, %v482_v20, 0.0  ;;  %5990 = vmatprep.subr.bf16.mxu1 %v6498_v61  ;;  %v1308_v35 = vrot.slane %v1306_v25, 4  ;;  %v6533_v39 = vld [vmem:[%s8308_s3 + $0x168] sm:$0xff]  }
  0x47   : > { %v1195_v34 = vld [vmem:[#allocation2 + $0x2c] sm:$0x1]  ;;  %v5828_v36 = vpack.c.bf16 %v483_v26, %v752_v32  ;;  %v6510_v47 = vld [vmem:[%s8308_s3 + $0xe0] sm:$0xff]   ;;  %6104 = vmatprep.subr.bf16.mxu0 %v6533_v39  ;;  %v515_v55 = vmax.f32 %v455_v49, 0.0  ;;  %v516_v56 = vmax.f32 %v456_v50, 0.0  ;;  %v517_v60 = vmax.f32 %v457_v53, 0.0 }
  0x48   : > { %v1307_v41 = vsel %vm6963_vm2, %v5425_v30, %v1306_v25  ;;  %v1309_v42 = vrot.slane %v1195_v34, 5  ;;  %v754_v45 = vsel %vm679_vm4, %v484_v31, 0.0  ;;  %v6507_v54 = vld [vmem:[#allocation3 + $0x90] ss:$36 sps:$4 sm:$0xff]   ;;  %v6508_v58 = vld [vmem:[#allocation3 + $0x3a8] ss:$36 sps:$4 sm:$0xff]  }
  0x49   : > { %1433 = vst [vmem:[#allocation3 + $0xdc] sm:$0xf] %v1307_v41  ;;  %v5747_v48 = vpack.c.bf16 %v754_v45, %v754_v45  ;;  %5869 = vst [vmem:[#allocation2 + $0x30] sm:$0xff] %v5828_v36   ;;  %5991 = vmatpush3.bf16.msra.mxu1 %v6500_v14  ;;  %v6502_v51 = vld [vmem:[#allocation3 + $0x94] ss:$36 sps:$4 sm:$0xff]   ;;  %v6516_v0 = vld [vmem:[%s8308_s3 + $0xd8] sm:$0xff]   ;;  %v5779_v1 = vpack.c.bf16 %v516_v56, %v516_v56 }
  0x4a   : > { %v1310_v52 = vsel %vm6963_vm2, %v1308_v35, %v1309_v42  ;;  %5992 = vmatprep.subr.bf16.mxu1 %v6506_v29  ;;  %4472 = vmatprep.mubr.bf16.mxu0 %v6502_v51  ;;  %v6511_v59 = vld [vmem:[%s8308_s3 + $0xa0] sm:$0xff]   ;;  %v785_v5 = vsel %vm614_vm3, %v515_v55, 0.0  ;;  %v787_v8 = vsel %vm679_vm4, %v517_v60, 0.0  ;;  %v6535_v10 = vld [vmem:[%s8308_s3 + $0x128] sm:$0xff]   ;;  %v6520_v11 = vld [vmem:[%s8308_s3 + $0x98] sm:$0xff]  }
  0x4b   : > { %1434 = vst [vmem:[#allocation3 + $0x100] sm:$0xf] %v1310_v52  ;;  %1074 = vst [vmem:[#allocation2 + $0x38] sm:$0x3] %v5747_v48  ;;  %4473 = vmatmul.mubr.bf16.gmra.mxu0 %v6507_v54  ;;  %v1228_v3 = vld [vmem:[#allocation2 + $0xb0] sm:$0x1]  ;;  %v5778_v9 = vpack.c.bf16 %v785_v5, %v785_v5  ;;  %v5780_v15 = vpack.c.bf16 %v787_v8, %v787_v8 }
  0x4c   : > { %v6504_v57 = vld [vmem:[#allocation3 + $0x3ac] ss:$36 sps:$4 sm:$0xff]   ;;  %v1386_v7 = vrot.slane %v1228_v3, 5  ;;  %1106 = vst [vmem:[#allocation2 + $0xb8] sm:$0xf] %v5779_v1  ;;  %6105 = vmatpush3.bf16.msra.mxu0 %v6535_v10  ;;  %v6522_v29 = vld [vmem:[%s8308_s3 + $0xd0] sm:$0xff]  }
  0x4d   : > { %v1148_v61 = vld [vmem:[#allocation2 + $0xa8] sm:$0xf]  ;;  %v1149_v62 = vld [vmem:[#allocation2 + $0xac] sm:$0xf]  ;;  %4560 = vmatprep.mubr.bf16.mxu1 %v6504_v57  ;;  %5993 = vmatpush3.bf16.msra.mxu1 %v6509_v40  ;;  %1105 = vst [vmem:[#allocation2 + $0xb4] sm:$0xf] %v5778_v9 }
  0x4e   : > { %v1226_v63 = vld [vmem:[#allocation2 + $0xa8] sm:$0xe]  ;;  %1180 = vst [vmem:[#allocation3 + $0x3f0] sm:$0xf] %v1148_v61  ;;  %1181 = vst [vmem:[#allocation3 + $0x414] sm:$0xf] %v1149_v62  ;;  %4561 = vmatmul.mubr.bf16.gmra.mxu1 %v6508_v58  ;;  %5994 = vmatprep.subr.bf16.mxu1 %v6510_v47 }
  0x4f   : > { %v1227_v2 = vld [vmem:[#allocation2 + $0xac] sm:$0xf]  ;;  %v5436_v4 = vrot.slane %v1226_v63, 9  ;;  %v231_v20 = vld [vmem:[%s6970_s21 + $0x3c] sm:$0xff]   ;;  %1107 = vst [vmem:[#allocation2 + $0xbc] sm:$0x3] %v5780_v15 }
  0x50   : > { %v1383_v6 = vrot.slane %v1227_v2, 5  ;;  %v1128_v12 = vld [vmem:[#allocation2 + $0x30] sm:$0xf]  ;;  %v1129_v14 = vld [vmem:[#allocation2 + $0x34] sm:$0xf]  ;;  %v291_v26 = vunpack.c.l.bf16 %v231_v20  ;;  %v292_v27 = vunpack.c.h.bf16 %v231_v20  ;;  %v6528_v39 = vld [vmem:[%s8308_s3 + $0xc8] sm:$0xff]  }
  0x51   : > { %1160 = vst [vmem:[#allocation3 + $0x120] sm:$0xf] %v1128_v12  ;;  %1161 = vst [vmem:[#allocation3 + $0x144] sm:$0xf] %v1129_v14  ;;  %v1196_v18 = vld [vmem:[#allocation2 + $0x30] sm:$0xe]  ;;  %5995 = vmatpush3.bf16.msra.mxu1 %v6511_v59 }
  0x52   : > { %v1384_v16 = vsel %vm6963_vm2, %v5436_v4, %v1383_v6  ;;  %v1385_v17 = vrot.slane %v1383_v6, 4  ;;  %v1197_v19 = vld [vmem:[#allocation2 + $0x34] sm:$0xf]  ;;  %v6512_v21 = vld [vmem:[#allocation3 + $0xdc] ss:$36 sps:$4 sm:$0xff]   ;;  %v5426_v25 = vrot.slane %v1196_v18, 9  ;;  %5996 = vmatprep.subr.bf16.mxu1 %v6516_v0  ;;  %v358_v35 = vmul.f32 %v6985_v43, %v291_v26 }
  0x53   : > { %1455 = vst [vmem:[#allocation3 + $0x3f4] sm:$0xf] %v1384_v16  ;;  %v6518_v23 = vld [vmem:[#allocation3 + $0xd8] ss:$36 sps:$4 sm:$0xff]   ;;  %v1198_v30 = vld [vmem:[#allocation2 + $0x38] sm:$0x1]  ;;  %4480 = vmatprep.mubr.bf16.mxu0 %v6512_v21  ;;  %v359_v36 = vmul.f32 %v6985_v43, %v292_v27 }
  0x54   : > { %v1387_v28 = vsel %vm6963_vm2, %v1385_v17, %v1386_v7  ;;  %v1313_v31 = vrot.slane %v1197_v19, 5  ;;  %v6523_v32 = vld [vmem:[%s8308_s3 + $0x90] sm:$0xff]   ;;  %v1316_v33 = vrot.slane %v1198_v30, 5  ;;  %v233_v34 = vld [vmem:[%s6970_s21 + $0x44] sm:$0x3]  ;;  %4481 = vmatmul.mubr.bf16.gmra.mxu0 %v6518_v23  ;;  %v5862_v45 = vld [vmem:[%s6970_s21 + $0x48] sm:$0xff]   ;;  %v425_v48 = vadd.f32 %v6990_v44, %v358_v35 }
  0x55   : > { %1456 = vst [vmem:[#allocation3 + $0x418] sm:$0xf] %v1387_v28  ;;  %v293_v40 = vunpack.c.l.bf16 %v233_v34  ;;  %v1459_v41 = vld [vmem:[#allocation2] sm:$0xc]  ;;  %v1460_v42 = vld [vmem:[#allocation2 + $0x4] sm:$0xf]  ;;  %5997 = vmatpush3.bf16.msra.mxu1 %v6520_v11  ;;  %v426_v49 = vadd.f32 %v6990_v44, %v359_v36  ;;  %v5798_v51 = vunpack.c.l.bf16 %v5862_v45  ;;  %v5799_v52 = vunpack.c.h.bf16 %v5862_v45 }
  0x56   : > { %v1314_v37 = vsel %vm6963_vm2, %v5426_v25, %v1313_v31  ;;  %v1315_v38 = vrot.slane %v1313_v31, 4  ;;  %v1151_v46 = vld [vmem:[#allocation2 + $0xb8] sm:$0xf]  ;;  %v1461_v50 = vld [vmem:[#allocation2 + $0x8] sm:$0x3]  ;;  %5998 = vmatprep.subr.bf16.mxu1 %v6522_v29  ;;  %v5438_v56 = vrot.slane %v1459_v41, 10 }
  0x57   : > { %1435 = vst [vmem:[#allocation3 + $0x124] sm:$0xf] %v1314_v37  ;;  %v1230_v47 = vld [vmem:[#allocation2 + $0xb8] sm:$0xf]  ;;  %1183 = vst [vmem:[#allocation3 + $0x45c] sm:$0xf] %v1151_v46  ;;  %v360_v55 = vmul.f32 %v6985_v43, %v293_v40  ;;  %v361_v0 = vmul.f32 %v5798_v51, %v6985_v43  ;;  %v362_v1 = vmul.f32 %v5799_v52, %v6985_v43 }
  0x58   : > { %v1317_v53 = vsel %vm6963_vm2, %v1315_v38, %v1316_v33  ;;  %v1390_v54 = vrot.slane %v1230_v47, 5  ;;  %v1735_v57 = vld [vmem:[#allocation2 + $0x18] sm:$0xf]  ;;  %v1736_v58 = vld [vmem:[#allocation2 + $0x1c] sm:$0xf]  ;;  %v485_v61 = vmax.f32 %v425_v48, 0.0 }
  0x59   : > { %1436 = vst [vmem:[#allocation3 + $0x148] sm:$0xf] %v1317_v53  ;;  %v1150_v59 = vld [vmem:[#allocation2 + $0xb4] sm:$0xf]  ;;  %v486_v62 = vmax.f32 %v426_v49, 0.0  ;;  %v6531_v5 = vld [vmem:[%s8308_s3 + $0x88] sm:$0xff]   ;;  %v427_v6 = vadd.f32 %v6990_v44, %v360_v55  ;;  %5999 = vmatpush3.bf16.msra.mxu1 %v6523_v32  ;;  %v428_v25 = vadd.f32 %v6990_v44, %v361_v0  ;;  %v429_v26 = vadd.f32 %v6990_v44, %v362_v1 }
  0x5a   : > { %v1229_v60 = vld [vmem:[#allocation2 + $0xb4] sm:$0xe]  ;;  %1767 = vst [vmem:[#allocation3 + $0xc] sm:$0xf] %v1735_v57  ;;  %1768 = vst [vmem:[#allocation3 + $0x30] sm:$0xf] %v1736_v58  ;;  %6000 = vmatprep.subr.bf16.mxu1 %v6528_v39 }
  0x5b   : > { %1182 = vst [vmem:[#allocation3 + $0x438] sm:$0xf] %v1150_v59  ;;  %v1231_v2 = vld [vmem:[#allocation2 + $0xbc] sm:$0x1]  ;;  %v5437_v3 = vrot.slane %v1229_v60, 9  ;;  %v1392_v4 = vrot.slane %v1390_v54, 4  ;;  %v5749_v11 = vpack.c.bf16 %v486_v62, %v486_v62 }
  0x5c   : > { %v1560_v7 = vrot.slane %v1460_v42, 6  ;;  %v1393_v8 = vrot.slane %v1231_v2, 5  ;;  %v6532_v9 = vld [vmem:[%s8308_s3 + $0xc0] sm:$0xff]   ;;  %v755_v10 = vsel %vm614_vm3, %v485_v61, 0.0  ;;  %v1563_v12 = vrot.slane %v1461_v50, 6  ;;  %v237_v37 = vld [vmem:[%s6970_s21 + $0x54] sm:$0xff]  }
  0x5d   : > { %v6548_v14 = vld [vmem:[%s8308_s3 + $0x160] sm:$0xff]   ;;  %v1391_v17 = vsel %vm6963_vm2, %v5437_v3, %v1390_v54  ;;  %v487_v18 = vmax.f32 %v427_v6, 0.0  ;;  %v5748_v19 = vpack.c.bf16 %v755_v10, %v755_v10  ;;  %1076 = vst [vmem:[#allocation2 + $0x40] sm:$0xf] %v5749_v11  ;;  %v236_v30 = vld [vmem:[%s6970_s21 + $0x50] sm:$0x3]  ;;  %6001 = vmatpush3.bf16.msra.mxu1 %v6531_v5  ;;  %v297_v41 = vunpack.c.l.bf16 %v237_v37 }
  0x5e   : > { %v6514_v15 = vld [vmem:[#allocation3 + $0x3f4] ss:$36 sps:$4 sm:$0xff]   ;;  %v1561_v20 = vsel %vm7182_vm7, %v5438_v56, %v1560_v7  ;;  %v1394_v21 = vsel %vm6963_vm2, %v1392_v4, %v1393_v8  ;;  %1457 = vst [vmem:[#allocation3 + $0x43c] sm:$0xf] %v1391_v17  ;;  %v1562_v23 = vrot.slane %v1560_v7, 4  ;;  %6106 = vmatprep.subr.bf16.mxu0 %v6548_v14  ;;  %v296_v33 = vunpack.c.l.bf16 %v236_v30  ;;  %6002 = vmatprep.subr.bf16.mxu1 %v6532_v9  ;;  %v6541_v45 = vld [vmem:[%s8308_s3 + $0x1f8] sm:$0xff]  }
  0x5f   : > { %v6519_v16 = vld [vmem:[#allocation3 + $0x3f0] ss:$36 sps:$4 sm:$0xff]   ;;  %1702 = vst [vmem:[#allocation3 + $0x8] sm:$0xf] %v1561_v20  ;;  %4568 = vmatprep.mubr.bf16.mxu1 %v6514_v15  ;;  %1458 = vst [vmem:[#allocation3 + $0x460] sm:$0xf] %v1394_v21  ;;  %v298_v42 = vunpack.c.h.bf16 %v237_v37  ;;  %v364_v55 = vmul.f32 %v6985_v43, %v297_v41 }
  0x60   : > { %v6551_v27 = vld [vmem:[%s8308_s3 + $0x120] sm:$0xff]   ;;  %v757_v29 = vsel %vm679_vm4, %v487_v18, 0.0  ;;  %1075 = vst [vmem:[#allocation2 + $0x3c] sm:$0xf] %v5748_v19  ;;  %4569 = vmatmul.mubr.bf16.gmra.mxu1 %v6519_v16  ;;  %v1564_v32 = vsel %vm7182_vm7, %v1562_v23, %v1563_v12  ;;  %v488_v34 = vmax.f32 %v428_v25, 0.0  ;;  %v489_v40 = vmax.f32 %v429_v26, 0.0 }
  0x61   : > { %v6534_v28 = vld [vmem:[%s8308_s3 + $0x80] sm:$0xff]   ;;  %v5750_v31 = vpack.c.bf16 %v757_v29, %v757_v29  ;;  %v1462_v35 = vld [vmem:[#allocation2 + $0xc] sm:$0xc]  ;;  %v1463_v36 = vld [vmem:[#allocation2 + $0x10] sm:$0xf]  ;;  %6107 = vmatpush3.bf16.msra.mxu0 %v6551_v27  ;;  %v363_v46 = vmul.f32 %v6985_v43, %v296_v33  ;;  %v365_v56 = vmul.f32 %v6985_v43, %v298_v42  ;;  %v431_v43 = vadd.f32 %v6990_v44, %v364_v55 }
  0x62   : > { %v6524_v38 = vld [vmem:[#allocation3 + $0x124] ss:$36 sps:$4 sm:$0xff]   ;;  %1703 = vst [vmem:[#allocation3 + $0x2c] sm:$0xf] %v1564_v32  ;;  %v758_v47 = vsel %vm614_vm3, %v488_v34, 0.0  ;;  %v5439_v49 = vrot.slane %v1462_v35, 10  ;;  %6003 = vmatpush3.bf16.msra.mxu1 %v6534_v28 }
  0x63   : > { %v6529_v39 = vld [vmem:[#allocation3 + $0x120] ss:$36 sps:$4 sm:$0xff]   ;;  %1077 = vst [vmem:[#allocation2 + $0x44] sm:$0x3] %v5750_v31  ;;  %v1567_v50 = vrot.slane %v1463_v36, 6  ;;  %4488 = vmatprep.mubr.bf16.mxu0 %v6524_v38  ;;  %v5833_v51 = vpack.c.bf16 %v489_v40, %v758_v47  ;;  %v430_v57 = vadd.f32 %v6990_v44, %v363_v46  ;;  %v6560_v60 = vld [vmem:[%s8308_s3 + $0x158] sm:$0xff]   ;;  %v432_v0 = vadd.f32 %v6990_v44, %v365_v56 }
  0x64   : > { %v1464_v48 = vld [vmem:[#allocation2 + $0x14] sm:$0x3]  ;;  %v1737_v53 = vld [vmem:[#allocation2 + $0x24] sm:$0xf]  ;;  %v1738_v54 = vld [vmem:[#allocation2 + $0x28] sm:$0xf]  ;;  %4489 = vmatmul.mubr.bf16.gmra.mxu0 %v6529_v39  ;;  %6212 = vmatprep.subr.bf16.mxu1 %v6541_v45 }
  0x65   : > { %v1570_v52 = vrot.slane %v1464_v48, 6  ;;  %v1568_v58 = vsel %vm7182_vm7, %v5439_v49, %v1567_v50  ;;  %v1569_v59 = vrot.slane %v1567_v50, 4  ;;  %1769 = vst [vmem:[#allocation3 + $0x54] sm:$0xf] %v1737_v53  ;;  %1770 = vst [vmem:[#allocation3 + $0x78] sm:$0xf] %v1738_v54  ;;  %6108 = vmatprep.subr.bf16.mxu0 %v6560_v60 }
  0x66   : > { %v1131_v61 = vld [vmem:[#allocation2 + $0x40] sm:$0xf]  ;;  %5870 = vst [vmem:[#allocation2 + $0x48] sm:$0xff] %v5833_v51   ;;  %1704 = vst [vmem:[#allocation3 + $0x50] sm:$0xf] %v1568_v58  ;;  %v490_v7 = vmax.f32 %v430_v57, 0.0 }
  0x67   : > { %v1200_v62 = vld [vmem:[#allocation2 + $0x40] sm:$0xf]  ;;  %v6526_v1 = vld [vmem:[#allocation3 + $0x43c] ss:$36 sps:$4 sm:$0xff]   ;;  %1163 = vst [vmem:[#allocation3 + $0x18c] sm:$0xf] %v1131_v61  ;;  %v1571_v4 = vsel %vm7182_vm7, %v1569_v59, %v1570_v52 }
  0x68   : > { %v6530_v2 = vld [vmem:[#allocation3 + $0x438] ss:$36 sps:$4 sm:$0xff]   ;;  %v1320_v3 = vrot.slane %v1200_v62, 5  ;;  %v1130_v5 = vld [vmem:[#allocation2 + $0x3c] sm:$0xf]  ;;  %4576 = vmatprep.mubr.bf16.mxu1 %v6526_v1  ;;  %v491_v10 = vmax.f32 %v431_v43, 0.0 }
  0x69   : > { %v1199_v6 = vld [vmem:[#allocation2 + $0x3c] sm:$0xe]  ;;  %1705 = vst [vmem:[#allocation3 + $0x74] sm:$0xf] %v1571_v4  ;;  %1162 = vst [vmem:[#allocation3 + $0x168] sm:$0xf] %v1130_v5  ;;  %4577 = vmatmul.mubr.bf16.gmra.mxu1 %v6530_v2 }
  0x6a   : > { %v5427_v8 = vrot.slane %v1199_v6, 9  ;;  %v1322_v9 = vrot.slane %v1320_v3, 4  ;;  %v1201_v44 = vld [vmem:[#allocation2 + $0x44] sm:$0x1]  ;;  %v6540_v11 = vld [vmem:[#allocation3 + $0xc] ss:$36 sps:$4 sm:$0xff]  }
  0x6b   : > { %v760_v12 = vsel %vm679_vm4, %v490_v7, 0.0  ;;  %v492_v14 = vmax.f32 %v432_v0, 0.0  ;;  %v1323_v16 = vrot.slane %v1201_v44, 5  ;;  %v761_v18 = vsel %vm614_vm3, %v491_v10, 0.0  ;;  %v6538_v19 = vld [vmem:[#allocation3 + $0x8] ss:$36 sps:$4 sm:$0xff]   ;;  %4617 = vmatprep.mubr.bf16.mxu1 %v6540_v11 }
  0x6c   : > { %v1321_v15 = vsel %vm6963_vm2, %v5427_v8, %v1320_v3  ;;  %v5753_v17 = vpack.c.bf16 %v760_v12, %v760_v12  ;;  %v239_v20 = vld [vmem:[%s6970_s21 + $0x5c] sm:$0x3]  ;;  %v5754_v21 = vpack.c.bf16 %v761_v18, %v761_v18  ;;  %v1465_v25 = vld [vmem:[#allocation2 + $0x18] sm:$0xc]  ;;  %v1467_v35 = vld [vmem:[#allocation2 + $0x20] sm:$0x3] }
  0x6d   : > { %1437 = vst [vmem:[#allocation3 + $0x16c] sm:$0xf] %v1321_v15  ;;  %v5755_v23 = vpack.c.bf16 %v492_v14, %v492_v14  ;;  %v1466_v26 = vld [vmem:[#allocation2 + $0x1c] sm:$0xf]  ;;  %v1324_v27 = vsel %vm6963_vm2, %v1322_v9, %v1323_v16  ;;  %v1132_v29 = vld [vmem:[#allocation2 + $0x48] sm:$0xf]  ;;  %v299_v32 = vunpack.c.l.bf16 %v239_v20 }
  0x6e   : > { %v6543_v28 = vld [vmem:[%s8308_s3 + $0x1b8] sm:$0xff]   ;;  %1080 = vst [vmem:[#allocation2 + $0x50] sm:$0x3] %v5753_v17  ;;  %v1133_v30 = vld [vmem:[#allocation2 + $0x4c] sm:$0xf]  ;;  %v6556_v40 = vld [vmem:[%s8308_s3 + $0x1f0] sm:$0xff]  }
  0x6f   : > { %v1202_v31 = vld [vmem:[#allocation2 + $0x48] sm:$0xe]  ;;  %1438 = vst [vmem:[#allocation3 + $0x190] sm:$0xf] %v1324_v27  ;;  %1164 = vst [vmem:[#allocation3 + $0x1b0] sm:$0xf] %v1132_v29 }
  0x70   : > { %1165 = vst [vmem:[#allocation3 + $0x1d4] sm:$0xf] %v1133_v30  ;;  %v1203_v33 = vld [vmem:[#allocation2 + $0x4c] sm:$0xf]  ;;  %v5428_v34 = vrot.slane %v1202_v31, 9  ;;  %v5440_v41 = vrot.slane %v1465_v25, 10 }
  0x71   : > { %1081 = vst [vmem:[#allocation2 + $0x54] sm:$0xf] %v5754_v21  ;;  %1082 = vst [vmem:[#allocation2 + $0x58] sm:$0xf] %v5755_v23  ;;  %v1327_v36 = vrot.slane %v1203_v33, 5  ;;  %v1574_v42 = vrot.slane %v1466_v26, 6  ;;  %4618 = vmatmul.mubr.bf16.vlgmr.msra.gmra.mxu1 %v6538_v19 }
  0x72   : > { %v6546_v37 = vld [vmem:[#allocation3 + $0x54] ss:$36 sps:$4 sm:$0xff]   ;;  %v7253_v38 = vld [vmem:[%s8306_s1] ss:$0 sm:$0xff]  ;;  %v1577_v45 = vrot.slane %v1467_v35, 6  ;;  %v6561_v47 = vld [vmem:[%s8308_s3 + $0x118] sm:$0xff]   ;;  %6213 = vmatpush3.bf16.msra.mxu1 %v6543_v28 }
  0x73   : > { %v366_v39 = vmul.f32 %v7253_v38, %v299_v32  ;;  %v1739_v46 = vld [vmem:[#allocation2 + $0x30] sm:$0xf]  ;;  %v1328_v48 = vsel %vm6963_vm2, %v5428_v34, %v1327_v36  ;;  %v1329_v49 = vrot.slane %v1327_v36, 4  ;;  %v7267_v50 = vld [vmem:[%s8307_s2] ss:$0 sm:$0xff]  ;;  %v1575_v55 = vsel %vm7182_vm7, %v5440_v41, %v1574_v42  ;;  %6109 = vmatpush3.bf16.msra.mxu0 %v6561_v47  ;;  %4625 = vmatprep.mubr.bf16.mxu1 %v6546_v37 }
  0x74   : > { %v1740_v52 = vld [vmem:[#allocation2 + $0x34] sm:$0xf]  ;;  %1771 = vst [vmem:[#allocation3 + $0x9c] sm:$0xf] %v1739_v46  ;;  %v5863_v54 = vld [vmem:[%s6970_s21 + $0x60] sm:$0xff]   ;;  %v1576_v56 = vrot.slane %v1574_v42, 4  ;;  %6214 = vmatprep.subr.bf16.mxu1 %v6556_v40 }
  0x75   : > { %v433_v51 = vadd.f32 %v7267_v50, %v366_v39  ;;  %v6559_v53 = vld [vmem:[%s8308_s3 + $0x1b0] sm:$0xff]   ;;  %1439 = vst [vmem:[#allocation3 + $0x1b4] sm:$0xf] %v1328_v48  ;;  %1772 = vst [vmem:[#allocation3 + $0xc0] sm:$0xf] %v1740_v52  ;;  %v5802_v57 = vunpack.c.l.bf16 %v5863_v54  ;;  %v5803_v58 = vunpack.c.h.bf16 %v5863_v54 }
  0x76   : > { %v243_v59 = vld [vmem:[%s6970_s21 + $0x6c] sm:$0xff]   ;;  %1706 = vst [vmem:[#allocation3 + $0x98] sm:$0xf] %v1575_v55  ;;  %v6550_v0 = vld [vmem:[#allocation3 + $0x50] ss:$36 sps:$4 sm:$0xff]   ;;  %v1578_v1 = vsel %vm7182_vm7, %v1576_v56, %v1577_v45  ;;  %6215 = vmatpush3.bf16.msra.mxu1 %v6559_v53 }
  0x77   : > { %v493_v60 = vmax.f32 %v433_v51, 0.0  ;;  %v303_v61 = vunpack.c.l.bf16 %v243_v59  ;;  %v304_v62 = vunpack.c.h.bf16 %v243_v59  ;;  %v1204_v43 = vld [vmem:[#allocation2 + $0x50] sm:$0x1]  ;;  %v367_v2 = vmul.f32 %v7253_v38, %v5802_v57  ;;  %v6536_v4 = vld [vmem:[#allocation3 + $0x16c] ss:$36 sps:$4 sm:$0xff]  }
  0x78   : > { %v368_v3 = vmul.f32 %v7253_v38, %v5803_v58  ;;  %v6542_v5 = vld [vmem:[#allocation3 + $0x168] ss:$36 sps:$4 sm:$0xff]   ;;  %v1330_v6 = vrot.slane %v1204_v43, 5  ;;  %1707 = vst [vmem:[#allocation3 + $0xbc] sm:$0xf] %v1578_v1  ;;  %v6572_v14 = vld [vmem:[%s8308_s3 + $0x150] sm:$0xff]   ;;  %4496 = vmatprep.mubr.bf16.mxu0 %v6536_v4 }
  0x79   : > { %v370_v7 = vmul.f32 %v7253_v38, %v303_v61  ;;  %v371_v8 = vmul.f32 %v7253_v38, %v304_v62  ;;  %v763_v9 = vsel %vm679_vm4, %v493_v60, 0.0  ;;  %v1134_v10 = vld [vmem:[#allocation2 + $0x54] sm:$0xf]  ;;  %v1135_v44 = vld [vmem:[#allocation2 + $0x58] sm:$0xf]  ;;  %v434_v11 = vadd.f32 %v7267_v50, %v367_v2  ;;  %4497 = vmatmul.mubr.bf16.gmra.mxu0 %v6542_v5  ;;  %6110 = vmatprep.subr.bf16.mxu0 %v6572_v14  ;;  %v6573_v62 = vld [vmem:[%s8308_s3 + $0x1e8] sm:$0xff]  }
  0x7a   : > { %v435_v12 = vadd.f32 %v7267_v50, %v368_v3  ;;  %v1331_v15 = vsel %vm6963_vm2, %v1329_v49, %v1330_v6  ;;  %v5756_v16 = vpack.c.bf16 %v763_v9, %v763_v9  ;;  %1166 = vst [vmem:[#allocation3 + $0x1f8] sm:$0xf] %v1134_v10  ;;  %1167 = vst [vmem:[#allocation3 + $0x21c] sm:$0xf] %v1135_v44  ;;  %v1205_v17 = vld [vmem:[#allocation2 + $0x54] sm:$0xe]  ;;  %4626 = vmatmul.mubr.bf16.gmra.mxu1 %v6550_v0 }
  0x7b   : > { %v1206_v18 = vld [vmem:[#allocation2 + $0x58] sm:$0xf]  ;;  %v437_v19 = vadd.f32 %v7267_v50, %v370_v7  ;;  %1440 = vst [vmem:[#allocation3 + $0x1d8] sm:$0xf] %v1331_v15  ;;  %v5429_v20 = vrot.slane %v1205_v17, 9  ;;  %v494_v25 = vmax.f32 %v434_v11, 0.0  ;;  %v438_v30 = vadd.f32 %v7267_v50, %v371_v8  ;;  %6216 = vmatprep.subr.bf16.mxu1 %v6573_v62 }
  0x7c   : > { %v1334_v21 = vrot.slane %v1206_v18, 5  ;;  %v242_v23 = vld [vmem:[%s6970_s21 + $0x68] sm:$0x3]  ;;  %v495_v26 = vmax.f32 %v435_v12, 0.0  ;;  %1083 = vst [vmem:[#allocation2 + $0x5c] sm:$0x3] %v5756_v16 }
  0x7d   : > { %v302_v27 = vunpack.c.l.bf16 %v242_v23  ;;  %v1468_v28 = vld [vmem:[#allocation2 + $0x24] sm:$0xc]  ;;  %v1469_v29 = vld [vmem:[#allocation2 + $0x28] sm:$0xf]  ;;  %v497_v31 = vmax.f32 %v437_v19, 0.0  ;;  %v764_v34 = vsel %vm614_vm3, %v494_v25, 0.0 }
  0x7e   : > { %v1335_v32 = vsel %vm6963_vm2, %v5429_v20, %v1334_v21  ;;  %v1336_v33 = vrot.slane %v1334_v21, 4  ;;  %v1470_v35 = vld [vmem:[#allocation2 + $0x2c] sm:$0x3]  ;;  %v5441_v36 = vrot.slane %v1468_v28, 10  ;;  %v5838_v39 = vpack.c.bf16 %v495_v26, %v764_v34  ;;  %v1741_v42 = vld [vmem:[#allocation2 + $0x3c] sm:$0xf] }
  0x7f   : > { %1441 = vst [vmem:[#allocation3 + $0x1fc] sm:$0xf] %v1335_v32  ;;  %v369_v37 = vmul.f32 %v7253_v38, %v302_v27  ;;  %v1581_v40 = vrot.slane %v1469_v29, 6  ;;  %v1584_v41 = vrot.slane %v1470_v35, 6  ;;  %v1742_v45 = vld [vmem:[#allocation2 + $0x40] sm:$0xf] }
  0x80   : > { %v6554_v46 = vld [vmem:[#allocation3 + $0x9c] ss:$36 sps:$4 sm:$0xff]   ;;  %1773 = vst [vmem:[#allocation3 + $0xe4] sm:$0xf] %v1741_v42  ;;  %1774 = vst [vmem:[#allocation3 + $0x108] sm:$0xf] %v1742_v45 }
  0x81   : > { %v6558_v47 = vld [vmem:[#allocation3 + $0x98] ss:$36 sps:$4 sm:$0xff]   ;;  %v498_v48 = vmax.f32 %v438_v30, 0.0  ;;  %v436_v49 = vadd.f32 %v7267_v50, %v369_v37  ;;  %5871 = vst [vmem:[#allocation2 + $0x60] sm:$0xff] %v5838_v39   ;;  %v1582_v51 = vsel %vm7182_vm7, %v5441_v36, %v1581_v40  ;;  %v1583_v52 = vrot.slane %v1581_v40, 4  ;;  %4633 = vmatprep.mubr.bf16.mxu1 %v6554_v46  ;;  %v6576_v25 = vld [vmem:[%s8308_s3 + $0x110] sm:$0xff]  }
  0x82   : > { %v245_v53 = vld [vmem:[%s6970_s21 + $0x74] sm:$0x3]  ;;  %v767_v54 = vsel %vm614_vm3, %v497_v31, 0.0  ;;  %v1471_v55 = vld [vmem:[#allocation2 + $0x30] sm:$0xc]  ;;  %4634 = vmatmul.mubr.bf16.gmra.mxu1 %v6558_v47  ;;  %v6577_v27 = vld [vmem:[%s8308_s3 + $0x1a8] sm:$0xff]   ;;  %6111 = vmatpush3.bf16.msra.mxu0 %v6576_v25 }
  0x83   : > { %1708 = vst [vmem:[#allocation3 + $0xe0] sm:$0xf] %v1582_v51  ;;  %v305_v56 = vunpack.c.l.bf16 %v245_v53  ;;  %v5760_v57 = vpack.c.bf16 %v767_v54, %v767_v54  ;;  %v5761_v58 = vpack.c.bf16 %v498_v48, %v498_v48  ;;  %v1472_v59 = vld [vmem:[#allocation2 + $0x34] sm:$0xf]  ;;  %v1473_v60 = vld [vmem:[#allocation2 + $0x38] sm:$0x3]  ;;  %v1585_v2 = vsel %vm7182_vm7, %v1583_v52, %v1584_v41  ;;  %6217 = vmatpush3.bf16.msra.mxu1 %v6577_v27 }
  0x84   : > { %v5442_v61 = vrot.slane %v1471_v55, 10  ;;  %v6544_v43 = vld [vmem:[#allocation3 + $0x1b4] ss:$36 sps:$4 sm:$0xff]   ;;  %v496_v1 = vmax.f32 %v436_v49, 0.0  ;;  %v1207_v3 = vld [vmem:[#allocation2 + $0x5c] sm:$0x1] }
  0x85   : > { %v6549_v0 = vld [vmem:[#allocation3 + $0x1b0] ss:$36 sps:$4 sm:$0xff]   ;;  %1709 = vst [vmem:[#allocation3 + $0x104] sm:$0xf] %v1585_v2  ;;  %v372_v4 = vmul.f32 %v7253_v38, %v305_v56  ;;  %1087 = vst [vmem:[#allocation2 + $0x6c] sm:$0xf] %v5760_v57  ;;  %4504 = vmatprep.mubr.bf16.mxu0 %v6544_v43 }
  0x86   : > { %1088 = vst [vmem:[#allocation2 + $0x70] sm:$0xf] %v5761_v58  ;;  %v1588_v5 = vrot.slane %v1472_v59, 6  ;;  %v1591_v6 = vrot.slane %v1473_v60, 6  ;;  %v1743_v7 = vld [vmem:[#allocation2 + $0x48] sm:$0xf]  ;;  %4505 = vmatmul.mubr.bf16.gmra.mxu0 %v6549_v0 }
  0x87   : > { %v1337_v8 = vrot.slane %v1207_v3, 5  ;;  %v766_v9 = vsel %vm679_vm4, %v496_v1, 0.0  ;;  %v1744_v10 = vld [vmem:[#allocation2 + $0x4c] sm:$0xf]  ;;  %1775 = vst [vmem:[#allocation3 + $0x12c] sm:$0xf] %v1743_v7  ;;  %v439_v11 = vadd.f32 %v7267_v50, %v372_v4 }
  0x88   : > { %v5759_v44 = vpack.c.bf16 %v766_v9, %v766_v9  ;;  %v1589_v12 = vsel %vm7182_vm7, %v5442_v61, %v1588_v5  ;;  %v1590_v14 = vrot.slane %v1588_v5, 4  ;;  %1776 = vst [vmem:[#allocation3 + $0x150] sm:$0xf] %v1744_v10  ;;  %v1136_v16 = vld [vmem:[#allocation2 + $0x60] sm:$0xf]  ;;  %v5864_v36 = vld [vmem:[%s6970_s21 + $0x78] sm:$0xff]  }
  0x89   : > { %v1338_v15 = vsel %vm6963_vm2, %v1336_v33, %v1337_v8  ;;  %1710 = vst [vmem:[#allocation3 + $0x128] sm:$0xf] %v1589_v12  ;;  %v1137_v17 = vld [vmem:[#allocation2 + $0x64] sm:$0xf]  ;;  %v1208_v18 = vld [vmem:[#allocation2 + $0x60] sm:$0xe]  ;;  %v5806_v40 = vunpack.c.l.bf16 %v5864_v36  ;;  %v5807_v41 = vunpack.c.h.bf16 %v5864_v36 }
  0x8a   : > { %1442 = vst [vmem:[#allocation3 + $0x220] sm:$0xf] %v1338_v15  ;;  %1086 = vst [vmem:[#allocation2 + $0x68] sm:$0x3] %v5759_v44  ;;  %v1592_v19 = vsel %vm7182_vm7, %v1590_v14, %v1591_v6  ;;  %v1209_v20 = vld [vmem:[#allocation2 + $0x64] sm:$0xf] }
  0x8b   : > { %1168 = vst [vmem:[#allocation3 + $0x240] sm:$0xf] %v1136_v16  ;;  %1169 = vst [vmem:[#allocation3 + $0x264] sm:$0xf] %v1137_v17  ;;  %v5430_v21 = vrot.slane %v1208_v18, 9  ;;  %v499_v23 = vmax.f32 %v439_v11, 0.0  ;;  %v373_v53 = vmul.f32 %v7253_v38, %v5806_v40  ;;  %v374_v54 = vmul.f32 %v7253_v38, %v5807_v41 }
  0x8c   : > { %1711 = vst [vmem:[#allocation3 + $0x14c] sm:$0xf] %v1592_v19  ;;  %v1341_v26 = vrot.slane %v1209_v20, 5  ;;  %v6564_v28 = vld [vmem:[#allocation3 + $0xe4] ss:$36 sps:$4 sm:$0xff]   ;;  %v6584_v49 = vld [vmem:[%s8308_s3 + $0x148] sm:$0xff]  }
  0x8d   : > { %v6567_v29 = vld [vmem:[#allocation3 + $0xe0] ss:$36 sps:$4 sm:$0xff]   ;;  %v769_v30 = vsel %vm679_vm4, %v499_v23, 0.0  ;;  %v1138_v34 = vld [vmem:[#allocation2 + $0x6c] sm:$0xf]  ;;  %4641 = vmatprep.mubr.bf16.mxu1 %v6564_v28  ;;  %6112 = vmatprep.subr.bf16.mxu0 %v6584_v49  ;;  %v440_v43 = vadd.f32 %v7267_v50, %v373_v53  ;;  %v441_v0 = vadd.f32 %v7267_v50, %v374_v54  ;;  %v249_v7 = vld [vmem:[%s6970_s21 + $0x84] sm:$0xff]  }
  0x8e   : > { %v1342_v31 = vsel %vm6963_vm2, %v5430_v21, %v1341_v26  ;;  %v1343_v32 = vrot.slane %v1341_v26, 4  ;;  %v5762_v33 = vpack.c.bf16 %v769_v30, %v769_v30  ;;  %v1139_v35 = vld [vmem:[#allocation2 + $0x70] sm:$0xf]  ;;  %1170 = vst [vmem:[#allocation3 + $0x288] sm:$0xf] %v1138_v34  ;;  %4642 = vmatmul.mubr.bf16.gmra.mxu1 %v6567_v29  ;;  %v6585_v2 = vld [vmem:[%s8308_s3 + $0x108] sm:$0xff]   ;;  %v309_v17 = vunpack.c.l.bf16 %v249_v7 }
  0x8f   : > { %1443 = vst [vmem:[#allocation3 + $0x244] sm:$0xf] %v1342_v31  ;;  %1171 = vst [vmem:[#allocation3 + $0x2ac] sm:$0xf] %v1139_v35  ;;  %v1211_v37 = vld [vmem:[#allocation2 + $0x6c] sm:$0xe]  ;;  %6113 = vmatpush3.bf16.msra.mxu0 %v6585_v2  ;;  %v310_v21 = vunpack.c.h.bf16 %v249_v7 }
  0x90   : > { %v1212_v39 = vld [vmem:[#allocation2 + $0x70] sm:$0xf]  ;;  %v248_v42 = vld [vmem:[%s6970_s21 + $0x80] sm:$0x3]  ;;  %1089 = vst [vmem:[#allocation2 + $0x74] sm:$0x3] %v5762_v33  ;;  %v376_v31 = vmul.f32 %v7253_v38, %v309_v17 }
  0x91   : > { %v5431_v45 = vrot.slane %v1211_v37, 9  ;;  %v1348_v46 = vrot.slane %v1212_v39, 5  ;;  %v308_v47 = vunpack.c.l.bf16 %v248_v42  ;;  %v1474_v48 = vld [vmem:[#allocation2 + $0x3c] sm:$0xc]  ;;  %v6552_v51 = vld [vmem:[#allocation3 + $0x1fc] ss:$36 sps:$4 sm:$0xff]  }
  0x92   : > { %v6557_v52 = vld [vmem:[#allocation3 + $0x1f8] ss:$36 sps:$4 sm:$0xff]   ;;  %v5443_v55 = vrot.slane %v1474_v48, 10  ;;  %v6570_v59 = vld [vmem:[#allocation3 + $0x12c] ss:$36 sps:$4 sm:$0xff]   ;;  %4512 = vmatprep.mubr.bf16.mxu0 %v6552_v51  ;;  %v500_v9 = vmax.f32 %v440_v43, 0.0  ;;  %v443_v42 = vadd.f32 %v7267_v50, %v376_v31 }
  0x93   : > { %v1210_v56 = vld [vmem:[#allocation2 + $0x68] sm:$0x1]  ;;  %v1349_v57 = vsel %vm6963_vm2, %v5431_v45, %v1348_v46  ;;  %v1350_v58 = vrot.slane %v1348_v46, 4  ;;  %v375_v60 = vmul.f32 %v7253_v38, %v308_v47  ;;  %v6575_v62 = vld [vmem:[#allocation3 + $0x128] ss:$36 sps:$4 sm:$0xff]   ;;  %4513 = vmatmul.mubr.bf16.gmra.mxu0 %v6557_v52  ;;  %4649 = vmatprep.mubr.bf16.mxu1 %v6570_v59  ;;  %v501_v10 = vmax.f32 %v441_v0, 0.0 }
  0x94   : > { %v1344_v61 = vrot.slane %v1210_v56, 5  ;;  %1445 = vst [vmem:[#allocation3 + $0x28c] sm:$0xf] %v1349_v57  ;;  %v1475_v1 = vld [vmem:[#allocation2 + $0x40] sm:$0xf]  ;;  %v770_v20 = vsel %vm614_vm3, %v500_v9, 0.0 }
  0x95   : > { %v442_v3 = vadd.f32 %v7267_v50, %v375_v60  ;;  %v1476_v4 = vld [vmem:[#allocation2 + $0x44] sm:$0x3]  ;;  %v1595_v5 = vrot.slane %v1475_v1, 6  ;;  %v1745_v6 = vld [vmem:[#allocation2 + $0x54] sm:$0xf]  ;;  %v5843_v27 = vpack.c.bf16 %v501_v10, %v770_v20  ;;  %v6606_v49 = vld [vmem:[%s8308_s3 + $0x1d8] sm:$0xff]  }
  0x96   : > { %v1345_v8 = vsel %vm6963_vm2, %v1343_v32, %v1344_v61  ;;  %v1598_v44 = vrot.slane %v1476_v4, 6  ;;  %v1746_v11 = vld [vmem:[#allocation2 + $0x58] sm:$0xf]  ;;  %1777 = vst [vmem:[#allocation3 + $0x174] sm:$0xf] %v1745_v6  ;;  %v6590_v12 = vld [vmem:[%s8308_s3 + $0x1e0] sm:$0xff]   ;;  %4650 = vmatmul.mubr.bf16.gmra.mxu1 %v6575_v62  ;;  %v377_v32 = vmul.f32 %v7253_v38, %v310_v21 }
  0x97   : > { %1444 = vst [vmem:[#allocation3 + $0x268] sm:$0xf] %v1345_v8  ;;  %v502_v14 = vmax.f32 %v442_v3, 0.0  ;;  %v1596_v15 = vsel %vm7182_vm7, %v5443_v55, %v1595_v5  ;;  %v1597_v16 = vrot.slane %v1595_v5, 4  ;;  %1778 = vst [vmem:[#allocation3 + $0x198] sm:$0xf] %v1746_v11  ;;  %6218 = vmatprep.subr.bf16.mxu1 %v6590_v12 }
  0x98   : > { %v6593_v18 = vld [vmem:[%s8308_s3 + $0x1a0] sm:$0xff]   ;;  %v1213_v19 = vld [vmem:[#allocation2 + $0x74] sm:$0x1]  ;;  %1712 = vst [vmem:[#allocation3 + $0x170] sm:$0xf] %v1596_v15  ;;  %5872 = vst [vmem:[#allocation2 + $0x78] sm:$0xff] %v5843_v27   ;;  %v444_v45 = vadd.f32 %v7267_v50, %v377_v32 }
  0x99   : > { %v6594_v23 = vld [vmem:[%s8308_s3 + $0x140] sm:$0xff]   ;;  %v1351_v25 = vrot.slane %v1213_v19, 5  ;;  %v772_v26 = vsel %vm679_vm4, %v502_v14, 0.0  ;;  %v1599_v28 = vsel %vm7182_vm7, %v1597_v16, %v1598_v44  ;;  %v251_v30 = vld [vmem:[%s6970_s21 + $0x8c] sm:$0x3]  ;;  %6219 = vmatpush3.bf16.msra.mxu1 %v6593_v18  ;;  %v6609_v54 = vld [vmem:[%s8308_s3 + $0x198] sm:$0xff]  }
  0x9a   : > { %v5765_v29 = vpack.c.bf16 %v772_v26, %v772_v26  ;;  %1713 = vst [vmem:[#allocation3 + $0x194] sm:$0xf] %v1599_v28  ;;  %v1477_v33 = vld [vmem:[#allocation2 + $0x48] sm:$0xc]  ;;  %v1478_v34 = vld [vmem:[#allocation2 + $0x4c] sm:$0xf]  ;;  %6114 = vmatprep.subr.bf16.mxu0 %v6594_v23  ;;  %v311_v36 = vunpack.c.l.bf16 %v251_v30  ;;  %6220 = vmatprep.subr.bf16.mxu1 %v6606_v49 }
  0x9b   : > { %v1352_v35 = vsel %vm6963_vm2, %v1350_v58, %v1351_v25  ;;  %v1479_v37 = vld [vmem:[#allocation2 + $0x50] sm:$0x3]  ;;  %v5444_v39 = vrot.slane %v1477_v33, 10  ;;  %v1602_v40 = vrot.slane %v1478_v34, 6  ;;  %v6595_v41 = vld [vmem:[%s8308_s3 + $0x100] sm:$0xff]   ;;  %v503_v57 = vmax.f32 %v443_v42, 0.0 }
  0x9c   : > { %1446 = vst [vmem:[#allocation3 + $0x2b0] sm:$0xf] %v1352_v35  ;;  %1092 = vst [vmem:[#allocation2 + $0x80] sm:$0x3] %v5765_v29  ;;  %v1605_v46 = vrot.slane %v1479_v37, 6  ;;  %v378_v51 = vmul.f32 %v7253_v38, %v311_v36  ;;  %6115 = vmatpush3.bf16.msra.mxu0 %v6595_v41  ;;  %v504_v59 = vmax.f32 %v444_v45, 0.0 }
  0x9d   : > { %v1747_v47 = vld [vmem:[#allocation2 + $0x60] sm:$0xf]  ;;  %v1748_v48 = vld [vmem:[#allocation2 + $0x64] sm:$0xf]  ;;  %v1603_v52 = vsel %vm7182_vm7, %v5444_v39, %v1602_v40  ;;  %v1604_v53 = vrot.slane %v1602_v40, 4  ;;  %6221 = vmatpush3.bf16.msra.mxu1 %v6609_v54  ;;  %v773_v61 = vsel %vm614_vm3, %v503_v57, 0.0 }
  0x9e   : > { %1779 = vst [vmem:[#allocation3 + $0x1bc] sm:$0xf] %v1747_v47  ;;  %1780 = vst [vmem:[#allocation3 + $0x1e0] sm:$0xf] %v1748_v48  ;;  %v6562_v55 = vld [vmem:[#allocation3 + $0x244] ss:$36 sps:$4 sm:$0xff]   ;;  %v445_v58 = vadd.f32 %v7267_v50, %v378_v51  ;;  %v5766_v2 = vpack.c.bf16 %v773_v61, %v773_v61  ;;  %v5767_v3 = vpack.c.bf16 %v504_v59, %v504_v59 }
  0x9f   : > { %v6566_v56 = vld [vmem:[#allocation3 + $0x240] ss:$36 sps:$4 sm:$0xff]   ;;  %1714 = vst [vmem:[#allocation3 + $0x1b8] sm:$0xf] %v1603_v52  ;;  %v1606_v60 = vsel %vm7182_vm7, %v1604_v53, %v1605_v46  ;;  %4520 = vmatprep.mubr.bf16.mxu0 %v6562_v55  ;;  %v7394_v62 = vld [vmem:[%s8308_s3 + $0x238] sm:$0xff]   ;;  %v6636_v49 = vld [vmem:[%s8308_s3 + $0x1c8] sm:$0xff]  }
  0xa0   : > { %1715 = vst [vmem:[#allocation3 + $0x1dc] sm:$0xf] %v1606_v60  ;;  %4521 = vmatmul.mubr.bf16.gmra.mxu0 %v6566_v56  ;;  %v6580_v43 = vld [vmem:[#allocation3 + $0x174] ss:$36 sps:$4 sm:$0xff]   ;;  %v505_v1 = vmax.f32 %v445_v58, 0.0  ;;  %6348 = vmatprep.subr.bf16.mxu0 %v7394_v62  ;;  %v6621_v12 = vld [vmem:[%s8308_s3 + $0x1d0] sm:$0xff]  }
  0xa1   : > { %v6583_v0 = vld [vmem:[#allocation3 + $0x170] ss:$36 sps:$4 sm:$0xff]   ;;  %v1140_v4 = vld [vmem:[#allocation2 + $0x78] sm:$0xf]  ;;  %v1141_v5 = vld [vmem:[#allocation2 + $0x7c] sm:$0xf]  ;;  %4657 = vmatprep.mubr.bf16.mxu1 %v6580_v43  ;;  %6222 = vmatprep.subr.bf16.mxu1 %v6621_v12 }
  0xa2   : > { %v1214_v6 = vld [vmem:[#allocation2 + $0x78] sm:$0xe]  ;;  %1172 = vst [vmem:[#allocation3 + $0x2d0] sm:$0xf] %v1140_v4  ;;  %1173 = vst [vmem:[#allocation3 + $0x2f4] sm:$0xf] %v1141_v5  ;;  %4658 = vmatmul.mubr.bf16.gmra.mxu1 %v6583_v0 }
  0xa3   : > { %v6568_v7 = vld [vmem:[#allocation3 + $0x28c] ss:$36 sps:$4 sm:$0xff]   ;;  %v5432_v9 = vrot.slane %v1214_v6, 9  ;;  %1093 = vst [vmem:[#allocation2 + $0x84] sm:$0xf] %v5766_v2  ;;  %v775_v11 = vsel %vm679_vm4, %v505_v1, 0.0 }
  0xa4   : > { %v6574_v8 = vld [vmem:[#allocation3 + $0x288] ss:$36 sps:$4 sm:$0xff]   ;;  %1094 = vst [vmem:[#allocation2 + $0x88] sm:$0xf] %v5767_v3  ;;  %v1216_v44 = vld [vmem:[#allocation2 + $0x80] sm:$0x1]  ;;  %4528 = vmatprep.mubr.bf16.mxu0 %v6568_v7  ;;  %v5768_v16 = vpack.c.bf16 %v775_v11, %v775_v11 }
  0xa5   : > { %v1215_v10 = vld [vmem:[#allocation2 + $0x7c] sm:$0xf]  ;;  %v1358_v15 = vrot.slane %v1216_v44, 5  ;;  %v6624_v17 = vld [vmem:[%s8308_s3 + $0x190] sm:$0xff]   ;;  %v1481_v19 = vld [vmem:[#allocation2 + $0x58] sm:$0xf] }
  0xa6   : > { %v1355_v14 = vrot.slane %v1215_v10, 5  ;;  %v1480_v18 = vld [vmem:[#allocation2 + $0x54] sm:$0xc]  ;;  %1095 = vst [vmem:[#allocation2 + $0x8c] sm:$0x3] %v5768_v16  ;;  %6223 = vmatpush3.bf16.msra.mxu1 %v6624_v17  ;;  %v1609_v28 = vrot.slane %v1481_v19, 6 }
  0xa7   : > { %v6588_v23 = vld [vmem:[#allocation3 + $0x1bc] ss:$36 sps:$4 sm:$0xff]   ;;  %v1482_v26 = vld [vmem:[#allocation2 + $0x5c] sm:$0x3]  ;;  %v5445_v27 = vrot.slane %v1480_v18, 10  ;;  %6224 = vmatprep.subr.bf16.mxu1 %v6636_v49 }
  0xa8   : > { %v1356_v20 = vsel %vm6963_vm2, %v5432_v9, %v1355_v14  ;;  %v1357_v21 = vrot.slane %v1355_v14, 4  ;;  %v6592_v25 = vld [vmem:[#allocation3 + $0x1b8] ss:$36 sps:$4 sm:$0xff]   ;;  %4529 = vmatmul.mubr.bf16.gmra.mxu0 %v6574_v8  ;;  %4665 = vmatprep.mubr.bf16.mxu1 %v6588_v23  ;;  %v1612_v31 = vrot.slane %v1482_v26, 6  ;;  %v1750_v32 = vld [vmem:[#allocation2 + $0x70] sm:$0xf] }
  0xa9   : > { %1447 = vst [vmem:[#allocation3 + $0x2d4] sm:$0xf] %v1356_v20  ;;  %v1749_v29 = vld [vmem:[#allocation2 + $0x6c] sm:$0xf]  ;;  %v1799_v33 = vld [vmem:[#allocation2 + $0x18] sm:$0xe]  ;;  %v1610_v37 = vsel %vm7182_vm7, %v5445_v27, %v1609_v28 }
  0xaa   : > { %v1359_v30 = vsel %vm6963_vm2, %v1357_v21, %v1358_v15  ;;  %1781 = vst [vmem:[#allocation3 + $0x204] sm:$0xf] %v1749_v29  ;;  %v1142_v34 = vld [vmem:[#allocation2 + $0x84] sm:$0xf]  ;;  %1782 = vst [vmem:[#allocation3 + $0x228] sm:$0xf] %v1750_v32  ;;  %4666 = vmatmul.mubr.bf16.gmra.mxu1 %v6592_v25 }
  0xab   : > { %1448 = vst [vmem:[#allocation3 + $0x2f8] sm:$0xf] %v1359_v30  ;;  %v1143_v35 = vld [vmem:[#allocation2 + $0x88] sm:$0xf]  ;;  %v1217_v36 = vld [vmem:[#allocation2 + $0x84] sm:$0xe] }
  0xac   : > { %1174 = vst [vmem:[#allocation3 + $0x318] sm:$0xf] %v1142_v34  ;;  %1175 = vst [vmem:[#allocation3 + $0x33c] sm:$0xf] %v1143_v35  ;;  %v1218_v39 = vld [vmem:[#allocation2 + $0x88] sm:$0xf] }
  0xad   : > { %v5433_v40 = vrot.slane %v1217_v36, 9  ;;  %v1611_v41 = vrot.slane %v1609_v28, 4  ;;  %1716 = vst [vmem:[#allocation3 + $0x200] sm:$0xf] %v1610_v37  ;;  %v1800_v42 = vld [vmem:[#allocation2 + $0x1c] sm:$0xf] }
  0xae   : > { %v1362_v45 = vrot.slane %v1218_v39, 5  ;;  %v1801_v46 = vld [vmem:[#allocation2 + $0x20] sm:$0x1]  ;;  %v5454_v47 = vrot.slane %v1799_v33, 9  ;;  %v1897_v48 = vrot.slane %v1800_v42, 5  ;;  %v6639_v55 = vld [vmem:[%s8308_s3 + $0x188] sm:$0xff]  }
  0xaf   : > { %v1613_v51 = vsel %vm7182_vm7, %v1611_v41, %v1612_v31  ;;  %v1900_v52 = vrot.slane %v1801_v46, 5  ;;  %v2071_v53 = vld [vmem:[#allocation2 + $0x18] sm:$0xc]  ;;  %v2072_v54 = vld [vmem:[#allocation2 + $0x1c] sm:$0xf]  ;;  %6225 = vmatpush3.bf16.msra.mxu1 %v6639_v55  ;;  %v5867_v27 = vld [vmem:[%s6970_s21 + $0xc0] sm:$0xff]  }
  0xb0   : > { %v1219_v56 = vld [vmem:[#allocation2 + $0x8c] sm:$0x1]  ;;  %v1363_v57 = vsel %vm6963_vm2, %v5433_v40, %v1362_v45  ;;  %v1364_v58 = vrot.slane %v1362_v45, 4  ;;  %1717 = vst [vmem:[#allocation3 + $0x224] sm:$0xf] %v1613_v51  ;;  %v1898_v59 = vsel %vm6963_vm2, %v5454_v47, %v1897_v48  ;;  %v1899_v60 = vrot.slane %v1897_v48, 4 }
  0xb1   : > { %v2073_v61 = vld [vmem:[#allocation2 + $0x20] sm:$0x3]  ;;  %v1365_v43 = vrot.slane %v1219_v56, 5  ;;  %1449 = vst [vmem:[#allocation3 + $0x31c] sm:$0xf] %v1363_v57  ;;  %v5470_v0 = vrot.slane %v2071_v53, 10  ;;  %v5818_v31 = vunpack.c.l.bf16 %v5867_v27  ;;  %v5819_v32 = vunpack.c.h.bf16 %v5867_v27 }
  0xb2   : > { %2039 = vst [vmem:[#allocation3 + $0x10] sm:$0xf] %v1898_v59  ;;  %v2169_v1 = vrot.slane %v2072_v54, 6  ;;  %v2172_v2 = vrot.slane %v2073_v61, 6  ;;  %v1901_v3 = vsel %vm6963_vm2, %v1899_v60, %v1900_v52  ;;  %v1483_v4 = vld [vmem:[#allocation2 + $0x60] sm:$0xc] }
  0xb3   : > { %v1484_v5 = vld [vmem:[#allocation2 + $0x64] sm:$0xf]  ;;  %v1485_v6 = vld [vmem:[#allocation2 + $0x68] sm:$0x3]  ;;  %v1366_v9 = vsel %vm6963_vm2, %v1364_v58, %v1365_v43  ;;  %2040 = vst [vmem:[#allocation3 + $0x34] sm:$0xf] %v1901_v3  ;;  %v391_v42 = vmul.f32 %v7253_v38, %v5818_v31  ;;  %v392_v45 = vmul.f32 %v7253_v38, %v5819_v32 }
  0xb4   : > { %v6578_v7 = vld [vmem:[#allocation3 + $0x2d4] ss:$36 sps:$4 sm:$0xff]   ;;  %v2170_v10 = vsel %vm7182_vm7, %v5470_v0, %v2169_v1  ;;  %v2171_v44 = vrot.slane %v2169_v1, 4  ;;  %1450 = vst [vmem:[#allocation3 + $0x340] sm:$0xf] %v1366_v9  ;;  %v5446_v11 = vrot.slane %v1483_v4, 10 }
  0xb5   : > { %v6582_v8 = vld [vmem:[#allocation3 + $0x2d0] ss:$36 sps:$4 sm:$0xff]   ;;  %2311 = vst [vmem:[#allocation3 + $0x14] sm:$0xf] %v2170_v10  ;;  %v1616_v12 = vrot.slane %v1484_v5, 6  ;;  %v1619_v14 = vrot.slane %v1485_v6, 6  ;;  %4536 = vmatprep.mubr.bf16.mxu0 %v6578_v7  ;;  %v458_v54 = vadd.f32 %v7267_v50, %v391_v42  ;;  %v459_v38 = vadd.f32 %v7267_v50, %v392_v45 }
  0xb6   : > { %v1751_v15 = vld [vmem:[#allocation2 + $0x78] sm:$0xf]  ;;  %v2173_v16 = vsel %vm7182_vm7, %v2171_v44, %v2172_v2  ;;  %v1752_v17 = vld [vmem:[#allocation2 + $0x7c] sm:$0xf]  ;;  %v1802_v18 = vld [vmem:[#allocation2 + $0x24] sm:$0xe]  ;;  %4537 = vmatmul.mubr.bf16.gmra.mxu0 %v6582_v8 }
  0xb7   : > { %1783 = vst [vmem:[#allocation3 + $0x24c] sm:$0xf] %v1751_v15  ;;  %v1803_v19 = vld [vmem:[#allocation2 + $0x28] sm:$0xf]  ;;  %2312 = vst [vmem:[#allocation3 + $0x38] sm:$0xf] %v2173_v16  ;;  %v1617_v20 = vsel %vm7182_vm7, %v5446_v11, %v1616_v12 }
  0xb8   : > { %v1618_v21 = vrot.slane %v1616_v12, 4  ;;  %1784 = vst [vmem:[#allocation3 + $0x270] sm:$0xf] %v1752_v17  ;;  %v1804_v23 = vld [vmem:[#allocation2 + $0x2c] sm:$0x1]  ;;  %v5455_v25 = vrot.slane %v1802_v18, 9 }
  0xb9   : > { %v1904_v26 = vrot.slane %v1803_v19, 5  ;;  %v6596_v28 = vld [vmem:[#allocation3 + $0x204] ss:$36 sps:$4 sm:$0xff]   ;;  %1718 = vst [vmem:[#allocation3 + $0x248] sm:$0xf] %v1617_v20  ;;  %v1907_v30 = vrot.slane %v1804_v23, 5 }
  0xba   : > { %v6601_v29 = vld [vmem:[#allocation3 + $0x200] ss:$36 sps:$4 sm:$0xff]   ;;  %v1620_v33 = vsel %vm7182_vm7, %v1618_v21, %v1619_v14  ;;  %v2074_v36 = vld [vmem:[#allocation2 + $0x24] sm:$0xc]  ;;  %v2075_v37 = vld [vmem:[#allocation2 + $0x28] sm:$0xf]  ;;  %4673 = vmatprep.mubr.bf16.mxu1 %v6596_v28 }
  0xbb   : > { %v1905_v34 = vsel %vm6963_vm2, %v5455_v25, %v1904_v26  ;;  %v1906_v35 = vrot.slane %v1904_v26, 4  ;;  %1719 = vst [vmem:[#allocation3 + $0x26c] sm:$0xf] %v1620_v33  ;;  %v2076_v39 = vld [vmem:[#allocation2 + $0x2c] sm:$0x3]  ;;  %v5471_v40 = vrot.slane %v2074_v36, 10  ;;  %4674 = vmatmul.mubr.bf16.gmra.mxu1 %v6601_v29 }
  0xbc   : > { %2041 = vst [vmem:[#allocation3 + $0x58] sm:$0xf] %v1905_v34  ;;  %v2176_v41 = vrot.slane %v2075_v37, 6  ;;  %v2179_v47 = vrot.slane %v2076_v39, 6  ;;  %v6651_v48 = vld [vmem:[%s8308_s3 + $0x1c0] sm:$0xff]   ;;  %v518_v57 = vmax.f32 %v458_v54, 0.0 }
  0xbd   : > { %v1908_v46 = vsel %vm6963_vm2, %v1906_v35, %v1907_v30  ;;  %v6586_v49 = vld [vmem:[#allocation3 + $0x31c] ss:$36 sps:$4 sm:$0xff]   ;;  %6226 = vmatprep.subr.bf16.mxu1 %v6651_v48  ;;  %v519_v59 = vmax.f32 %v459_v38, 0.0  ;;  %v1488_v61 = vld [vmem:[#allocation2 + $0x74] sm:$0x3]  ;;  %v6654_v8 = vld [vmem:[%s8308_s3 + $0x180] sm:$0xff]  }
  0xbe   : > { %v6591_v51 = vld [vmem:[#allocation3 + $0x318] ss:$36 sps:$4 sm:$0xff]   ;;  %2042 = vst [vmem:[#allocation3 + $0x7c] sm:$0xf] %v1908_v46  ;;  %v2177_v52 = vsel %vm7182_vm7, %v5471_v40, %v2176_v41  ;;  %v2178_v53 = vrot.slane %v2176_v41, 4  ;;  %4544 = vmatprep.mubr.bf16.mxu0 %v6586_v49  ;;  %v788_v0 = vsel %vm614_vm3, %v518_v57, 0.0  ;;  %6227 = vmatpush3.bf16.msra.mxu1 %v6654_v8 }
  0xbf   : > { %2313 = vst [vmem:[#allocation3 + $0x5c] sm:$0xf] %v2177_v52  ;;  %v6600_v55 = vld [vmem:[#allocation3 + $0x14] ss:$36 sps:$4 sm:$0xff]   ;;  %4545 = vmatmul.mubr.bf16.gmra.mxu0 %v6591_v51  ;;  %v1486_v58 = vld [vmem:[#allocation2 + $0x6c] sm:$0xc]  ;;  %v5858_v4 = vpack.c.bf16 %v519_v59, %v788_v0 }
  0xc0   : > { %v2180_v56 = vsel %vm7182_vm7, %v2178_v53, %v2179_v47  ;;  %4778 = vmatprep.mubr.bf16.mxu0 %v6600_v55  ;;  %v1487_v60 = vld [vmem:[#allocation2 + $0x70] sm:$0xf]  ;;  %v5447_v43 = vrot.slane %v1486_v58, 10  ;;  %v6598_v50 = vld [vmem:[#allocation3 + $0x10] ss:$36 sps:$4 sm:$0xff]   ;;  %v1626_v5 = vrot.slane %v1488_v61, 6 }
  0xc1   : > { %2314 = vst [vmem:[#allocation3 + $0x80] sm:$0xf] %v2180_v56  ;;  %v6602_v1 = vld [vmem:[#allocation3 + $0x24c] ss:$36 sps:$4 sm:$0xff]   ;;  %v1623_v3 = vrot.slane %v1487_v60, 6  ;;  %5875 = vst [vmem:[#allocation2 + $0xc0] sm:$0xff] %v5858_v4  }
  0xc2   : > { %v6607_v2 = vld [vmem:[#allocation3 + $0x248] ss:$36 sps:$4 sm:$0xff]   ;;  %v1753_v6 = vld [vmem:[#allocation2 + $0x84] sm:$0xf]  ;;  %v1754_v7 = vld [vmem:[#allocation2 + $0x88] sm:$0xf]  ;;  %4681 = vmatprep.mubr.bf16.mxu1 %v6602_v1 }
  0xc3   : > { %v1624_v9 = vsel %vm7182_vm7, %v5447_v43, %v1623_v3  ;;  %v1625_v10 = vrot.slane %v1623_v3, 4  ;;  %1785 = vst [vmem:[#allocation3 + $0x294] sm:$0xf] %v1753_v6  ;;  %1786 = vst [vmem:[#allocation3 + $0x2b8] sm:$0xf] %v1754_v7  ;;  %4682 = vmatmul.mubr.bf16.gmra.mxu1 %v6607_v2  ;;  %v267_v16 = vld [vmem:[%s6970_s21 + $0xcc] sm:$0xff]  }
  0xc4   : > { %v1805_v44 = vld [vmem:[#allocation2 + $0x30] sm:$0xe]  ;;  %v1806_v11 = vld [vmem:[#allocation2 + $0x34] sm:$0xf]  ;;  %1720 = vst [vmem:[#allocation3 + $0x290] sm:$0xf] %v1624_v9  ;;  %v327_v23 = vunpack.c.l.bf16 %v267_v16  ;;  %v328_v25 = vunpack.c.h.bf16 %v267_v16 }
  0xc5   : > { %v1807_v12 = vld [vmem:[#allocation2 + $0x38] sm:$0x1]  ;;  %v5456_v14 = vrot.slane %v1805_v44, 9  ;;  %v1911_v15 = vrot.slane %v1806_v11, 5  ;;  %v1627_v17 = vsel %vm7182_vm7, %v1625_v10, %v1626_v5  ;;  %v2077_v19 = vld [vmem:[#allocation2 + $0x30] sm:$0xc] }
  0xc6   : > { %v1914_v18 = vrot.slane %v1807_v12, 5  ;;  %v2078_v20 = vld [vmem:[#allocation2 + $0x34] sm:$0xf]  ;;  %1721 = vst [vmem:[#allocation3 + $0x2b4] sm:$0xf] %v1627_v17  ;;  %v5472_v30 = vrot.slane %v2077_v19, 10 }
  0xc7   : > { %v6625_v21 = vld [vmem:[%s8308_s3 + $0x230] sm:$0xff]   ;;  %v1912_v27 = vsel %vm6963_vm2, %v5456_v14, %v1911_v15  ;;  %v1913_v28 = vrot.slane %v1911_v15, 4  ;;  %4779 = vmatmul.mubr.bf16.vlgmr.msra.gmra.mxu0 %v6598_v50  ;;  %v2079_v29 = vld [vmem:[#allocation2 + $0x38] sm:$0x3]  ;;  %v2183_v31 = vrot.slane %v2078_v20, 6  ;;  %v6655_v60 = vld [vmem:[%s8308_s3 + $0x220] sm:$0xff]  }
  0xc8   : > { %v6604_v26 = vld [vmem:[#allocation3 + $0x5c] ss:$36 sps:$4 sm:$0xff]   ;;  %2043 = vst [vmem:[#allocation3 + $0xa0] sm:$0xf] %v1912_v27  ;;  %v1489_v32 = vld [vmem:[#allocation2 + $0x78] sm:$0xc]  ;;  %6349 = vmatpush3.bf16.msra.mxu0 %v7394_v62 }
  0xc9   : > { %v6753_v33 = vld [vmem:[%s8306_s1] ss:$0 sm:$0xff]  ;;  %4786 = vmatprep.mubr.bf16.mxu0 %v6604_v26  ;;  %v1915_v35 = vsel %vm6963_vm2, %v1913_v28, %v1914_v18  ;;  %v2186_v36 = vrot.slane %v2079_v29, 6  ;;  %v1490_v37 = vld [vmem:[#allocation2 + $0x7c] sm:$0xf]  ;;  %v5448_v40 = vrot.slane %v1489_v32, 10  ;;  %v2184_v45 = vsel %vm7182_vm7, %v5472_v30, %v2183_v31  ;;  %6350 = vmatprep.subr.bf16.mxu0 %v6625_v21 }
  0xca   : > { %v394_v34 = vmul.f32 %v6753_v33, %v327_v23  ;;  %v1491_v39 = vld [vmem:[#allocation2 + $0x80] sm:$0x3]  ;;  %v395_v41 = vmul.f32 %v6753_v33, %v328_v25  ;;  %v6608_v42 = vld [vmem:[#allocation3 + $0x58] ss:$36 sps:$4 sm:$0xff]   ;;  %2044 = vst [vmem:[#allocation3 + $0xc4] sm:$0xf] %v1915_v35 }
  0xcb   : > { %v2185_v46 = vrot.slane %v2183_v31, 4  ;;  %v1630_v47 = vrot.slane %v1490_v37, 6  ;;  %v1633_v48 = vrot.slane %v1491_v39, 6  ;;  %v1755_v49 = vld [vmem:[#allocation2 + $0x90] sm:$0xf]  ;;  %v6640_v62 = vld [vmem:[%s8308_s3 + $0x228] sm:$0xff]  }
  0xcc   : > { %2315 = vst [vmem:[#allocation3 + $0xa4] sm:$0xf] %v2184_v45  ;;  %v1756_v51 = vld [vmem:[#allocation2 + $0x94] sm:$0xf]  ;;  %1787 = vst [vmem:[#allocation3 + $0x2dc] sm:$0xf] %v1755_v49  ;;  %6351 = vmatpush3.bf16.msra.mxu0 %v6625_v21 }
  0xcd   : > { %v1808_v52 = vld [vmem:[#allocation2 + $0x3c] sm:$0xe]  ;;  %v1809_v53 = vld [vmem:[#allocation2 + $0x40] sm:$0xf]  ;;  %v2187_v55 = vsel %vm7182_vm7, %v2185_v46, %v2186_v36  ;;  %v1631_v56 = vsel %vm7182_vm7, %v5448_v40, %v1630_v47  ;;  %v1632_v57 = vrot.slane %v1630_v47, 4  ;;  %6352 = vmatprep.subr.bf16.mxu0 %v6640_v62  ;;  %v6681_v30 = vld [vmem:[%s8308_s3 + $0x210] sm:$0xff]  }
  0xce   : > { %v6754_v54 = vld [vmem:[%s8307_s2] ss:$0 sm:$0xff]  ;;  %1788 = vst [vmem:[#allocation3 + $0x300] sm:$0xf] %v1756_v51  ;;  %v1810_v58 = vld [vmem:[#allocation2 + $0x44] sm:$0x1] }
  0xcf   : > { %v461_v38 = vadd.f32 %v6754_v54, %v394_v34  ;;  %v5457_v59 = vrot.slane %v1808_v52, 9  ;;  %2316 = vst [vmem:[#allocation3 + $0xc8] sm:$0xf] %v2187_v55  ;;  %1722 = vst [vmem:[#allocation3 + $0x2d8] sm:$0xf] %v1631_v56  ;;  %v1918_v61 = vrot.slane %v1809_v53, 5  ;;  %v462_v1 = vadd.f32 %v6754_v54, %v395_v41  ;;  %4787 = vmatmul.mubr.bf16.gmra.mxu0 %v6608_v42 }
  0xd0   : > { %v1921_v43 = vrot.slane %v1810_v58, 5  ;;  %v2080_v0 = vld [vmem:[#allocation2 + $0x3c] sm:$0xc]  ;;  %v2081_v50 = vld [vmem:[#allocation2 + $0x40] sm:$0xf]  ;;  %v1634_v4 = vsel %vm7182_vm7, %v1632_v57, %v1633_v48  ;;  %6353 = vmatpush3.bf16.msra.mxu0 %v6640_v62  ;;  %v6694_v55 = vld [vmem:[%s8308_s3 + $0x208] sm:$0xff]  }
  0xd1   : > { %v6611_v2 = vld [vmem:[#allocation3 + $0x294] ss:$36 sps:$4 sm:$0xff]   ;;  %v5473_v5 = vrot.slane %v2080_v0, 10  ;;  %1723 = vst [vmem:[#allocation3 + $0x2fc] sm:$0xf] %v1634_v4  ;;  %v1919_v6 = vsel %vm6963_vm2, %v5457_v59, %v1918_v61  ;;  %v1920_v7 = vrot.slane %v1918_v61, 4  ;;  %6354 = vmatprep.subr.bf16.mxu0 %v6655_v60 }
  0xd2   : > { %v6615_v3 = vld [vmem:[#allocation3 + $0x290] ss:$36 sps:$4 sm:$0xff]   ;;  %v2190_v9 = vrot.slane %v2081_v50, 6  ;;  %4689 = vmatprep.mubr.bf16.mxu1 %v6611_v2  ;;  %2045 = vst [vmem:[#allocation3 + $0xe8] sm:$0xf] %v1919_v6  ;;  %v521_v44 = vmax.f32 %v461_v38, 0.0 }
  0xd3   : > { %v2082_v8 = vld [vmem:[#allocation2 + $0x44] sm:$0x3]  ;;  %v6668_v11 = vld [vmem:[%s8308_s3 + $0x218] sm:$0xff]   ;;  %4690 = vmatmul.mubr.bf16.gmra.mxu1 %v6615_v3  ;;  %v1922_v12 = vsel %vm6963_vm2, %v1920_v7, %v1921_v43  ;;  %v522_v16 = vmax.f32 %v462_v1, 0.0  ;;  %v1492_v17 = vld [vmem:[#allocation2 + $0x84] sm:$0xc] }
  0xd4   : > { %v2193_v10 = vrot.slane %v2082_v8, 6  ;;  %v2191_v14 = vsel %vm7182_vm7, %v5473_v5, %v2190_v9  ;;  %v2192_v15 = vrot.slane %v2190_v9, 4  ;;  %2046 = vst [vmem:[#allocation3 + $0x10c] sm:$0xf] %v1922_v12  ;;  %v791_v18 = vsel %vm614_vm3, %v521_v44, 0.0  ;;  %6355 = vmatpush3.bf16.msra.mxu0 %v6655_v60  ;;  %v6707_v50 = vld [vmem:[%s8308_s3 + $0x200] sm:$0xff]  }
  0xd5   : > { %2317 = vst [vmem:[#allocation3 + $0xec] sm:$0xf] %v2191_v14  ;;  %v1493_v20 = vld [vmem:[#allocation2 + $0x88] sm:$0xf]  ;;  %v1494_v21 = vld [vmem:[#allocation2 + $0x8c] sm:$0x3]  ;;  %v5784_v25 = vpack.c.bf16 %v791_v18, %v791_v18  ;;  %v5785_v26 = vpack.c.bf16 %v522_v16, %v522_v16  ;;  %6356 = vmatprep.subr.bf16.mxu0 %v6668_v11 }
  0xd6   : > { %v2194_v19 = vsel %vm7182_vm7, %v2192_v15, %v2193_v10  ;;  %v5449_v23 = vrot.slane %v1492_v17, 10  ;;  %v6613_v27 = vld [vmem:[#allocation3 + $0xa4] ss:$36 sps:$4 sm:$0xff]   ;;  %v1637_v29 = vrot.slane %v1493_v20, 6  ;;  %v1640_v31 = vrot.slane %v1494_v21, 6 }
  0xd7   : > { %v6616_v28 = vld [vmem:[#allocation3 + $0xa0] ss:$36 sps:$4 sm:$0xff]   ;;  %2318 = vst [vmem:[#allocation3 + $0x110] sm:$0xf] %v2194_v19  ;;  %v1757_v32 = vld [vmem:[#allocation2 + $0x9c] sm:$0xf]  ;;  %4794 = vmatprep.mubr.bf16.mxu0 %v6613_v27 }
  0xd8   : > { %v1758_v13 = vld [vmem:[#allocation2 + $0xa0] sm:$0xf]  ;;  %1111 = vst [vmem:[#allocation2 + $0xcc] sm:$0xf] %v5784_v25  ;;  %1112 = vst [vmem:[#allocation2 + $0xd0] sm:$0xf] %v5785_v26  ;;  %v1638_v35 = vsel %vm7182_vm7, %v5449_v23, %v1637_v29  ;;  %4795 = vmatmul.mubr.bf16.gmra.mxu0 %v6616_v28 }
  0xd9   : > { %v6617_v33 = vld [vmem:[#allocation3 + $0x2dc] ss:$36 sps:$4 sm:$0xff]   ;;  %v1639_v36 = vrot.slane %v1637_v29, 4  ;;  %1789 = vst [vmem:[#allocation3 + $0x324] sm:$0xf] %v1757_v32  ;;  %6357 = vmatpush3.bf16.msra.mxu0 %v6668_v11 }
  0xda   : > { %v6622_v34 = vld [vmem:[#allocation3 + $0x2d8] ss:$36 sps:$4 sm:$0xff]   ;;  %1790 = vst [vmem:[#allocation3 + $0x348] sm:$0xf] %v1758_v13  ;;  %1724 = vst [vmem:[#allocation3 + $0x320] sm:$0xf] %v1638_v35  ;;  %4697 = vmatprep.mubr.bf16.mxu1 %v6617_v33  ;;  %6358 = vmatprep.subr.bf16.mxu0 %v6681_v30 }
  0xdb   : > { %v1811_v37 = vld [vmem:[#allocation2 + $0x48] sm:$0xe]  ;;  %v1812_v39 = vld [vmem:[#allocation2 + $0x4c] sm:$0xf]  ;;  %v1813_v40 = vld [vmem:[#allocation2 + $0x50] sm:$0x1]  ;;  %v1641_v41 = vsel %vm7182_vm7, %v1639_v36, %v1640_v31  ;;  %4698 = vmatmul.mubr.bf16.gmra.mxu1 %v6622_v34 }
  0xdc   : > { %v5458_v42 = vrot.slane %v1811_v37, 9  ;;  %v1925_v45 = vrot.slane %v1812_v39, 5  ;;  %v1928_v46 = vrot.slane %v1813_v40, 5  ;;  %v2083_v47 = vld [vmem:[#allocation2 + $0x48] sm:$0xc] }
  0xdd   : > { %1725 = vst [vmem:[#allocation3 + $0x344] sm:$0xf] %v1641_v41  ;;  %v2084_v48 = vld [vmem:[#allocation2 + $0x4c] sm:$0xf]  ;;  %v2085_v49 = vld [vmem:[#allocation2 + $0x50] sm:$0x3]  ;;  %6359 = vmatpush3.bf16.msra.mxu0 %v6681_v30 }
  0xde   : > { %v5474_v62 = vrot.slane %v2083_v47, 10  ;;  %v1926_v51 = vsel %vm6963_vm2, %v5458_v42, %v1925_v45  ;;  %v1927_v52 = vrot.slane %v1925_v45, 4  ;;  %v2197_v53 = vrot.slane %v2084_v48, 6  ;;  %v1495_v38 = vld [vmem:[#allocation2 + $0x90] sm:$0xc]  ;;  %6360 = vmatprep.subr.bf16.mxu0 %v6694_v55 }
  0xdf   : > { %v2200_v54 = vrot.slane %v2085_v49, 6  ;;  %v6619_v56 = vld [vmem:[#allocation3 + $0xec] ss:$36 sps:$4 sm:$0xff]   ;;  %2047 = vst [vmem:[#allocation3 + $0x130] sm:$0xf] %v1926_v51  ;;  %v5450_v58 = vrot.slane %v1495_v38, 10 }
  0xe0   : > { %v6623_v57 = vld [vmem:[#allocation3 + $0xe8] ss:$36 sps:$4 sm:$0xff]   ;;  %v1929_v59 = vsel %vm6963_vm2, %v1927_v52, %v1928_v46  ;;  %v2198_v60 = vsel %vm7182_vm7, %v5474_v62, %v2197_v53  ;;  %v2199_v61 = vrot.slane %v2197_v53, 4  ;;  %v1496_v43 = vld [vmem:[#allocation2 + $0x94] sm:$0xf]  ;;  %4802 = vmatprep.mubr.bf16.mxu0 %v6619_v56 }
  0xe1   : > { %v1497_v0 = vld [vmem:[#allocation2 + $0x98] sm:$0x3]  ;;  %2048 = vst [vmem:[#allocation3 + $0x154] sm:$0xf] %v1929_v59  ;;  %2319 = vst [vmem:[#allocation3 + $0x134] sm:$0xf] %v2198_v60  ;;  %4803 = vmatmul.mubr.bf16.gmra.mxu0 %v6623_v57 }
  0xe2   : > { %v1644_v1 = vrot.slane %v1496_v43, 6  ;;  %v1647_v2 = vrot.slane %v1497_v0, 6  ;;  %v1759_v3 = vld [vmem:[#allocation2 + $0xa8] sm:$0xf]  ;;  %v1760_v4 = vld [vmem:[#allocation2 + $0xac] sm:$0xf]  ;;  %v2201_v5 = vsel %vm7182_vm7, %v2199_v61, %v2200_v54  ;;  %6361 = vmatpush3.bf16.msra.mxu0 %v6694_v55 }
  0xe3   : > { %1791 = vst [vmem:[#allocation3 + $0x36c] sm:$0xf] %v1759_v3  ;;  %1792 = vst [vmem:[#allocation3 + $0x390] sm:$0xf] %v1760_v4  ;;  %v1814_v6 = vld [vmem:[#allocation2 + $0x54] sm:$0xe]  ;;  %6362 = vmatprep.subr.bf16.mxu0 %v6707_v50 }
  0xe4   : > { %v1815_v7 = vld [vmem:[#allocation2 + $0x58] sm:$0xf]  ;;  %2320 = vst [vmem:[#allocation3 + $0x158] sm:$0xf] %v2201_v5  ;;  %v1645_v8 = vsel %vm7182_vm7, %v5450_v58, %v1644_v1  ;;  %v1646_v9 = vrot.slane %v1644_v1, 4  ;;  %v5459_v44 = vrot.slane %v1814_v6, 9 }
  0xe5   : > { %v1816_v10 = vld [vmem:[#allocation2 + $0x5c] sm:$0x1]  ;;  %v1932_v11 = vrot.slane %v1815_v7, 5  ;;  %v6626_v12 = vld [vmem:[#allocation3 + $0x324] ss:$36 sps:$4 sm:$0xff]  }
  0xe6   : > { %v6630_v14 = vld [vmem:[#allocation3 + $0x320] ss:$36 sps:$4 sm:$0xff]   ;;  %1726 = vst [vmem:[#allocation3 + $0x368] sm:$0xf] %v1645_v8  ;;  %v1935_v15 = vrot.slane %v1816_v10, 5  ;;  %v1648_v16 = vsel %vm7182_vm7, %v1646_v9, %v1647_v2  ;;  %4705 = vmatprep.mubr.bf16.mxu1 %v6626_v12  ;;  %6363 = vmatpush3.bf16.msra.mxu0 %v6707_v50 }
  0xe7   : > { %v1933_v17 = vsel %vm6963_vm2, %v5459_v44, %v1932_v11  ;;  %v1934_v18 = vrot.slane %v1932_v11, 4  ;;  %v2086_v19 = vld [vmem:[#allocation2 + $0x54] sm:$0xc]  ;;  %v2087_v20 = vld [vmem:[#allocation2 + $0x58] sm:$0xf]  ;;  %4706 = vmatmul.mubr.bf16.gmra.mxu1 %v6630_v14 }
  0xe8   : > { %1727 = vst [vmem:[#allocation3 + $0x38c] sm:$0xf] %v1648_v16  ;;  %2049 = vst [vmem:[#allocation3 + $0x178] sm:$0xf] %v1933_v17  ;;  %v2088_v21 = vld [vmem:[#allocation2 + $0x5c] sm:$0x3] }
  0xe9   : > { %v5475_v23 = vrot.slane %v2086_v19, 10  ;;  %v2204_v25 = vrot.slane %v2087_v20, 6  ;;  %v1936_v26 = vsel %vm6963_vm2, %v1934_v18, %v1935_v15  ;;  %v2207_v27 = vrot.slane %v2088_v21, 6  ;;  %v1498_v30 = vld [vmem:[#allocation2 + $0x9c] sm:$0xc] }
  0xea   : > { %2050 = vst [vmem:[#allocation3 + $0x19c] sm:$0xf] %v1936_v26  ;;  %v1499_v31 = vld [vmem:[#allocation2 + $0xa0] sm:$0xf]  ;;  %v5451_v34 = vrot.slane %v1498_v30, 10 }
  0xeb   : > { %v2205_v28 = vsel %vm7182_vm7, %v5475_v23, %v2204_v25  ;;  %v2206_v29 = vrot.slane %v2204_v25, 4  ;;  %v6628_v32 = vld [vmem:[#allocation3 + $0x134] ss:$36 sps:$4 sm:$0xff]   ;;  %v1651_v36 = vrot.slane %v1499_v31, 6  ;;  %v1761_v37 = vld [vmem:[#allocation2 + $0xb4] sm:$0xf] }
  0xec   : > { %2321 = vst [vmem:[#allocation3 + $0x17c] sm:$0xf] %v2205_v28  ;;  %v6631_v13 = vld [vmem:[#allocation3 + $0x130] ss:$36 sps:$4 sm:$0xff]   ;;  %4810 = vmatprep.mubr.bf16.mxu0 %v6628_v32  ;;  %v1762_v40 = vld [vmem:[#allocation2 + $0xb8] sm:$0xf] }
  0xed   : > { %v2208_v33 = vsel %vm7182_vm7, %v2206_v29, %v2207_v27  ;;  %v1500_v35 = vld [vmem:[#allocation2 + $0xa4] sm:$0x3]  ;;  %1793 = vst [vmem:[#allocation3 + $0x3b4] sm:$0xf] %v1761_v37  ;;  %v1817_v41 = vld [vmem:[#allocation2 + $0x60] sm:$0xe]  ;;  %4811 = vmatmul.mubr.bf16.gmra.mxu0 %v6631_v13  ;;  %v1652_v46 = vsel %vm7182_vm7, %v5451_v34, %v1651_v36 }
  0xee   : > { %2322 = vst [vmem:[#allocation3 + $0x1a0] sm:$0xf] %v2208_v33  ;;  %v1654_v39 = vrot.slane %v1500_v35, 6  ;;  %v6632_v42 = vld [vmem:[#allocation3 + $0x36c] ss:$36 sps:$4 sm:$0xff]   ;;  %v1653_v47 = vrot.slane %v1651_v36, 4 }
  0xef   : > { %v6637_v45 = vld [vmem:[#allocation3 + $0x368] ss:$36 sps:$4 sm:$0xff]   ;;  %1794 = vst [vmem:[#allocation3 + $0x3d8] sm:$0xf] %v1762_v40  ;;  %1728 = vst [vmem:[#allocation3 + $0x3b0] sm:$0xf] %v1652_v46  ;;  %4713 = vmatprep.mubr.bf16.mxu1 %v6632_v42 }
  0xf0   : > { %v1818_v48 = vld [vmem:[#allocation2 + $0x64] sm:$0xf]  ;;  %v1819_v49 = vld [vmem:[#allocation2 + $0x68] sm:$0x1]  ;;  %v5460_v62 = vrot.slane %v1817_v41, 9  ;;  %v1655_v51 = vsel %vm7182_vm7, %v1653_v47, %v1654_v39  ;;  %4714 = vmatmul.mubr.bf16.gmra.mxu1 %v6637_v45 }
  0xf1   : > { %v1939_v52 = vrot.slane %v1818_v48, 5  ;;  %v1942_v53 = vrot.slane %v1819_v49, 5  ;;  %v2089_v54 = vld [vmem:[#allocation2 + $0x60] sm:$0xc]  ;;  %v2090_v38 = vld [vmem:[#allocation2 + $0x64] sm:$0xf] }
  0xf2   : > { %1729 = vst [vmem:[#allocation3 + $0x3d4] sm:$0xf] %v1655_v51  ;;  %v2091_v55 = vld [vmem:[#allocation2 + $0x68] sm:$0x3]  ;;  %v5476_v56 = vrot.slane %v2089_v54, 10  ;;  %v2211_v57 = vrot.slane %v2090_v38, 6 }
  0xf3   : > { %v1940_v58 = vsel %vm6963_vm2, %v5460_v62, %v1939_v52  ;;  %v1941_v59 = vrot.slane %v1939_v52, 4  ;;  %v2214_v60 = vrot.slane %v2091_v55, 6  ;;  %v1501_v61 = vld [vmem:[#allocation2 + $0xa8] sm:$0xc]  ;;  %v1502_v43 = vld [vmem:[#allocation2 + $0xac] sm:$0xf] }
  0xf4   : > { %v6638_v50 = vld [vmem:[#allocation3 + $0x178] ss:$36 sps:$4 sm:$0xff]   ;;  %2051 = vst [vmem:[#allocation3 + $0x1c0] sm:$0xf] %v1940_v58  ;;  %v2212_v1 = vsel %vm7182_vm7, %v5476_v56, %v2211_v57  ;;  %v2213_v2 = vrot.slane %v2211_v57, 4  ;;  %v5452_v5 = vrot.slane %v1501_v61, 10 }
  0xf5   : > { %v6634_v0 = vld [vmem:[#allocation3 + $0x17c] ss:$36 sps:$4 sm:$0xff]   ;;  %v1943_v3 = vsel %vm6963_vm2, %v1941_v59, %v1942_v53  ;;  %2323 = vst [vmem:[#allocation3 + $0x1c4] sm:$0xf] %v2212_v1  ;;  %v1658_v6 = vrot.slane %v1502_v43, 6  ;;  %v5892_v55 = vpop.f32.mrf.mxu0 }
  0xf6   : > { %v1503_v4 = vld [vmem:[#allocation2 + $0xb0] sm:$0x3]  ;;  %v1763_v7 = vld [vmem:[#allocation2 + $0xc0] sm:$0xf]  ;;  %4818 = vmatprep.mubr.bf16.mxu0 %v6634_v0  ;;  %2052 = vst [vmem:[#allocation3 + $0x1e4] sm:$0xf] %v1943_v3  ;;  %v2215_v8 = vsel %vm7182_vm7, %v2213_v2, %v2214_v60 }
  0xf7   : > { %v1661_v9 = vrot.slane %v1503_v4, 6  ;;  %v1764_v10 = vld [vmem:[#allocation2 + $0xc4] sm:$0xf]  ;;  %1795 = vst [vmem:[#allocation3 + $0x3fc] sm:$0xf] %v1763_v7  ;;  %4819 = vmatmul.mubr.bf16.gmra.mxu0 %v6638_v50  ;;  %v1659_v11 = vsel %vm7182_vm7, %v5452_v5, %v1658_v6  ;;  %v1660_v12 = vrot.slane %v1658_v6, 4  ;;  %v5893_v50 = vpop.f32.mrf.mxu0 }
  0xf8   : > { %v1820_v44 = vld [vmem:[#allocation2 + $0x6c] sm:$0xe]  ;;  %2324 = vst [vmem:[#allocation3 + $0x1e8] sm:$0xf] %v2215_v8  ;;  %1796 = vst [vmem:[#allocation3 + $0x420] sm:$0xf] %v1764_v10  ;;  %v7565_v6 = vadd.f32 %v5893_v50, %v5892_v55 }
  0xf9   : > { %v1821_v14 = vld [vmem:[#allocation2 + $0x70] sm:$0xf]  ;;  %v1822_v15 = vld [vmem:[#allocation2 + $0x74] sm:$0x1]  ;;  %1730 = vst [vmem:[#allocation3 + $0x3f8] sm:$0xf] %v1659_v11  ;;  %v1662_v23 = vsel %vm7182_vm7, %v1660_v12, %v1661_v9 }
  0xfa   : > { %v5461_v16 = vrot.slane %v1820_v44, 9  ;;  %v1946_v17 = vrot.slane %v1821_v14, 5  ;;  %v1949_v18 = vrot.slane %v1822_v15, 5  ;;  %v2092_v19 = vld [vmem:[#allocation2 + $0x6c] sm:$0xc]  ;;  %v7569_v44 = vpop.f32.mrf.mxu0 }
  0xfb   : > { %v6641_v20 = vld [vmem:[#allocation3 + $0x3b4] ss:$36 sps:$4 sm:$0xff]   ;;  %v5477_v25 = vrot.slane %v2092_v19, 10  ;;  %1731 = vst [vmem:[#allocation3 + $0x41c] sm:$0xf] %v1662_v23 }
  0xfc   : > { %v6645_v21 = vld [vmem:[#allocation3 + $0x3b0] ss:$36 sps:$4 sm:$0xff]   ;;  %v1947_v26 = vsel %vm6963_vm2, %v5461_v16, %v1946_v17  ;;  %v1948_v27 = vrot.slane %v1946_v17, 4  ;;  %v2093_v28 = vld [vmem:[#allocation2 + $0x70] sm:$0xf]  ;;  %4721 = vmatprep.mubr.bf16.mxu1 %v6641_v20  ;;  %v7575_v23 = vpop.f32.mrf.mxu0 }
  0xfd   : > { %v2094_v29 = vld [vmem:[#allocation2 + $0x74] sm:$0x3]  ;;  %2053 = vst [vmem:[#allocation3 + $0x208] sm:$0xf] %v1947_v26  ;;  %v2218_v30 = vrot.slane %v2093_v28, 6  ;;  %4722 = vmatmul.mubr.bf16.gmra.mxu1 %v6645_v21 }
  0xfe   : > { %v2221_v31 = vrot.slane %v2094_v29, 6  ;;  %v1950_v32 = vsel %vm6963_vm2, %v1948_v27, %v1949_v18  ;;  %v6646_v35 = vld [vmem:[#allocation3 + $0x1c0] ss:$36 sps:$4 sm:$0xff]   ;;  %v1505_v39 = vld [vmem:[#allocation2 + $0xb8] sm:$0xf] }
  0xff   : > { %2054 = vst [vmem:[#allocation3 + $0x22c] sm:$0xf] %v1950_v32  ;;  %v2219_v13 = vsel %vm7182_vm7, %v5477_v25, %v2218_v30  ;;  %v2220_v33 = vrot.slane %v2218_v30, 4  ;;  %v6643_v34 = vld [vmem:[#allocation3 + $0x1c4] ss:$36 sps:$4 sm:$0xff]   ;;  %v1665_v42 = vrot.slane %v1505_v39, 6 }
 0x100   : > { %2325 = vst [vmem:[#allocation3 + $0x20c] sm:$0xf] %v2219_v13  ;;  %v1504_v37 = vld [vmem:[#allocation2 + $0xb4] sm:$0xc]  ;;  %4826 = vmatprep.mubr.bf16.mxu0 %v6643_v34  ;;  %v1506_v40 = vld [vmem:[#allocation2 + $0xbc] sm:$0x3]  ;;  %v5898_v13 = vpop.f32.mrf.mxu0 }
 0x101   : > { %v2222_v36 = vsel %vm7182_vm7, %v2220_v33, %v2221_v31  ;;  %v5453_v41 = vrot.slane %v1504_v37, 10  ;;  %v1765_v45 = vld [vmem:[#allocation2 + $0xcc] sm:$0xf]  ;;  %4827 = vmatmul.mubr.bf16.gmra.mxu0 %v6646_v35  ;;  %v1668_v48 = vrot.slane %v1506_v40, 6  ;;  %v1667_v62 = vrot.slane %v1665_v42, 4 }
 0x102   : > { %2326 = vst [vmem:[#allocation3 + $0x230] sm:$0xf] %v2222_v36  ;;  %v6647_v46 = vld [vmem:[#allocation3 + $0x3fc] ss:$36 sps:$4 sm:$0xff]   ;;  %1797 = vst [vmem:[#allocation3 + $0x444] sm:$0xf] %v1765_v45 }
 0x103   : > { %v6652_v47 = vld [vmem:[#allocation3 + $0x3f8] ss:$36 sps:$4 sm:$0xff]   ;;  %v1666_v49 = vsel %vm7182_vm7, %v5453_v41, %v1665_v42  ;;  %v1766_v51 = vld [vmem:[#allocation2 + $0xd0] sm:$0xf]  ;;  %v1823_v52 = vld [vmem:[#allocation2 + $0x78] sm:$0xe]  ;;  %4729 = vmatprep.mubr.bf16.mxu1 %v6647_v46  ;;  %v1669_v56 = vsel %vm7182_vm7, %v1667_v62, %v1668_v48  ;;  %v5899_v42 = vpop.f32.mrf.mxu0 }
 0x104   : > { %1732 = vst [vmem:[#allocation3 + $0x440] sm:$0xf] %v1666_v49  ;;  %1798 = vst [vmem:[#allocation3 + $0x468] sm:$0xf] %v1766_v51  ;;  %v1824_v53 = vld [vmem:[#allocation2 + $0x7c] sm:$0xf]  ;;  %v7585_v48 = vadd.f32 %v5899_v42, %v5898_v13  ;;  %v5964_v13 = vpop.f32.mrf.mxu1 }
 0x105   : > { %v1825_v54 = vld [vmem:[#allocation2 + $0x80] sm:$0x1]  ;;  %v5462_v38 = vrot.slane %v1823_v52, 9  ;;  %4730 = vmatmul.mubr.bf16.gmra.mxu1 %v6652_v47  ;;  %v1953_v57 = vrot.slane %v1824_v53, 5  ;;  %v2095_v59 = vld [vmem:[#allocation2 + $0x78] sm:$0xc] }
 0x106   : > { %v1956_v58 = vrot.slane %v1825_v54, 5  ;;  %v2096_v60 = vld [vmem:[#allocation2 + $0x7c] sm:$0xf]  ;;  %1733 = vst [vmem:[#allocation3 + $0x464] sm:$0xf] %v1669_v56  ;;  %v5478_v43 = vrot.slane %v2095_v59, 10 }
 0x107   : > { %v2097_v61 = vld [vmem:[#allocation2 + $0x80] sm:$0x3]  ;;  %v2225_v0 = vrot.slane %v2096_v60, 6  ;;  %v1954_v1 = vsel %vm6963_vm2, %v5462_v38, %v1953_v57  ;;  %v1955_v2 = vrot.slane %v1953_v57, 4  ;;  %v1826_v4 = vld [vmem:[#allocation2 + $0x84] sm:$0xe] }
 0x108   : > { %v2228_v3 = vrot.slane %v2097_v61, 6  ;;  %v1827_v5 = vld [vmem:[#allocation2 + $0x88] sm:$0xf]  ;;  %v6653_v8 = vld [vmem:[#allocation3 + $0x208] ss:$36 sps:$4 sm:$0xff]   ;;  %v5463_v14 = vrot.slane %v1826_v4, 9 }
 0x109   : > { %v6649_v7 = vld [vmem:[#allocation3 + $0x20c] ss:$36 sps:$4 sm:$0xff]   ;;  %2055 = vst [vmem:[#allocation3 + $0x250] sm:$0xf] %v1954_v1  ;;  %v2226_v9 = vsel %vm7182_vm7, %v5478_v43, %v2225_v0  ;;  %v2227_v10 = vrot.slane %v2225_v0, 4  ;;  %v1957_v11 = vsel %vm6963_vm2, %v1955_v2, %v1956_v58  ;;  %v1960_v15 = vrot.slane %v1827_v5, 5 }
 0x10a   : > { %2327 = vst [vmem:[#allocation3 + $0x254] sm:$0xf] %v2226_v9  ;;  %v1828_v12 = vld [vmem:[#allocation2 + $0x8c] sm:$0x1]  ;;  %v2098_v16 = vld [vmem:[#allocation2 + $0x84] sm:$0xc]  ;;  %4834 = vmatprep.mubr.bf16.mxu0 %v6649_v7 }
 0x10b   : > { %2056 = vst [vmem:[#allocation3 + $0x274] sm:$0xf] %v1957_v11  ;;  %v2229_v17 = vsel %vm7182_vm7, %v2227_v10, %v2228_v3  ;;  %v1963_v18 = vrot.slane %v1828_v12, 5  ;;  %v2099_v19 = vld [vmem:[#allocation2 + $0x88] sm:$0xf]  ;;  %v5479_v21 = vrot.slane %v2098_v16, 10  ;;  %4835 = vmatmul.mubr.bf16.gmra.mxu0 %v6653_v8  ;;  %v1961_v25 = vsel %vm6963_vm2, %v5463_v14, %v1960_v15 }
 0x10c   : > { %v2100_v20 = vld [vmem:[#allocation2 + $0x8c] sm:$0x3]  ;;  %2328 = vst [vmem:[#allocation3 + $0x278] sm:$0xf] %v2229_v17  ;;  %v1962_v26 = vrot.slane %v1960_v15, 4  ;;  %v2232_v27 = vrot.slane %v2099_v19, 6 }
 0x10d   : > { %v2235_v28 = vrot.slane %v2100_v20, 6  ;;  %v2344_v29 = vld [vmem:[#allocation2 + $0x30] sm:$0xf]  ;;  %2057 = vst [vmem:[#allocation3 + $0x298] sm:$0xf] %v1961_v25 }
 0x10e   : > { %v2345_v30 = vld [vmem:[#allocation2 + $0x34] sm:$0xf]  ;;  %2376 = vst [vmem:[#allocation3 + $0x18] sm:$0xf] %v2344_v29  ;;  %v2408_v31 = vld [vmem:[#allocation2 + $0x30] sm:$0xe]  ;;  %v1964_v35 = vsel %vm6963_vm2, %v1962_v26, %v1963_v18  ;;  %v2233_v36 = vsel %vm7182_vm7, %v5479_v21, %v2232_v27 }
 0x10f   : > { %v2409_v32 = vld [vmem:[#allocation2 + $0x34] sm:$0xf]  ;;  %v2234_v37 = vrot.slane %v2232_v27, 4  ;;  %2377 = vst [vmem:[#allocation3 + $0x3c] sm:$0xf] %v2345_v30  ;;  %v5486_v40 = vrot.slane %v2408_v31, 9 }
 0x110   : > { %v6656_v33 = vld [vmem:[#allocation3 + $0x444] ss:$36 sps:$4 sm:$0xff]   ;;  %2058 = vst [vmem:[#allocation3 + $0x2bc] sm:$0xf] %v1964_v35  ;;  %2329 = vst [vmem:[#allocation3 + $0x29c] sm:$0xf] %v2233_v36 }
 0x111   : > { %v6660_v34 = vld [vmem:[#allocation3 + $0x440] ss:$36 sps:$4 sm:$0xff]   ;;  %v2410_v39 = vld [vmem:[#allocation2 + $0x38] sm:$0x1]  ;;  %v2506_v41 = vrot.slane %v2409_v32, 5  ;;  %4737 = vmatprep.mubr.bf16.mxu1 %v6656_v33  ;;  %v2236_v45 = vsel %vm7182_vm7, %v2234_v37, %v2235_v28  ;;  %v7603_v33 = vpop.f32.mrf.mxu0 }
 0x112   : > { %v2509_v46 = vrot.slane %v2410_v39, 5  ;;  %v1829_v47 = vld [vmem:[#allocation2 + $0x90] sm:$0xe]  ;;  %4738 = vmatmul.mubr.bf16.gmra.mxu1 %v6660_v34  ;;  %2330 = vst [vmem:[#allocation3 + $0x2c0] sm:$0xf] %v2236_v45 }
 0x113   : > { %v2507_v49 = vsel %vm6963_vm2, %v5486_v40, %v2506_v41  ;;  %v2508_v62 = vrot.slane %v2506_v41, 4  ;;  %v1830_v51 = vld [vmem:[#allocation2 + $0x94] sm:$0xf]  ;;  %v1831_v52 = vld [vmem:[#allocation2 + $0x98] sm:$0x1]  ;;  %v5464_v53 = vrot.slane %v1829_v47, 9 }
 0x114   : > { %2648 = vst [vmem:[#allocation3 + $0x1c] sm:$0xf] %v2507_v49  ;;  %v1967_v54 = vrot.slane %v1830_v51, 5  ;;  %v1970_v38 = vrot.slane %v1831_v52, 5  ;;  %v2101_v55 = vld [vmem:[#allocation2 + $0x90] sm:$0xc] }
 0x115   : > { %v6658_v56 = vld [vmem:[#allocation3 + $0x254] ss:$36 sps:$4 sm:$0xff]   ;;  %v2510_v58 = vsel %vm6963_vm2, %v2508_v62, %v2509_v46  ;;  %v5480_v59 = vrot.slane %v2101_v55, 10  ;;  %v2102_v43 = vld [vmem:[#allocation2 + $0x94] sm:$0xf]  ;;  %v5965_v46 = vpop.f32.mrf.mxu1 }
 0x116   : > { %v6661_v57 = vld [vmem:[#allocation3 + $0x250] ss:$36 sps:$4 sm:$0xff]   ;;  %2649 = vst [vmem:[#allocation3 + $0x40] sm:$0xf] %v2510_v58  ;;  %v1968_v60 = vsel %vm6963_vm2, %v5464_v53, %v1967_v54  ;;  %v1969_v61 = vrot.slane %v1967_v54, 4  ;;  %4842 = vmatprep.mubr.bf16.mxu0 %v6658_v56  ;;  %v2239_v50 = vrot.slane %v2102_v43, 6  ;;  %v7609_v52 = vadd.f32 %v5965_v46, %v5964_v13 }
 0x117   : > { %v2103_v0 = vld [vmem:[#allocation2 + $0x98] sm:$0x3]  ;;  %2059 = vst [vmem:[#allocation3 + $0x2e0] sm:$0xf] %v1968_v60  ;;  %v2346_v2 = vld [vmem:[#allocation2 + $0x3c] sm:$0xf]  ;;  %4843 = vmatmul.mubr.bf16.gmra.mxu0 %v6661_v57  ;;  %v5967_v56 = vpop.f32.mrf.mxu1  ;;  %v7613_v57 = vpop.f32.mrf.mxu0 }
 0x118   : > { %v2242_v1 = vrot.slane %v2103_v0, 6  ;;  %v2347_v3 = vld [vmem:[#allocation2 + $0x40] sm:$0xf]  ;;  %v1971_v4 = vsel %vm6963_vm2, %v1969_v61, %v1970_v38  ;;  %2378 = vst [vmem:[#allocation3 + $0x60] sm:$0xf] %v2346_v2  ;;  %v2240_v8 = vsel %vm7182_vm7, %v5480_v59, %v2239_v50  ;;  %v2241_v9 = vrot.slane %v2239_v50, 4 }
 0x119   : > { %2379 = vst [vmem:[#allocation3 + $0x84] sm:$0xf] %v2347_v3  ;;  %v2411_v5 = vld [vmem:[#allocation2 + $0x3c] sm:$0xe]  ;;  %v2412_v7 = vld [vmem:[#allocation2 + $0x40] sm:$0xf] }
 0x11a   : > { %2060 = vst [vmem:[#allocation3 + $0x304] sm:$0xf] %v1971_v4  ;;  %v2413_v10 = vld [vmem:[#allocation2 + $0x44] sm:$0x1]  ;;  %v5487_v11 = vrot.slane %v2411_v5, 9  ;;  %v2513_v12 = vrot.slane %v2412_v7, 5  ;;  %v2243_v17 = vsel %vm7182_vm7, %v2241_v9, %v2242_v1  ;;  %v5968_v1 = vpop.f32.mrf.mxu1 }
 0x11b   : > { %v6662_v14 = vld [vmem:[#allocation3 + $0x29c] ss:$36 sps:$4 sm:$0xff]   ;;  %2331 = vst [vmem:[#allocation3 + $0x2e4] sm:$0xf] %v2240_v8  ;;  %v2516_v16 = vrot.slane %v2413_v10, 5  ;;  %v7619_v5 = vadd.f32 %v5968_v1, %v5967_v56 }
 0x11c   : > { %v6667_v15 = vld [vmem:[#allocation3 + $0x298] ss:$36 sps:$4 sm:$0xff]   ;;  %v2514_v18 = vsel %vm6963_vm2, %v5487_v11, %v2513_v12  ;;  %v2515_v19 = vrot.slane %v2513_v12, 4  ;;  %v1832_v20 = vld [vmem:[#allocation2 + $0x9c] sm:$0xe]  ;;  %4850 = vmatprep.mubr.bf16.mxu0 %v6662_v14  ;;  %v5904_v11 = vpop.f32.mrf.mxu0 }
 0x11d   : > { %v1833_v21 = vld [vmem:[#allocation2 + $0xa0] sm:$0xf]  ;;  %2332 = vst [vmem:[#allocation3 + $0x308] sm:$0xf] %v2243_v17  ;;  %2650 = vst [vmem:[#allocation3 + $0x64] sm:$0xf] %v2514_v18 }
 0x11e   : > { %v1834_v25 = vld [vmem:[#allocation2 + $0xa4] sm:$0x1]  ;;  %v5465_v26 = vrot.slane %v1832_v20, 9  ;;  %v1974_v27 = vrot.slane %v1833_v21, 5  ;;  %v2104_v28 = vld [vmem:[#allocation2 + $0x9c] sm:$0xc]  ;;  %v2517_v31 = vsel %vm6963_vm2, %v2515_v19, %v2516_v16  ;;  %v5970_v21 = vpop.f32.mrf.mxu1 }
 0x11f   : > { %v6664_v29 = vld [vmem:[#allocation3 + $0x18] ss:$36 sps:$4 sm:$0xff]   ;;  %v1977_v32 = vrot.slane %v1834_v25, 5  ;;  %2651 = vst [vmem:[#allocation3 + $0x88] sm:$0xf] %v2517_v31  ;;  %v5481_v39 = vrot.slane %v2104_v28, 10  ;;  %4851 = vmatmul.mubr.bf16.gmra.mxu0 %v6667_v15  ;;  %v5905_v25 = vpop.f32.mrf.mxu0 }
 0x120   : > { %v6666_v30 = vld [vmem:[#allocation3 + $0x1c] ss:$36 sps:$4 sm:$0xff]   ;;  %v1975_v34 = vsel %vm6963_vm2, %v5465_v26, %v1974_v27  ;;  %v1976_v35 = vrot.slane %v1974_v27, 4  ;;  %v2105_v36 = vld [vmem:[#allocation2 + $0xa0] sm:$0xf] }
 0x121   : > { %v2106_v37 = vld [vmem:[#allocation2 + $0xa4] sm:$0x3]  ;;  %4939 = vmatprep.mubr.bf16.mxu1 %v6666_v30  ;;  %2061 = vst [vmem:[#allocation3 + $0x328] sm:$0xf] %v1975_v34  ;;  %v2246_v40 = vrot.slane %v2105_v36, 6  ;;  %v7631_v36 = vpop.f32.mrf.mxu0 }
 0x122   : > { %v2249_v41 = vrot.slane %v2106_v37, 6  ;;  %v2348_v42 = vld [vmem:[#allocation2 + $0x48] sm:$0xf]  ;;  %v2349_v45 = vld [vmem:[#allocation2 + $0x4c] sm:$0xf]  ;;  %4940 = vmatmul.mubr.bf16.vlgmr.msra.gmra.mxu1 %v6664_v29  ;;  %v1978_v47 = vsel %vm6963_vm2, %v1976_v35, %v1977_v32  ;;  %v7625_v29 = vadd.f32 %v5905_v25, %v5904_v11  ;;  %v5971_v35 = vpop.f32.mrf.mxu1 }
 0x123   : > { %2380 = vst [vmem:[#allocation3 + $0xa8] sm:$0xf] %v2348_v42  ;;  %2381 = vst [vmem:[#allocation3 + $0xcc] sm:$0xf] %v2349_v45  ;;  %v2414_v49 = vld [vmem:[#allocation2 + $0x48] sm:$0xe]  ;;  %v2247_v53 = vsel %vm7182_vm7, %v5481_v39, %v2246_v40  ;;  %v7633_v42 = vadd.f32 %v5971_v35, %v5970_v21 }
 0x124   : > { %v2415_v62 = vld [vmem:[#allocation2 + $0x4c] sm:$0xf]  ;;  %v2416_v51 = vld [vmem:[#allocation2 + $0x50] sm:$0x1]  ;;  %2062 = vst [vmem:[#allocation3 + $0x34c] sm:$0xf] %v1978_v47 }
 0x125   : > { %v2248_v54 = vrot.slane %v2246_v40, 4  ;;  %v5488_v38 = vrot.slane %v2414_v49, 9  ;;  %v2520_v55 = vrot.slane %v2415_v62, 5  ;;  %2333 = vst [vmem:[#allocation3 + $0x32c] sm:$0xf] %v2247_v53  ;;  %v2523_v58 = vrot.slane %v2416_v51, 5  ;;  %v5973_v62 = vpop.f32.mrf.mxu1  ;;  %v7637_v51 = vpop.f32.mrf.mxu0 }
 0x126   : > { %v1835_v59 = vld [vmem:[#allocation2 + $0xa8] sm:$0xe]  ;;  %v6669_v60 = vld [vmem:[#allocation3 + $0x2e4] ss:$36 sps:$4 sm:$0xff]   ;;  %v1836_v3 = vld [vmem:[#allocation2 + $0xac] sm:$0xf] }
 0x127   : > { %v2250_v61 = vsel %vm7182_vm7, %v2248_v54, %v2249_v41  ;;  %v2521_v43 = vsel %vm6963_vm2, %v5488_v38, %v2520_v55  ;;  %v2522_v0 = vrot.slane %v2520_v55, 4  ;;  %v5466_v50 = vrot.slane %v1835_v59, 9  ;;  %v6673_v2 = vld [vmem:[#allocation3 + $0x2e0] ss:$36 sps:$4 sm:$0xff]   ;;  %4858 = vmatprep.mubr.bf16.mxu0 %v6669_v60  ;;  %v2107_v14 = vld [vmem:[#allocation2 + $0xa8] sm:$0xc]  ;;  %v5974_v60 = vpop.f32.mrf.mxu1 }
 0x128   : > { %2334 = vst [vmem:[#allocation3 + $0x350] sm:$0xf] %v2250_v61  ;;  %2652 = vst [vmem:[#allocation3 + $0xac] sm:$0xf] %v2521_v43  ;;  %v1837_v4 = vld [vmem:[#allocation2 + $0xb0] sm:$0x1]  ;;  %4859 = vmatmul.mubr.bf16.gmra.mxu0 %v6673_v2  ;;  %v5910_v61 = vpop.f32.mrf.mxu0  ;;  %v7643_v2 = vadd.f32 %v5974_v60, %v5973_v62 }
 0x129   : > { %v6671_v7 = vld [vmem:[#allocation3 + $0x64] ss:$36 sps:$4 sm:$0xff]   ;;  %v2524_v9 = vsel %vm6963_vm2, %v2522_v0, %v2523_v58  ;;  %v1981_v10 = vrot.slane %v1836_v3, 5  ;;  %v1984_v12 = vrot.slane %v1837_v4, 5  ;;  %v2108_v15 = vld [vmem:[#allocation2 + $0xac] sm:$0xf]  ;;  %v5976_v62 = vpop.f32.mrf.mxu1 }
 0x12a   : > { %v6674_v8 = vld [vmem:[#allocation3 + $0x60] ss:$36 sps:$4 sm:$0xff]   ;;  %2653 = vst [vmem:[#allocation3 + $0xd0] sm:$0xf] %v2524_v9  ;;  %4947 = vmatprep.mubr.bf16.mxu1 %v6671_v7  ;;  %v5482_v19 = vrot.slane %v2107_v14, 10  ;;  %v2253_v20 = vrot.slane %v2108_v15, 6 }
 0x12b   : > { %v1982_v16 = vsel %vm6963_vm2, %v5466_v50, %v1981_v10  ;;  %v1983_v17 = vrot.slane %v1981_v10, 4  ;;  %v2109_v18 = vld [vmem:[#allocation2 + $0xb0] sm:$0x3]  ;;  %4948 = vmatmul.mubr.bf16.gmra.mxu1 %v6674_v8  ;;  %v2350_v27 = vld [vmem:[#allocation2 + $0x54] sm:$0xf]  ;;  %v5911_v10 = vpop.f32.mrf.mxu0 }
 0x12c   : > { %2063 = vst [vmem:[#allocation3 + $0x370] sm:$0xf] %v1982_v16  ;;  %v2256_v26 = vrot.slane %v2109_v18, 6  ;;  %v2351_v28 = vld [vmem:[#allocation2 + $0x58] sm:$0xf]  ;;  %v2254_v31 = vsel %vm7182_vm7, %v5482_v19, %v2253_v20  ;;  %v2255_v32 = vrot.slane %v2253_v20, 4  ;;  %v7647_v16 = vadd.f32 %v5911_v10, %v5910_v61 }
 0x12d   : > { %v1985_v30 = vsel %vm6963_vm2, %v1983_v17, %v1984_v12  ;;  %2382 = vst [vmem:[#allocation3 + $0xf0] sm:$0xf] %v2350_v27  ;;  %2383 = vst [vmem:[#allocation3 + $0x114] sm:$0xf] %v2351_v28  ;;  %v2417_v13 = vld [vmem:[#allocation2 + $0x54] sm:$0xe]  ;;  %v7653_v28 = vpop.f32.mrf.mxu0 }
 0x12e   : > { %v2418_v34 = vld [vmem:[#allocation2 + $0x58] sm:$0xf]  ;;  %2064 = vst [vmem:[#allocation3 + $0x394] sm:$0xf] %v1985_v30  ;;  %2335 = vst [vmem:[#allocation3 + $0x374] sm:$0xf] %v2254_v31  ;;  %v2257_v46 = vsel %vm7182_vm7, %v2255_v32, %v2256_v26 }
 0x12f   : > { %v2419_v37 = vld [vmem:[#allocation2 + $0x5c] sm:$0x1]  ;;  %v5489_v39 = vrot.slane %v2417_v13, 9  ;;  %v2527_v40 = vrot.slane %v2418_v34, 5  ;;  %v1838_v41 = vld [vmem:[#allocation2 + $0xb4] sm:$0xe] }
 0x130   : > { %v6675_v45 = vld [vmem:[#allocation3 + $0x32c] ss:$36 sps:$4 sm:$0xff]   ;;  %v2530_v47 = vrot.slane %v2419_v37, 5  ;;  %v5467_v49 = vrot.slane %v1838_v41, 9  ;;  %2336 = vst [vmem:[#allocation3 + $0x398] sm:$0xf] %v2257_v46 }
 0x131   : > { %v6679_v53 = vld [vmem:[#allocation3 + $0x328] ss:$36 sps:$4 sm:$0xff]   ;;  %v2528_v54 = vsel %vm6963_vm2, %v5489_v39, %v2527_v40  ;;  %v2529_v38 = vrot.slane %v2527_v40, 4  ;;  %4866 = vmatprep.mubr.bf16.mxu0 %v6675_v45  ;;  %v2110_v50 = vld [vmem:[#allocation2 + $0xb4] sm:$0xc] }
 0x132   : > { %v1839_v55 = vld [vmem:[#allocation2 + $0xb8] sm:$0xf]  ;;  %v6677_v56 = vld [vmem:[#allocation3 + $0xac] ss:$36 sps:$4 sm:$0xff]   ;;  %2654 = vst [vmem:[#allocation3 + $0xf4] sm:$0xf] %v2528_v54  ;;  %4867 = vmatmul.mubr.bf16.gmra.mxu0 %v6679_v53  ;;  %v7664_v53 = vpop.f32.mrf.mxu0 }
 0x133   : > { %v6680_v58 = vld [vmem:[#allocation3 + $0xa8] ss:$36 sps:$4 sm:$0xff]   ;;  %v1988_v59 = vrot.slane %v1839_v55, 5  ;;  %v2531_v43 = vsel %vm6963_vm2, %v2529_v38, %v2530_v47  ;;  %4955 = vmatprep.mubr.bf16.mxu1 %v6677_v56  ;;  %v5483_v9 = vrot.slane %v2110_v50, 10  ;;  %v2352_v14 = vld [vmem:[#allocation2 + $0x60] sm:$0xf] }
 0x134   : > { %v1840_v0 = vld [vmem:[#allocation2 + $0xbc] sm:$0x1]  ;;  %v2111_v1 = vld [vmem:[#allocation2 + $0xb8] sm:$0xf]  ;;  %2655 = vst [vmem:[#allocation3 + $0x118] sm:$0xf] %v2531_v43  ;;  %4956 = vmatmul.mubr.bf16.gmra.mxu1 %v6680_v58 }
 0x135   : > { %v1989_v3 = vsel %vm6963_vm2, %v5467_v49, %v1988_v59  ;;  %v1990_v4 = vrot.slane %v1988_v59, 4  ;;  %v1991_v7 = vrot.slane %v1840_v0, 5  ;;  %v2112_v8 = vld [vmem:[#allocation2 + $0xbc] sm:$0x3]  ;;  %v2260_v11 = vrot.slane %v2111_v1, 6  ;;  %v5977_v0 = vpop.f32.mrf.mxu1 }
 0x136   : > { %2065 = vst [vmem:[#allocation3 + $0x3b8] sm:$0xf] %v1989_v3  ;;  %v2263_v12 = vrot.slane %v2112_v8, 6  ;;  %v2353_v15 = vld [vmem:[#allocation2 + $0x64] sm:$0xf] }
 0x137   : > { %v1992_v17 = vsel %vm6963_vm2, %v1990_v4, %v1991_v7  ;;  %2384 = vst [vmem:[#allocation3 + $0x138] sm:$0xf] %v2352_v14  ;;  %2385 = vst [vmem:[#allocation3 + $0x15c] sm:$0xf] %v2353_v15  ;;  %v2420_v18 = vld [vmem:[#allocation2 + $0x60] sm:$0xe]  ;;  %v2261_v20 = vsel %vm7182_vm7, %v5483_v9, %v2260_v11  ;;  %v7677_v4 = vadd.f32 %v5977_v0, %v5976_v62  ;;  %v5916_v14 = vpop.f32.mrf.mxu0 }
 0x138   : > { %v2421_v19 = vld [vmem:[#allocation2 + $0x64] sm:$0xf]  ;;  %2066 = vst [vmem:[#allocation3 + $0x3dc] sm:$0xf] %v1992_v17  ;;  %v2262_v21 = vrot.slane %v2260_v11, 4  ;;  %v5490_v26 = vrot.slane %v2420_v18, 9 }
 0x139   : > { %v2422_v25 = vld [vmem:[#allocation2 + $0x68] sm:$0x1]  ;;  %v2534_v27 = vrot.slane %v2421_v19, 5  ;;  %v6686_v31 = vld [vmem:[#allocation3 + $0x370] ss:$36 sps:$4 sm:$0xff]  }
 0x13a   : > { %v6682_v30 = vld [vmem:[#allocation3 + $0x374] ss:$36 sps:$4 sm:$0xff]   ;;  %2337 = vst [vmem:[#allocation3 + $0x3bc] sm:$0xf] %v2261_v20  ;;  %v2537_v32 = vrot.slane %v2422_v25, 5  ;;  %v2264_v13 = vsel %vm7182_vm7, %v2262_v21, %v2263_v12  ;;  %v5979_v12 = vpop.f32.mrf.mxu1 }
 0x13b   : > { %v2535_v34 = vsel %vm6963_vm2, %v5490_v26, %v2534_v27  ;;  %v2536_v35 = vrot.slane %v2534_v27, 4  ;;  %4874 = vmatprep.mubr.bf16.mxu0 %v6682_v30  ;;  %2338 = vst [vmem:[#allocation3 + $0x3e0] sm:$0xf] %v2264_v13  ;;  %v266_v37 = vld [vmem:[%s6970_s21 + $0xc8] sm:$0x3]  ;;  %v5917_v30 = vpop.f32.mrf.mxu0 }
 0x13c   : > { %2656 = vst [vmem:[#allocation3 + $0x13c] sm:$0xf] %v2535_v34  ;;  %v1841_v39 = vld [vmem:[#allocation2 + $0xc0] sm:$0xe]  ;;  %v7660_v40 = vld [vmem:[#allocation2 + $0xc4] sm:$0xf]  ;;  %v326_v47 = vunpack.c.l.bf16 %v266_v37  ;;  %4875 = vmatmul.mubr.bf16.gmra.mxu0 %v6686_v31  ;;  %v5980_v27 = vpop.f32.mrf.mxu1  ;;  %v7693_v37 = vadd.f32 %v5917_v30, %v5916_v14 }
 0x13d   : > { %v6684_v41 = vld [vmem:[#allocation3 + $0xf4] ss:$36 sps:$4 sm:$0xff]   ;;  %v2538_v46 = vsel %vm6963_vm2, %v2536_v35, %v2537_v32  ;;  %v5468_v49 = vrot.slane %v1841_v39, 9  ;;  %v1995_v54 = vrot.slane %v7660_v40, 5  ;;  %v2113_v38 = vld [vmem:[#allocation2 + $0xc0] sm:$0xc]  ;;  %v7691_v35 = vadd.f32 %v5980_v27, %v5979_v12 }
 0x13e   : > { %v6687_v45 = vld [vmem:[#allocation3 + $0xf0] ss:$36 sps:$4 sm:$0xff]   ;;  %2657 = vst [vmem:[#allocation3 + $0x160] sm:$0xf] %v2538_v46  ;;  %4963 = vmatprep.mubr.bf16.mxu1 %v6684_v41  ;;  %v5484_v59 = vrot.slane %v2113_v38, 10 }
 0x13f   : > { %v7667_v55 = vld [vmem:[#allocation2 + $0xc4] sm:$0xf]  ;;  %v6755_v56 = vld [vmem:[%s8306_s1] ss:$0 sm:$0xff]  ;;  %v2354_v61 = vld [vmem:[#allocation2 + $0x6c] sm:$0xf]  ;;  %4964 = vmatmul.mubr.bf16.gmra.mxu1 %v6687_v45  ;;  %v1996_v50 = vsel %vm6963_vm2, %v5468_v49, %v1995_v54 }
 0x140   : > { %v393_v58 = vmul.f32 %v6755_v56, %v326_v47  ;;  %v2267_v60 = vrot.slane %v7667_v55, 6  ;;  %v2355_v43 = vld [vmem:[#allocation2 + $0x70] sm:$0xf]  ;;  %2386 = vst [vmem:[#allocation3 + $0x180] sm:$0xf] %v2354_v61 }
 0x141   : > { %2387 = vst [vmem:[#allocation3 + $0x1a4] sm:$0xf] %v2355_v43  ;;  %v2423_v1 = vld [vmem:[#allocation2 + $0x6c] sm:$0xe]  ;;  %v2424_v3 = vld [vmem:[#allocation2 + $0x70] sm:$0xf] }
 0x142   : > { %v6756_v7 = vld [vmem:[%s8307_s2] ss:$0 sm:$0xff]  ;;  %2067 = vst [vmem:[#allocation3 + $0x400] sm:$0xf] %v1996_v50  ;;  %v2268_v9 = vsel %vm7182_vm7, %v5484_v59, %v2267_v60  ;;  %v2425_v10 = vld [vmem:[#allocation2 + $0x74] sm:$0x1]  ;;  %v5982_v59 = vpop.f32.mrf.mxu1 }
 0x143   : > { %v460_v8 = vadd.f32 %v6756_v7, %v393_v58  ;;  %v5491_v11 = vrot.slane %v2423_v1, 9  ;;  %2339 = vst [vmem:[#allocation3 + $0x404] sm:$0xf] %v2268_v9  ;;  %v2541_v15 = vrot.slane %v2424_v3, 5  ;;  %v2544_v17 = vrot.slane %v2425_v10, 5 }
 0x144   : > { %v269_v18 = vld [vmem:[%s6970_s21 + $0xd4] sm:$0x3]  ;;  %v1844_v19 = vld [vmem:[#allocation2 + $0xcc] sm:$0xe]  ;;  %v7689_v34 = vld [vmem:[#allocation2 + $0xd0] sm:$0xf]  ;;  %v5983_v9 = vpop.f32.mrf.mxu1 }
 0x145   : > { %v6688_v20 = vld [vmem:[#allocation3 + $0x3bc] ss:$36 sps:$4 sm:$0xff]   ;;  %v520_v21 = vmax.f32 %v460_v8, 0.0  ;;  %v329_v25 = vunpack.c.l.bf16 %v269_v18  ;;  %v5469_v26 = vrot.slane %v1844_v19, 9  ;;  %v2542_v32 = vsel %vm6963_vm2, %v5491_v11, %v2541_v15  ;;  %v2356_v50 = vld [vmem:[#allocation2 + $0x78] sm:$0xf] }
 0x146   : > { %v6692_v31 = vld [vmem:[#allocation3 + $0x3b8] ss:$36 sps:$4 sm:$0xff]   ;;  %v2543_v13 = vrot.slane %v2541_v15, 4  ;;  %4882 = vmatprep.mubr.bf16.mxu0 %v6688_v20  ;;  %2658 = vst [vmem:[#allocation3 + $0x184] sm:$0xf] %v2542_v32  ;;  %v2002_v62 = vrot.slane %v7689_v34, 5  ;;  %v7713_v18 = vadd.f32 %v5983_v9, %v5982_v59  ;;  %v5985_v19 = vpop.f32.mrf.mxu1  ;;  %v7721_v32 = vpop.f32.mrf.mxu0 }
 0x147   : > { %v6690_v39 = vld [vmem:[#allocation3 + $0x13c] ss:$36 sps:$4 sm:$0xff]   ;;  %v790_v45 = vsel %vm679_vm4, %v520_v21, 0.0  ;;  %v396_v46 = vmul.f32 %v6755_v56, %v329_v25  ;;  %4883 = vmatmul.mubr.bf16.gmra.mxu0 %v6692_v31  ;;  %v2357_v1 = vld [vmem:[#allocation2 + $0x7c] sm:$0xf]  ;;  %v2269_v20 = vrot.slane %v2267_v60, 4 }
 0x148   : > { %v6693_v41 = vld [vmem:[#allocation3 + $0x138] ss:$36 sps:$4 sm:$0xff]   ;;  %v5783_v47 = vpack.c.bf16 %v790_v45, %v790_v45  ;;  %v2545_v49 = vsel %vm6963_vm2, %v2543_v13, %v2544_v17  ;;  %v7700_v58 = vld [vmem:[#allocation2 + $0xd0] sm:$0xf]  ;;  %4971 = vmatprep.mubr.bf16.mxu1 %v6690_v39  ;;  %v2003_v56 = vsel %vm6963_vm2, %v5469_v26, %v2002_v62  ;;  %2388 = vst [vmem:[#allocation3 + $0x1c8] sm:$0xf] %v2356_v50  ;;  %v5986_v13 = vpop.f32.mrf.mxu1 }
 0x149   : > { %v2116_v38 = vld [vmem:[#allocation2 + $0xcc] sm:$0xc]  ;;  %2659 = vst [vmem:[#allocation3 + $0x1a8] sm:$0xf] %v2545_v49  ;;  %v463_v61 = vadd.f32 %v6756_v7, %v396_v46  ;;  %v2274_v0 = vrot.slane %v7700_v58, 6  ;;  %4972 = vmatmul.mubr.bf16.gmra.mxu1 %v6693_v41  ;;  %v1997_v7 = vrot.slane %v1995_v54, 4  ;;  %v7723_v41 = vadd.f32 %v5986_v13, %v5985_v19 }
 0x14a   : > { %v5485_v43 = vrot.slane %v2116_v38, 10  ;;  %1110 = vst [vmem:[#allocation2 + $0xc8] sm:$0x3] %v5783_v47  ;;  %2389 = vst [vmem:[#allocation3 + $0x1ec] sm:$0xf] %v2357_v1  ;;  %v6004_v38 = vpop.f32.mrf.mxu1  ;;  %s202_s21 = sand.u32 1, %s6817_s16  }
 0x14b   : > { %v2426_v3 = vld [vmem:[#allocation2 + $0x78] sm:$0xe]  ;;  %v2427_v8 = vld [vmem:[#allocation2 + $0x7c] sm:$0xf]  ;;  %v523_v10 = vmax.f32 %v463_v61, 0.0  ;;  %s5358_s24 = sshll.u32 %s202_s21, 8 }
 0x14c   : > { %2069 = vst [vmem:[#allocation3 + $0x448] sm:$0xf] %v2003_v56  ;;  %v2275_v11 = vsel %vm7182_vm7, %v5485_v43, %v2274_v0  ;;  %v2428_v12 = vld [vmem:[#allocation2 + $0x80] sm:$0x1]  ;;  %v5492_v14 = vrot.slane %v2426_v3, 9  ;;  %v2548_v15 = vrot.slane %v2427_v8, 5 }
 0x14d   : > { %2341 = vst [vmem:[#allocation3 + $0x44c] sm:$0xf] %v2275_v11  ;;  %v2551_v17 = vrot.slane %v2428_v12, 5  ;;  %v793_v40 = vsel %vm679_vm4, %v523_v10, 0.0  ;;  %v2358_v54 = vld [vmem:[#allocation2 + $0x84] sm:$0xf]  ;;  %v7729_v10 = vpop.f32.mrf.mxu0  ;;  %v6005_v11 = vpop.f32.mrf.mxu1 }
 0x14e   : > { %v2359_v21 = vld [vmem:[#allocation2 + $0x88] sm:$0xf]  ;;  %v5786_v25 = vpack.c.bf16 %v793_v40, %v793_v40  ;;  %v2549_v26 = vsel %vm6963_vm2, %v5492_v14, %v2548_v15  ;;  %v2550_v27 = vrot.slane %v2548_v15, 4  ;;  %2390 = vst [vmem:[#allocation3 + $0x210] sm:$0xf] %v2358_v54  ;;  %v6006_v19 = vadd.f32 %v6005_v11, %v6004_v38  ;;  %s8153_s26 = scalar_lea.vmem [#allocation4], %s5358_s24 }
 0x14f   : > { %2391 = vst [vmem:[#allocation3 + $0x234] sm:$0xf] %v2359_v21  ;;  %v2429_v30 = vld [vmem:[#allocation2 + $0x84] sm:$0xe]  ;;  %v2430_v31 = vld [vmem:[#allocation2 + $0x88] sm:$0xf] }
 0x150   : > { %2660 = vst [vmem:[#allocation3 + $0x1cc] sm:$0xf] %v2549_v26  ;;  %v2431_v55 = vld [vmem:[#allocation2 + $0x8c] sm:$0x1]  ;;  %v5493_v60 = vrot.slane %v2429_v30, 9  ;;  %v2555_v39 = vrot.slane %v2430_v31, 5  ;;  %v2552_v47 = vsel %vm6963_vm2, %v2550_v27, %v2551_v17  ;;  %v6007_v30 = vpop.f32.mrf.mxu1 }
 0x151   : > { %v2680_v24 = vld [vmem:[#allocation2 + $0x30] sm:$0xc]  ;;  %v6697_v45 = vld [vmem:[#allocation3 + $0x184] ss:$36 sps:$4 sm:$0xff]   ;;  %1113 = vst [vmem:[#allocation2 + $0xd4] sm:$0x3] %v5786_v25 }
 0x152   : > { %v6700_v46 = vld [vmem:[#allocation3 + $0x180] ss:$36 sps:$4 sm:$0xff]   ;;  %v2558_v49 = vrot.slane %v2431_v55, 5  ;;  %v1843_v59 = vld [vmem:[#allocation2 + $0xc8] sm:$0x1]  ;;  %v2556_v43 = vsel %vm6963_vm2, %v5493_v60, %v2555_v39  ;;  %v2557_v50 = vrot.slane %v2555_v39, 4  ;;  %4979 = vmatprep.mubr.bf16.mxu1 %v6697_v45  ;;  %v5922_v39 = vpop.f32.mrf.mxu0  ;;  %v6008_v45 = vpop.f32.mrf.mxu1 }
 0x153   : > { %v2115_v61 = vld [vmem:[#allocation2 + $0xc8] sm:$0x3]  ;;  %2661 = vst [vmem:[#allocation3 + $0x1f0] sm:$0xf] %v2552_v47  ;;  %v5502_v1 = vrot.slane %v2680_v24, 10  ;;  %v1998_v56 = vrot.slane %v1843_v59, 5  ;;  %4980 = vmatmul.mubr.bf16.gmra.mxu1 %v6700_v46  ;;  %v7744_v24 = vadd.f32 %v6006_v19, %v7565_v6  ;;  %v5897_v46 = vadd.f32 %v7575_v23, %v7569_v44 }
 0x154   : > { %v2270_v3 = vrot.slane %v2115_v61, 6  ;;  %2662 = vst [vmem:[#allocation3 + $0x214] sm:$0xf] %v2556_v43  ;;  %v2681_v8 = vld [vmem:[#allocation2 + $0x34] sm:$0xf]  ;;  %v2559_v12 = vsel %vm6963_vm2, %v2557_v50, %v2558_v49  ;;  %v2004_v21 = vrot.slane %v2002_v62, 4  ;;  %v5923_v50 = vpop.f32.mrf.mxu0 }
 0x155   : > { %v2682_v9 = vld [vmem:[#allocation2 + $0x38] sm:$0x3]  ;;  %v2778_v14 = vrot.slane %v2681_v8, 6  ;;  %v2683_v17 = vld [vmem:[#allocation2 + $0x3c] sm:$0xc]  ;;  %v1999_v40 = vsel %vm6963_vm2, %v1997_v7, %v1998_v56  ;;  %v6010_v56 = vpop.f32.mrf.mxu1  ;;  %v7754_v8 = vadd.f32 %v5923_v50, %v5922_v39  ;;  %s5278_s30 = sshll.u32 %s8153_s26, 4  ;;  %s8255_s30 = int_to_ptr.vmem [resolvable:$true] %s5278_s30 }
 0x156   : > { %v2781_v15 = vrot.slane %v2682_v9, 6  ;;  %v2271_v54 = vsel %vm7182_vm7, %v2269_v20, %v2270_v3  ;;  %2663 = vst [vmem:[#allocation3 + $0x238] sm:$0xf] %v2559_v12  ;;  %v2684_v25 = vld [vmem:[#allocation2 + $0x40] sm:$0xf]  ;;  %v5503_v27 = vrot.slane %v2683_v17, 10  ;;  %p6764_p1 = scmp.lt.s32.totalorder %s8255_s30, %s6762_s10 }
 0x157   : > { %v2685_v26 = vld [vmem:[#allocation2 + $0x44] sm:$0x3]  ;;  %2068 = vst [vmem:[#allocation3 + $0x424] sm:$0xf] %v1999_v40  ;;  %2340 = vst [vmem:[#allocation3 + $0x428] sm:$0xf] %v2271_v54  ;;  %v2779_v31 = vsel %vm7182_vm7, %v5502_v1, %v2778_v14  ;;  %v6009_v1 = vadd.f32 %v6008_v45, %v6007_v30  ;;  %v6011_v19 = vpop.f32.mrf.mxu1 }
 0x158   : > { %v2780_v13 = vrot.slane %v2778_v14, 4  ;;  %v2785_v55 = vrot.slane %v2684_v25, 6  ;;  %v2788_v60 = vrot.slane %v2685_v26, 6  ;;  %v2360_v7 = vld [vmem:[#allocation2 + $0x90] sm:$0xf]  ;;  %v2276_v20 = vrot.slane %v2274_v0, 4 }
 0x159   : > { %2920 = vst [vmem:[#allocation3 + $0x20] sm:$0xf] %v2779_v31  ;;  %v2361_v34 = vld [vmem:[#allocation2 + $0x94] sm:$0xf]  ;;  %2392 = vst [vmem:[#allocation3 + $0x258] sm:$0xf] %v2360_v7  ;;  %v7760_v17 = vadd.f32 %v6009_v1, %v5897_v46  ;;  %v6012_v26 = vadd.f32 %v6011_v19, %v6010_v56 }
 0x15a   : > { %v2432_v62 = vld [vmem:[#allocation2 + $0x90] sm:$0xe]  ;;  %v1846_v47 = vld [vmem:[#allocation2 + $0xd4] sm:$0x1]  ;;  %v2782_v38 = vsel %vm7182_vm7, %v2780_v13, %v2781_v15  ;;  %v2786_v58 = vsel %vm7182_vm7, %v5503_v27, %v2785_v55  ;;  %v2787_v0 = vrot.slane %v2785_v55, 4  ;;  %v5925_v15 = vpop.f32.mrf.mxu0  ;;  %v6013_v55 = vpop.f32.mrf.mxu1  ;;  %s8260_s8 = scalar_lea.sflag [#allocation5], %s202_s21 }
 0x15b   : > { %v2118_v49 = vld [vmem:[#allocation2 + $0xd4] sm:$0x3]  ;;  %2393 = vst [vmem:[#allocation3 + $0x27c] sm:$0xf] %v2361_v34  ;;  %v2005_v59 = vrot.slane %v1846_v47, 5  ;;  %v5494_v6 = vrot.slane %v2432_v62, 9  ;;  %v7767_v34 = vadd.f32 %v6012_v26, %v7585_v48 }
 0x15c   : > { %v2277_v61 = vrot.slane %v2118_v49, 6  ;;  %v6703_v43 = vld [vmem:[#allocation3 + $0x1cc] ss:$36 sps:$4 sm:$0xff]   ;;  %2921 = vst [vmem:[#allocation3 + $0x44] sm:$0xf] %v2782_v38  ;;  %v2789_v23 = vsel %vm7182_vm7, %v2787_v0, %v2788_v60  ;;  %v5926_v13 = vpop.f32.mrf.mxu0  ;;  %v6014_v49 = vpop.f32.mrf.mxu1  ;;  %v5903_v38 = vadd.f32 %v7613_v57, %v7603_v33  ;;  %s6757_s18 = scalar_lea.vmem %s8255_s30, 4096 }
 0x15d   : > { %2922 = vst [vmem:[#allocation3 + $0x68] sm:$0xf] %v2786_v58  ;;  %v6706_v44 = vld [vmem:[#allocation3 + $0x1c8] ss:$36 sps:$4 sm:$0xff]   ;;  %v2433_v3 = vld [vmem:[#allocation2 + $0x94] sm:$0xf]  ;;  %v2006_v9 = vsel %vm6963_vm2, %v2004_v21, %v2005_v59  ;;  %4987 = vmatprep.mubr.bf16.mxu1 %v6703_v43  ;;  %v6015_v0 = vadd.f32 %v6014_v49, %v6013_v55  ;;  %p6758_p12 = scmp.ne.s32.totalorder %s8255_s30, %s6757_s18  ;;  %p6765_p2 = scmp.lt.s32.totalorder %s6763_s11, %s6757_s18 }
 0x15e   : > { %v2278_v11 = vsel %vm7182_vm7, %v2276_v20, %v2277_v61  ;;  %2923 = vst [vmem:[#allocation3 + $0x8c] sm:$0xf] %v2789_v23  ;;  %v2434_v12 = vld [vmem:[#allocation2 + $0x98] sm:$0x1]  ;;  %v2562_v14 = vrot.slane %v2433_v3, 5  ;;  %4988 = vmatmul.mubr.bf16.gmra.mxu1 %v6706_v44  ;;  %v7764_v20 = vadd.f32 %v5926_v13, %v5925_v15  ;;  %v5928_v50 = vpop.f32.mrf.mxu0  ;;  %v6016_v1 = vpop.f32.mrf.mxu1 }
 0x15f   : > { %2070 = vst [vmem:[#allocation3 + $0x46c] sm:$0xf] %v2006_v9  ;;  %2342 = vst [vmem:[#allocation3 + $0x470] sm:$0xf] %v2278_v11  ;;  %v6708_v40 = vld [vmem:[#allocation3 + $0x214] ss:$36 sps:$4 sm:$0xff]   ;;  %v7775_v23 = vadd.f32 %v6015_v0, %v5903_v38  ;;  %p6759_p13 = pnand %p6758_p12, %p6904_p4  ;;  %p6766_p3 = por %p6765_p2, %p6764_p1 }
 0x160   : > { %v2565_v54 = vrot.slane %v2434_v12, 5  ;;  %v2686_v25 = vld [vmem:[#allocation2 + $0x48] sm:$0xc]  ;;  %v6695_v27 = vld [vmem:[#allocation3 + $0x404] ss:$36 sps:$4 sm:$0xff]   ;;  %v2563_v30 = vsel %vm6963_vm2, %v5494_v6, %v2562_v14  ;;  %v2564_v31 = vrot.slane %v2562_v14, 4  ;;  %4995 = vmatprep.mubr.bf16.mxu1 %v6708_v40  ;;  %v5929_v11 = vpop.f32.mrf.mxu0  ;;  %v6017_v12 = vpop.f32.mrf.mxu1 }
 0x161   : > { %v6699_v21 = vld [vmem:[#allocation3 + $0x400] ss:$36 sps:$4 sm:$0xff]   ;;  %2664 = vst [vmem:[#allocation3 + $0x25c] sm:$0xf] %v2563_v30  ;;  %v2687_v60 = vld [vmem:[#allocation2 + $0x4c] sm:$0xf]  ;;  %4890 = vmatprep.mubr.bf16.mxu0 %v6695_v27  ;;  %p6760_p0 = pneg %p6759_p13 }
 0x162   : > { %v2688_v7 = vld [vmem:[#allocation2 + $0x50] sm:$0x3]  ;;  %v2566_v62 = vsel %vm6963_vm2, %v2564_v31, %v2565_v54  ;;  %v5504_v39 = vrot.slane %v2686_v25, 10  ;;  %v2792_v45 = vrot.slane %v2687_v60, 6  ;;  %v2689_v47 = vld [vmem:[#allocation2 + $0x54] sm:$0xc]  ;;  %4891 = vmatmul.mubr.bf16.gmra.mxu0 %v6699_v21  ;;  %v7781_v54 = vadd.f32 %v5929_v11, %v5928_v50  ;;  %v5931_v21 = vpop.f32.mrf.mxu0  ;;  %v6019_v30 = vpop.f32.mrf.mxu1 }
 0x163   : > { %v2795_v46 = vrot.slane %v2688_v7, 6  ;;  %v6711_v58 = vld [vmem:[#allocation3 + $0x210] ss:$36 sps:$4 sm:$0xff]   ;;  %2665 = vst [vmem:[#allocation3 + $0x280] sm:$0xf] %v2566_v62  ;;  %v5505_v6 = vrot.slane %v2689_v47, 10  ;;  %v6018_v25 = vadd.f32 %v6017_v12, %v6016_v1  ;;  %p6767_p5 = pnand %p6766_p3, %p6760_p0 }
 0x164   : > { %v2793_v48 = vsel %vm7182_vm7, %v5504_v39, %v2792_v45  ;;  %v2794_v59 = vrot.slane %v2792_v45, 4  ;;  %v2690_v61 = vld [vmem:[#allocation2 + $0x58] sm:$0xf]  ;;  %v2691_v43 = vld [vmem:[#allocation2 + $0x5c] sm:$0x3]  ;;  %v5932_v47 = vpop.f32.mrf.mxu0  ;;  %v6020_v49 = vpop.f32.mrf.mxu1 }
 0x165   : > { %2924 = vst [vmem:[#allocation3 + $0xb0] sm:$0xf] %v2793_v48  ;;  %v2799_v56 = vrot.slane %v2690_v61, 6  ;;  %v2802_v44 = vrot.slane %v2691_v43, 6  ;;  %v6710_v57 = vld [vmem:[#allocation3 + $0x20] ss:$36 sps:$4 sm:$0xff]   ;;  %v7786_v62 = vadd.f32 %v6018_v25, %v7625_v29  ;;  %v7790_v61 = vadd.f32 %v5932_v47, %v5931_v21 }
 0x166   : > { %v6701_v3 = vld [vmem:[#allocation3 + $0x44c] ss:$36 sps:$4 sm:$0xff]   ;;  %v2796_v9 = vsel %vm7182_vm7, %v2794_v59, %v2795_v46  ;;  %4996 = vmatmul.mubr.bf16.gmra.mxu1 %v6711_v58  ;;  %v2437_v13 = vld [vmem:[#allocation2 + $0xa4] sm:$0x1]  ;;  %v6713_v39 = vld [vmem:[#allocation3 + $0x258] ss:$36 sps:$4 sm:$0xff]   ;;  %v5909_v29 = vadd.f32 %v7637_v51, %v7631_v36  ;;  %v6021_v1 = vadd.f32 %v6020_v49, %v6019_v30 }
 0x167   : > { %v6705_v33 = vld [vmem:[#allocation3 + $0x448] ss:$36 sps:$4 sm:$0xff]   ;;  %2925 = vst [vmem:[#allocation3 + $0xd4] sm:$0xf] %v2796_v9  ;;  %v2800_v14 = vsel %vm7182_vm7, %v5505_v6, %v2799_v56  ;;  %v2801_v15 = vrot.slane %v2799_v56, 4  ;;  %4898 = vmatprep.mubr.bf16.mxu0 %v6701_v3  ;;  %v2572_v46 = vrot.slane %v2437_v13, 5  ;;  %v6022_v56 = vpop.f32.mrf.mxu1  ;;  %v5934_v13 = vpop.f32.mrf.mxu0 }
 0x168   : > { %v2362_v19 = vld [vmem:[#allocation2 + $0x9c] sm:$0xf]  ;;  %v2363_v40 = vld [vmem:[#allocation2 + $0xa0] sm:$0xf]  ;;  %2926 = vst [vmem:[#allocation3 + $0xf8] sm:$0xf] %v2800_v14  ;;  %v7798_v14 = vadd.f32 %v6021_v1, %v5909_v29 }
 0x169   : > { %2394 = vst [vmem:[#allocation3 + $0x2a0] sm:$0xf] %v2362_v19  ;;  %2395 = vst [vmem:[#allocation3 + $0x2c4] sm:$0xf] %v2363_v40  ;;  %v2435_v26 = vld [vmem:[#allocation2 + $0x9c] sm:$0xe]  ;;  %v2803_v31 = vsel %vm7182_vm7, %v2801_v15, %v2802_v44  ;;  %v6023_v15 = vpop.f32.mrf.mxu1 }
 0x16a   : > { %v2436_v27 = vld [vmem:[#allocation2 + $0xa0] sm:$0xf]  ;;  %v5495_v55 = vrot.slane %v2435_v26, 9  ;;  %v6715_v45 = vld [vmem:[#allocation3 + $0x25c] ss:$36 sps:$4 sm:$0xff]   ;;  %4899 = vmatmul.mubr.bf16.gmra.mxu0 %v6705_v33  ;;  %v6024_v25 = vadd.f32 %v6023_v15, %v6022_v56 }
 0x16b   : > { %v2569_v60 = vrot.slane %v2436_v27, 5  ;;  %v2692_v7 = vld [vmem:[#allocation2 + $0x60] sm:$0xc]  ;;  %2927 = vst [vmem:[#allocation3 + $0x11c] sm:$0xf] %v2803_v31  ;;  %6364 = vmatprep.mubr.bf16.mxu0 %v6710_v57  ;;  %5003 = vmatprep.mubr.bf16.mxu1 %v6715_v45 }
 0x16c   : > { %v2693_v0 = vld [vmem:[#allocation2 + $0x64] sm:$0xf]  ;;  %v2694_v48 = vld [vmem:[#allocation2 + $0x68] sm:$0x3]  ;;  %v5506_v59 = vrot.slane %v2692_v7, 10  ;;  %v7805_v7 = vadd.f32 %v6024_v25, %v7647_v16 }
 0x16d   : > { %v2570_v38 = vsel %vm6963_vm2, %v5495_v55, %v2569_v60  ;;  %v2571_v58 = vrot.slane %v2569_v60, 4  ;;  %v2806_v43 = vrot.slane %v2693_v0, 6  ;;  %v2809_v6 = vrot.slane %v2694_v48, 6  ;;  %v2695_v50 = vld [vmem:[#allocation2 + $0x6c] sm:$0xc]  ;;  %v6025_v55 = vpop.f32.mrf.mxu1 }
 0x16e   : > { %2666 = vst [vmem:[#allocation3 + $0x2a4] sm:$0xf] %v2570_v38  ;;  %v6712_v44 = vld [vmem:[#allocation3 + $0x68] ss:$36 sps:$4 sm:$0xff]   ;;  %v2696_v33 = vld [vmem:[#allocation2 + $0x70] sm:$0xf]  ;;  %5004 = vmatmul.mubr.bf16.gmra.mxu1 %v6713_v39  ;;  %v5935_v38 = vpop.f32.mrf.mxu0  ;;  %v5915_v0 = vadd.f32 %v7664_v53, %v7653_v28 }
 0x16f   : > { %v2573_v3 = vsel %vm6963_vm2, %v2571_v58, %v2572_v46  ;;  %v2697_v9 = vld [vmem:[#allocation2 + $0x74] sm:$0x3]  ;;  %v5507_v11 = vrot.slane %v2695_v50, 10  ;;  %v6716_v12 = vld [vmem:[#allocation3 + $0xb0] ss:$36 sps:$4 sm:$0xff]   ;;  %v2807_v36 = vsel %vm7182_vm7, %v5506_v59, %v2806_v43  ;;  %v2808_v51 = vrot.slane %v2806_v43, 4  ;;  %v6026_v58 = vpop.f32.mrf.mxu1 }
 0x170   : > { %2667 = vst [vmem:[#allocation3 + $0x2c8] sm:$0xf] %v2573_v3  ;;  %v2813_v57 = vrot.slane %v2696_v33, 6  ;;  %2928 = vst [vmem:[#allocation3 + $0x140] sm:$0xf] %v2807_v36  ;;  %v2816_v19 = vrot.slane %v2697_v9, 6  ;;  %v7811_v43 = vadd.f32 %v5935_v38, %v5934_v13  ;;  %v6027_v16 = vadd.f32 %v6026_v58, %v6025_v55  ;;  %v5937_v33 = vpop.f32.mrf.mxu0 }
 0x171   : > { %v2364_v40 = vld [vmem:[#allocation2 + $0xa8] sm:$0xf]  ;;  %v2810_v26 = vsel %vm7182_vm7, %v2808_v51, %v2809_v6  ;;  %v2365_v30 = vld [vmem:[#allocation2 + $0xac] sm:$0xf]  ;;  %v2440_v45 = vld [vmem:[#allocation2 + $0xb0] sm:$0x1]  ;;  %v6028_v9 = vpop.f32.mrf.mxu1 }
 0x172   : > { %v2814_v27 = vsel %vm7182_vm7, %v5507_v11, %v2813_v57  ;;  %v2815_v21 = vrot.slane %v2813_v57, 4  ;;  %2396 = vst [vmem:[#allocation3 + $0x2e8] sm:$0xf] %v2364_v40  ;;  %v2438_v31 = vld [vmem:[#allocation2 + $0xa8] sm:$0xe]  ;;  %6365 = vmatmul.mubr.bf16.vlgmr.msra.gmra.mxu0 %v6712_v44  ;;  %v2579_v48 = vrot.slane %v2440_v45, 5  ;;  %v7815_v36 = vadd.f32 %v6027_v16, %v5915_v0  ;;  %v5938_v40 = vpop.f32.mrf.mxu0 }
 0x173   : > { %2929 = vst [vmem:[#allocation3 + $0x164] sm:$0xf] %v2810_v26  ;;  %2930 = vst [vmem:[#allocation3 + $0x188] sm:$0xf] %v2814_v27  ;;  %v2439_v60 = vld [vmem:[#allocation2 + $0xac] sm:$0xf]  ;;  %6368 = vmatprep.mubr.bf16.mxu0 %v6716_v12  ;;  %v6029_v25 = vpop.f32.mrf.mxu1 }
 0x174   : > { %2397 = vst [vmem:[#allocation3 + $0x30c] sm:$0xf] %v2365_v30  ;;  %v2817_v39 = vsel %vm7182_vm7, %v2815_v21, %v2816_v19  ;;  %v5496_v46 = vrot.slane %v2438_v31, 9  ;;  %v2576_v47 = vrot.slane %v2439_v60, 5  ;;  %v2698_v49 = vld [vmem:[#allocation2 + $0x78] sm:$0xc]  ;;  %v7821_v21 = vadd.f32 %v5938_v40, %v5937_v33  ;;  %v5940_v33 = vpop.f32.mrf.mxu0 }
 0x175   : > { %2931 = vst [vmem:[#allocation3 + $0x1ac] sm:$0xf] %v2817_v39  ;;  %v2699_v59 = vld [vmem:[#allocation2 + $0x7c] sm:$0xf]  ;;  %v2700_v29 = vld [vmem:[#allocation2 + $0x80] sm:$0x3]  ;;  %v6030_v31 = vadd.f32 %v6029_v25, %v6028_v9  ;;  %v6031_v60 = vpop.f32.mrf.mxu1 }
 0x176   : > { %v2577_v6 = vsel %vm6963_vm2, %v5496_v46, %v2576_v47  ;;  %v2578_v50 = vrot.slane %v2576_v47, 4  ;;  %v5508_v1 = vrot.slane %v2698_v49, 10  ;;  %v2820_v56 = vrot.slane %v2699_v59, 6  ;;  %v2701_v3 = vld [vmem:[#allocation2 + $0x84] sm:$0xc] }
 0x177   : > { %v6717_v11 = vld [vmem:[#allocation3 + $0xf8] ss:$36 sps:$4 sm:$0xff]   ;;  %v6718_v28 = vld [vmem:[#allocation3 + $0x2a0] ss:$36 sps:$4 sm:$0xff]   ;;  %2668 = vst [vmem:[#allocation3 + $0x2ec] sm:$0xf] %v2577_v6  ;;  %v7828_v38 = vadd.f32 %v6030_v31, %v7693_v37  ;;  %v6032_v0 = vpop.f32.mrf.mxu1 }
 0x178   : > { %v6720_v53 = vld [vmem:[#allocation3 + $0x2a4] ss:$36 sps:$4 sm:$0xff]   ;;  %v2823_v44 = vrot.slane %v2700_v29, 6  ;;  %v2580_v51 = vsel %vm6963_vm2, %v2578_v50, %v2579_v48  ;;  %v2821_v12 = vsel %vm7182_vm7, %v5508_v1, %v2820_v56  ;;  %v2822_v57 = vrot.slane %v2820_v56, 4  ;;  %v2702_v15 = vld [vmem:[#allocation2 + $0x88] sm:$0xf] }
 0x179   : > { %v5509_v19 = vrot.slane %v2701_v3, 10  ;;  %5011 = vmatprep.mubr.bf16.mxu1 %v6720_v53  ;;  %2669 = vst [vmem:[#allocation3 + $0x310] sm:$0xf] %v2580_v51  ;;  %2932 = vst [vmem:[#allocation3 + $0x1d0] sm:$0xf] %v2821_v12  ;;  %v2827_v27 = vrot.slane %v2702_v15, 6  ;;  %v6033_v50 = vadd.f32 %v6032_v0, %v6031_v60  ;;  %v5921_v1 = vadd.f32 %v7729_v10, %v7721_v32 }
 0x17a   : > { %v2703_v26 = vld [vmem:[#allocation2 + $0x8c] sm:$0x3]  ;;  %v2366_v30 = vld [vmem:[#allocation2 + $0xb4] sm:$0xf]  ;;  %5012 = vmatmul.mubr.bf16.gmra.mxu1 %v6718_v28  ;;  %v2824_v55 = vsel %vm7182_vm7, %v2822_v57, %v2823_v44  ;;  %v2367_v47 = vld [vmem:[#allocation2 + $0xb8] sm:$0xf]  ;;  %6369 = vmatmul.mubr.bf16.gmra.mxu0 %v6717_v11 }
 0x17b   : > { %v6721_v13 = vld [vmem:[#allocation3 + $0x140] ss:$36 sps:$4 sm:$0xff]   ;;  %2398 = vst [vmem:[#allocation3 + $0x330] sm:$0xf] %v2366_v30  ;;  %2933 = vst [vmem:[#allocation3 + $0x1f4] sm:$0xf] %v2824_v55  ;;  %v2828_v39 = vsel %vm7182_vm7, %v5509_v19, %v2827_v27  ;;  %v5941_v19 = vpop.f32.mrf.mxu0  ;;  %v7836_v32 = vadd.f32 %v6033_v50, %v5921_v1  ;;  %v6034_v30 = vpop.f32.mrf.mxu1 }
 0x17c   : > { %v2829_v45 = vrot.slane %v2827_v27, 4  ;;  %v2830_v46 = vrot.slane %v2703_v26, 6  ;;  %v2441_v49 = vld [vmem:[#allocation2 + $0xb4] sm:$0xe]  ;;  %2934 = vst [vmem:[#allocation3 + $0x218] sm:$0xf] %v2828_v39  ;;  %6372 = vmatprep.mubr.bf16.mxu0 %v6721_v13  ;;  %v7842_v55 = vadd.f32 %v5941_v19, %v5940_v33 }
 0x17d   : > { %2399 = vst [vmem:[#allocation3 + $0x354] sm:$0xf] %v2367_v47  ;;  %v2442_v58 = vld [vmem:[#allocation2 + $0xb8] sm:$0xf]  ;;  %v2443_v59 = vld [vmem:[#allocation2 + $0xbc] sm:$0x1]  ;;  %v5943_v60 = vpop.f32.mrf.mxu0 }
 0x17e   : > { %v2831_v48 = vsel %vm7182_vm7, %v2829_v45, %v2830_v46  ;;  %v5497_v29 = vrot.slane %v2441_v49, 9  ;;  %v2583_v16 = vrot.slane %v2442_v58, 5  ;;  %v2704_v6 = vld [vmem:[#allocation2 + $0x90] sm:$0xc]  ;;  %v2586_v37 = vrot.slane %v2443_v59, 5  ;;  %v6035_v49 = vpop.f32.mrf.mxu1 }
 0x17f   : > { %2935 = vst [vmem:[#allocation3 + $0x23c] sm:$0xf] %v2831_v48  ;;  %v2705_v56 = vld [vmem:[#allocation2 + $0x94] sm:$0xf]  ;;  %v2706_v3 = vld [vmem:[#allocation2 + $0x98] sm:$0x3]  ;;  %v5944_v58 = vpop.f32.mrf.mxu0 }
 0x180   : > { %v6722_v9 = vld [vmem:[#allocation3 + $0x188] ss:$36 sps:$4 sm:$0xff]   ;;  %v2584_v11 = vsel %vm6963_vm2, %v5497_v29, %v2583_v16  ;;  %v2585_v28 = vrot.slane %v2583_v16, 4  ;;  %v5510_v53 = vrot.slane %v2704_v6, 10  ;;  %v2834_v44 = vrot.slane %v2705_v56, 6 }
 0x181   : > { %v2707_v51 = vld [vmem:[#allocation2 + $0x9c] sm:$0xc]  ;;  %2670 = vst [vmem:[#allocation3 + $0x334] sm:$0xf] %v2584_v11  ;;  %v2837_v15 = vrot.slane %v2706_v3, 6  ;;  %v6036_v29 = vadd.f32 %v6035_v49, %v6034_v30  ;;  %v7848_v50 = vadd.f32 %v5944_v58, %v5943_v60  ;;  %v5946_v11 = vpop.f32.mrf.mxu0 }
 0x182   : > { %v6723_v12 = vld [vmem:[#allocation3 + $0x2e8] ss:$36 sps:$4 sm:$0xff]   ;;  %v2587_v10 = vsel %vm6963_vm2, %v2585_v28, %v2586_v37  ;;  %v2835_v40 = vsel %vm7182_vm7, %v5510_v53, %v2834_v44  ;;  %v2836_v25 = vrot.slane %v2834_v44, 4  ;;  %v2708_v26 = vld [vmem:[#allocation2 + $0xa0] sm:$0xf]  ;;  %v5511_v27 = vrot.slane %v2707_v51, 10  ;;  %6373 = vmatmul.mubr.bf16.gmra.mxu0 %v6722_v9  ;;  %v6037_v37 = vpop.f32.mrf.mxu1 }
 0x183   : > { %v6725_v57 = vld [vmem:[#allocation3 + $0x2ec] ss:$36 sps:$4 sm:$0xff]   ;;  %2671 = vst [vmem:[#allocation3 + $0x358] sm:$0xf] %v2587_v10  ;;  %2936 = vst [vmem:[#allocation3 + $0x260] sm:$0xf] %v2835_v40  ;;  %v7851_v28 = vadd.f32 %v6036_v29, %v7754_v8 }
 0x184   : > { %5019 = vmatprep.mubr.bf16.mxu1 %v6725_v57  ;;  %v6726_v31 = vld [vmem:[#allocation3 + $0x1d0] ss:$36 sps:$4 sm:$0xff]   ;;  %v2838_v39 = vsel %vm7182_vm7, %v2836_v25, %v2837_v15  ;;  %v2841_v45 = vrot.slane %v2708_v26, 6  ;;  %v2446_v56 = vld [vmem:[#allocation2 + $0xc8] sm:$0x1]  ;;  %v6038_v57 = vpop.f32.mrf.mxu1  ;;  %v5947_v26 = vpop.f32.mrf.mxu0 }
 0x185   : > { %v2709_v13 = vld [vmem:[#allocation2 + $0xa4] sm:$0x3]  ;;  %5020 = vmatmul.mubr.bf16.gmra.mxu1 %v6723_v12  ;;  %v2368_v47 = vld [vmem:[#allocation2 + $0xc0] sm:$0xf]  ;;  %2937 = vst [vmem:[#allocation3 + $0x284] sm:$0xf] %v2838_v39  ;;  %6376 = vmatprep.mubr.bf16.mxu0 %v6726_v31  ;;  %v7857_v31 = vadd.f32 %v5947_v26, %v5946_v11 }
 0x186   : > { %v2844_v46 = vrot.slane %v2709_v13, 6  ;;  %v2369_v0 = vld [vmem:[#allocation2 + $0xc4] sm:$0xf]  ;;  %2400 = vst [vmem:[#allocation3 + $0x378] sm:$0xf] %v2368_v47  ;;  %v2842_v16 = vsel %vm7182_vm7, %v5511_v27, %v2841_v45  ;;  %v2843_v6 = vrot.slane %v2841_v45, 4  ;;  %v6039_v13 = vadd.f32 %v6038_v57, %v6037_v37  ;;  %v6040_v60 = vpop.f32.mrf.mxu1  ;;  %v5949_v58 = vpop.f32.mrf.mxu0 }
 0x187   : > { %v2444_v48 = vld [vmem:[#allocation2 + $0xc0] sm:$0xe]  ;;  %v2445_v59 = vld [vmem:[#allocation2 + $0xc4] sm:$0xf]  ;;  %2401 = vst [vmem:[#allocation3 + $0x39c] sm:$0xf] %v2369_v0 }
 0x188   : > { %v5498_v1 = vrot.slane %v2444_v48, 9  ;;  %2938 = vst [vmem:[#allocation3 + $0x2a8] sm:$0xf] %v2842_v16  ;;  %v2590_v3 = vrot.slane %v2445_v59, 5  ;;  %v2710_v33 = vld [vmem:[#allocation2 + $0xa8] sm:$0xc]  ;;  %v2845_v9 = vsel %vm7182_vm7, %v2843_v6, %v2844_v46  ;;  %v7864_v59 = vadd.f32 %v6039_v13, %v7764_v20  ;;  %v6041_v29 = vpop.f32.mrf.mxu1  ;;  %v5950_v37 = vpop.f32.mrf.mxu0 }
 0x189   : > { %v6727_v53 = vld [vmem:[#allocation3 + $0x218] ss:$36 sps:$4 sm:$0xff]   ;;  %v2593_v44 = vrot.slane %v2446_v56, 5  ;;  %v2712_v12 = vld [vmem:[#allocation2 + $0xb0] sm:$0x3]  ;;  %v5512_v10 = vrot.slane %v2710_v33, 10  ;;  %v6042_v33 = vadd.f32 %v6041_v29, %v6040_v60  ;;  %v7868_v11 = vadd.f32 %v5950_v37, %v5949_v58 }
 0x18a   : > { %v2711_v51 = vld [vmem:[#allocation2 + $0xac] sm:$0xf]  ;;  %2939 = vst [vmem:[#allocation3 + $0x2cc] sm:$0xf] %v2845_v9  ;;  %v2591_v15 = vsel %vm6963_vm2, %v5498_v1, %v2590_v3  ;;  %v2592_v19 = vrot.slane %v2590_v3, 4  ;;  %v2851_v30 = vrot.slane %v2712_v12, 6  ;;  %6377 = vmatmul.mubr.bf16.gmra.mxu0 %v6727_v53 }
 0x18b   : > { %v2848_v40 = vrot.slane %v2711_v51, 6  ;;  %v2713_v25 = vld [vmem:[#allocation2 + $0xb4] sm:$0xc]  ;;  %v6728_v27 = vld [vmem:[#allocation3 + $0x330] ss:$36 sps:$4 sm:$0xff]   ;;  %v7873_v53 = vadd.f32 %v6042_v33, %v7781_v54 }
 0x18c   : > { %v6730_v8 = vld [vmem:[#allocation3 + $0x334] ss:$36 sps:$4 sm:$0xff]   ;;  %2672 = vst [vmem:[#allocation3 + $0x37c] sm:$0xf] %v2591_v15  ;;  %v2594_v39 = vsel %vm6963_vm2, %v2592_v19, %v2593_v44  ;;  %v2714_v47 = vld [vmem:[#allocation2 + $0xb8] sm:$0xf]  ;;  %v6043_v44 = vpop.f32.mrf.mxu1 }
 0x18d   : > { %v2849_v45 = vsel %vm7182_vm7, %v5512_v10, %v2848_v40  ;;  %v2850_v46 = vrot.slane %v2848_v40, 4  ;;  %v5513_v49 = vrot.slane %v2713_v25, 10  ;;  %5027 = vmatprep.mubr.bf16.mxu1 %v6730_v8  ;;  %v6731_v0 = vld [vmem:[#allocation3 + $0x260] ss:$36 sps:$4 sm:$0xff]   ;;  %2673 = vst [vmem:[#allocation3 + $0x3a0] sm:$0xf] %v2594_v39 }
 0x18e   : > { %2940 = vst [vmem:[#allocation3 + $0x2f0] sm:$0xf] %v2849_v45  ;;  %v2715_v48 = vld [vmem:[#allocation2 + $0xbc] sm:$0x3]  ;;  %5028 = vmatmul.mubr.bf16.gmra.mxu1 %v6728_v27  ;;  %v2855_v6 = vrot.slane %v2714_v47, 6  ;;  %6380 = vmatprep.mubr.bf16.mxu0 %v6731_v0  ;;  %v6044_v25 = vpop.f32.mrf.mxu1  ;;  %v5952_v47 = vpop.f32.mrf.mxu0 }
 0x18f   : > { %v2852_v16 = vsel %vm7182_vm7, %v2850_v46, %v2851_v30  ;;  %v2858_v1 = vrot.slane %v2715_v48, 6  ;;  %v2370_v56 = vld [vmem:[#allocation2 + $0xcc] sm:$0xf]  ;;  %v2371_v3 = vld [vmem:[#allocation2 + $0xd0] sm:$0xf]  ;;  %v6045_v60 = vadd.f32 %v6044_v25, %v6043_v44 }
 0x190   : > { %2941 = vst [vmem:[#allocation3 + $0x314] sm:$0xf] %v2852_v16  ;;  %2402 = vst [vmem:[#allocation3 + $0x3c0] sm:$0xf] %v2370_v56  ;;  %v2447_v9 = vld [vmem:[#allocation2 + $0xcc] sm:$0xe]  ;;  %v2856_v51 = vsel %vm7182_vm7, %v5513_v49, %v2855_v6  ;;  %v5953_v56 = vpop.f32.mrf.mxu0 }
 0x191   : > { %2403 = vst [vmem:[#allocation3 + $0x3e4] sm:$0xf] %v2371_v3  ;;  %v2448_v20 = vld [vmem:[#allocation2 + $0xd0] sm:$0xf]  ;;  %v2857_v12 = vrot.slane %v2855_v6, 4  ;;  %v5499_v15 = vrot.slane %v2447_v9, 9  ;;  %v7882_v29 = vadd.f32 %v6045_v60, %v7790_v61  ;;  %v7886_v9 = vadd.f32 %v5953_v56, %v5952_v47 }
 0x192   : > { %v2449_v57 = vld [vmem:[#allocation2 + $0xd4] sm:$0x1]  ;;  %v2597_v19 = vrot.slane %v2448_v20, 5  ;;  %v6732_v10 = vld [vmem:[#allocation3 + $0x2a8] ss:$36 sps:$4 sm:$0xff]  }
 0x193   : > { %2942 = vst [vmem:[#allocation3 + $0x338] sm:$0xf] %v2856_v51  ;;  %v2600_v40 = vrot.slane %v2449_v57, 5  ;;  %v2859_v26 = vsel %vm7182_vm7, %v2857_v12, %v2858_v1  ;;  %v2716_v30 = vld [vmem:[#allocation2 + $0xc0] sm:$0xc]  ;;  %6381 = vmatmul.mubr.bf16.gmra.mxu0 %v6732_v10  ;;  %v5955_v51 = vpop.f32.mrf.mxu0 }
 0x194   : > { %v2598_v27 = vsel %vm6963_vm2, %v5499_v15, %v2597_v19  ;;  %v2599_v8 = vrot.slane %v2597_v19, 4  ;;  %v2717_v13 = vld [vmem:[#allocation2 + $0xc4] sm:$0xf]  ;;  %2943 = vst [vmem:[#allocation3 + $0x35c] sm:$0xf] %v2859_v26  ;;  %v5514_v45 = vrot.slane %v2716_v30, 10  ;;  %v6046_v15 = vpop.f32.mrf.mxu1 }
 0x195   : > { %2674 = vst [vmem:[#allocation3 + $0x3c4] sm:$0xf] %v2598_v27  ;;  %v2718_v39 = vld [vmem:[#allocation2 + $0xc8] sm:$0x3]  ;;  %v2862_v46 = vrot.slane %v2717_v13, 6  ;;  %v5956_v26 = vpop.f32.mrf.mxu0 }
 0x196   : > { %v2719_v49 = vld [vmem:[#allocation2 + $0xcc] sm:$0xc]  ;;  %v2601_v0 = vsel %vm6963_vm2, %v2599_v8, %v2600_v40  ;;  %v2865_v48 = vrot.slane %v2718_v39, 6  ;;  %v2720_v1 = vld [vmem:[#allocation2 + $0xd0] sm:$0xf]  ;;  %v6047_v13 = vpop.f32.mrf.mxu1  ;;  %v7892_v39 = vadd.f32 %v5956_v26, %v5955_v51 }
 0x197   : > { %v6733_v54 = vld [vmem:[#allocation3 + $0x378] ss:$36 sps:$4 sm:$0xff]   ;;  %2675 = vst [vmem:[#allocation3 + $0x3e8] sm:$0xf] %v2601_v0  ;;  %v2863_v16 = vsel %vm7182_vm7, %v5514_v45, %v2862_v46  ;;  %v2864_v6 = vrot.slane %v2862_v46, 4  ;;  %v5515_v37 = vrot.slane %v2719_v49, 10  ;;  %v6048_v46 = vadd.f32 %v6047_v13, %v6046_v15 }
 0x198   : > { %v6735_v58 = vld [vmem:[#allocation3 + $0x37c] ss:$36 sps:$4 sm:$0xff]   ;;  %v6736_v3 = vld [vmem:[#allocation3 + $0x2f0] ss:$36 sps:$4 sm:$0xff]   ;;  %2944 = vst [vmem:[#allocation3 + $0x380] sm:$0xf] %v2863_v16  ;;  %v6049_v16 = vpop.f32.mrf.mxu1 }
 0x199   : > { %5035 = vmatprep.mubr.bf16.mxu1 %v6735_v58  ;;  %v2721_v33 = vld [vmem:[#allocation2 + $0xd4] sm:$0x3]  ;;  %v2866_v61 = vsel %vm7182_vm7, %v2864_v6, %v2865_v48  ;;  %v2869_v20 = vrot.slane %v2720_v1, 6  ;;  %v2372_v12 = vld [vmem:[#allocation2 + $0xd8] sm:$0xf]  ;;  %6384 = vmatprep.mubr.bf16.mxu0 %v6736_v3  ;;  %v5958_v58 = vpop.f32.mrf.mxu0  ;;  %v7899_v56 = vadd.f32 %v6048_v46, %v7811_v43 }
 0x19a   : > { %5036 = vmatmul.mubr.bf16.gmra.mxu1 %v6733_v54  ;;  %v2872_v44 = vrot.slane %v2721_v33, 6  ;;  %v2373_v57 = vld [vmem:[#allocation2 + $0xdc] sm:$0xf]  ;;  %2945 = vst [vmem:[#allocation3 + $0x3a4] sm:$0xf] %v2866_v61 }
 0x19b   : > { %2404 = vst [vmem:[#allocation3 + $0x408] sm:$0xf] %v2372_v12  ;;  %2405 = vst [vmem:[#allocation3 + $0x42c] sm:$0xf] %v2373_v57  ;;  %v2450_v19 = vld [vmem:[#allocation2 + $0xd8] sm:$0xe]  ;;  %v2870_v25 = vsel %vm7182_vm7, %v5515_v37, %v2869_v20  ;;  %v5959_v33 = vpop.f32.mrf.mxu0 }
 0x19c   : > { %v2451_v40 = vld [vmem:[#allocation2 + $0xdc] sm:$0xf]  ;;  %v2871_v10 = vrot.slane %v2869_v20, 4  ;;  %v2452_v27 = vld [vmem:[#allocation2 + $0xe0] sm:$0x1]  ;;  %v5500_v8 = vrot.slane %v2450_v19, 9  ;;  %v7903_v51 = vadd.f32 %v5959_v33, %v5958_v58 }
 0x19d   : > { %v2604_v30 = vrot.slane %v2451_v40, 5  ;;  %v6737_v60 = vld [vmem:[#allocation3 + $0x338] ss:$36 sps:$4 sm:$0xff]   ;;  %2946 = vst [vmem:[#allocation3 + $0x3c8] sm:$0xf] %v2870_v25  ;;  %v2607_v45 = vrot.slane %v2452_v27, 5 }
 0x19e   : > { %v2873_v47 = vsel %vm7182_vm7, %v2871_v10, %v2872_v44  ;;  %v2722_v0 = vld [vmem:[#allocation2 + $0xd8] sm:$0xc]  ;;  %v2723_v48 = vld [vmem:[#allocation2 + $0xdc] sm:$0xf]  ;;  %v6738_v6 = vld [vmem:[#allocation3 + $0x3c0] ss:$36 sps:$4 sm:$0xff]   ;;  %v6050_v44 = vpop.f32.mrf.mxu1  ;;  %6385 = vmatmul.mubr.bf16.gmra.mxu0 %v6737_v60  ;;  %v5961_v10 = vpop.f32.mrf.mxu0 }
 0x19f   : > { %v2605_v49 = vsel %vm6963_vm2, %v5500_v8, %v2604_v30  ;;  %v2606_v54 = vrot.slane %v2604_v30, 4  ;;  %v6740_v1 = vld [vmem:[#allocation3 + $0x3c4] ss:$36 sps:$4 sm:$0xff]   ;;  %2947 = vst [vmem:[#allocation3 + $0x3ec] sm:$0xf] %v2873_v47  ;;  %v5516_v37 = vrot.slane %v2722_v0, 10  ;;  %v6051_v19 = vadd.f32 %v6050_v44, %v6049_v16 }
 0x1a0   : > { %2676 = vst [vmem:[#allocation3 + $0x40c] sm:$0xf] %v2605_v49  ;;  %v2724_v61 = vld [vmem:[#allocation2 + $0xe0] sm:$0x3]  ;;  %v2876_v20 = vrot.slane %v2723_v48, 6  ;;  %5043 = vmatprep.mubr.bf16.mxu1 %v6740_v1  ;;  %v5962_v47 = vpop.f32.mrf.mxu0 }
 0x1a1   : > { %v2608_v3 = vsel %vm6963_vm2, %v2606_v54, %v2607_v45  ;;  %v2879_v12 = vrot.slane %v2724_v61, 6  ;;  %v2725_v57 = vld [vmem:[#allocation2 + $0xe4] sm:$0xc]  ;;  %v2726_v15 = vld [vmem:[#allocation2 + $0xe8] sm:$0xf]  ;;  %v7908_v13 = vadd.f32 %v6051_v19, %v7821_v21  ;;  %v6052_v45 = vpop.f32.mrf.mxu1  ;;  %v7914_v0 = vadd.f32 %v5962_v47, %v5961_v10 }
 0x1a2   : > { %2677 = vst [vmem:[#allocation3 + $0x430] sm:$0xf] %v2608_v3  ;;  %v6741_v40 = vld [vmem:[#allocation3 + $0x380] ss:$36 sps:$4 sm:$0xff]   ;;  %5044 = vmatmul.mubr.bf16.gmra.mxu1 %v6738_v6  ;;  %v2877_v43 = vsel %vm7182_vm7, %v5516_v37, %v2876_v20  ;;  %v2878_v25 = vrot.slane %v2876_v20, 4  ;;  %v5517_v26 = vrot.slane %v2725_v57, 10  ;;  %v6116_v37 = vpop.f32.mrf.mxu0 }
 0x1a3   : > { %2948 = vst [vmem:[#allocation3 + $0x410] sm:$0xf] %v2877_v43  ;;  %v2727_v27 = vld [vmem:[#allocation2 + $0xec] sm:$0x3]  ;;  %v2883_v8 = vrot.slane %v2726_v15, 6  ;;  %6388 = vmatprep.mubr.bf16.mxu0 %v6741_v40  ;;  %v6053_v16 = vpop.f32.mrf.mxu1 }
 0x1a4   : > { %v2374_v30 = vld [vmem:[#allocation2 + $0xe4] sm:$0xf]  ;;  %v2880_v60 = vsel %vm7182_vm7, %v2878_v25, %v2879_v12  ;;  %v2886_v46 = vrot.slane %v2727_v27, 6  ;;  %v2375_v49 = vld [vmem:[#allocation2 + $0xe8] sm:$0xf]  ;;  %v6054_v3 = vadd.f32 %v6053_v16, %v6052_v45  ;;  %v6117_v19 = vpop.f32.mrf.mxu0 }
 0x1a5   : > { %2406 = vst [vmem:[#allocation3 + $0x450] sm:$0xf] %v2374_v30  ;;  %2949 = vst [vmem:[#allocation3 + $0x434] sm:$0xf] %v2880_v60  ;;  %v2884_v54 = vsel %vm7182_vm7, %v5517_v26, %v2883_v8  ;;  %v2885_v58 = vrot.slane %v2883_v8, 4  ;;  %v6055_v44 = vpop.f32.mrf.mxu1  ;;  %v6118_v10 = vadd.f32 %v6117_v19, %v6116_v37 }
 0x1a6   : > { %2407 = vst [vmem:[#allocation3 + $0x474] sm:$0xf] %v2375_v49  ;;  %v2453_v48 = vld [vmem:[#allocation2 + $0xe4] sm:$0xe]  ;;  %v2454_v21 = vld [vmem:[#allocation2 + $0xe8] sm:$0xf]  ;;  %v7919_v40 = vadd.f32 %v6054_v3, %v7842_v55  ;;  %v6119_v63 = vpop.f32.mrf.mxu0 }
 0x1a7   : > { %v6742_v6 = vld [vmem:[#allocation3 + $0x3c8] ss:$36 sps:$4 sm:$0xff]   ;;  %2950 = vst [vmem:[#allocation3 + $0x458] sm:$0xf] %v2884_v54  ;;  %v5501_v1 = vrot.slane %v2453_v48, 9  ;;  %v2887_v33 = vsel %vm7182_vm7, %v2885_v58, %v2886_v46  ;;  %v2611_v20 = vrot.slane %v2454_v21, 5  ;;  %v6056_v26 = vpop.f32.mrf.mxu1  ;;  %v7926_v30 = vadd.f32 %v6118_v10, %v7744_v24 }
 0x1a8   : > { %v2455_v61 = vld [vmem:[#allocation2 + $0xec] sm:$0x1]  ;;  %v6743_v12 = vld [vmem:[#allocation3 + $0x408] ss:$36 sps:$4 sm:$0xff]   ;;  %2951 = vst [vmem:[#allocation3 + $0x47c] sm:$0xf] %v2887_v33  ;;  %6389 = vmatmul.mubr.bf16.gmra.mxu0 %v6742_v6  ;;  %v6057_v27 = vadd.f32 %v6056_v26, %v6055_v44  ;;  %v6120_v45 = vpop.f32.mrf.mxu0 }
 0x1a9   : > { %v6745_v57 = vld [vmem:[#allocation3 + $0x40c] ss:$36 sps:$4 sm:$0xff]   ;;  %v2614_v15 = vrot.slane %v2455_v61, 5  ;;  %v2612_v43 = vsel %vm6963_vm2, %v5501_v1, %v2611_v20  ;;  %v2613_v25 = vrot.slane %v2611_v20, 4  ;;  %v6121_v46 = vadd.f32 %v6120_v45, %v6119_v63  ;;  %v6058_v58 = vpop.f32.mrf.mxu1 }
 0x1aa   : > { %5051 = vmatprep.mubr.bf16.mxu1 %v6745_v57  ;;  %2678 = vst [vmem:[#allocation3 + $0x454] sm:$0xf] %v2612_v43  ;;  %v7929_v60 = vadd.f32 %v6057_v27, %v7848_v50  ;;  %v6122_v47 = vpop.f32.mrf.mxu0 }
 0x1ab   : > { %5052 = vmatmul.mubr.bf16.gmra.mxu1 %v6743_v12  ;;  %v2615_v8 = vsel %vm6963_vm2, %v2613_v25, %v2614_v15  ;;  %v7932_v54 = vadd.f32 %v6121_v46, %v7760_v17  ;;  %v6059_v21 = vpop.f32.mrf.mxu1 }
 0x1ac   : > { %v6746_v55 = vld [vmem:[#allocation3 + $0x410] ss:$36 sps:$4 sm:$0xff]   ;;  %2679 = vst [vmem:[#allocation3 + $0x478] sm:$0xf] %v2615_v8  ;;  %v6123_v48 = vpop.f32.mrf.mxu0  ;;  %v6060_v16 = vadd.f32 %v6059_v21, %v6058_v58 }
 0x1ad   : > { %6392 = vmatprep.mubr.bf16.mxu0 %v6746_v55  ;;  %v6124_v22 = vadd.f32 %v6123_v48, %v6122_v47  ;;  %v6748_v6 = vld [vmem:[#allocation3 + $0x450] ss:$36 sps:$4 sm:$0xff]   ;;  %v6061_v50 = vpop.f32.mrf.mxu1 }
 0x1ae   : > { %v6125_v24 = vpop.f32.mrf.mxu0  ;;  %v7938_v33 = vadd.f32 %v6060_v16, %v7857_v31 }
 0x1af   : > { %v6747_v49 = vld [vmem:[#allocation3 + $0x458] ss:$36 sps:$4 sm:$0xff]   ;;  %v7935_v37 = vadd.f32 %v6124_v22, %v7767_v34  ;;  %v6062_v61 = vpop.f32.mrf.mxu1 }
 0x1b0   : > { %6393 = vmatmul.mubr.bf16.gmra.mxu0 %v6747_v49  ;;  %v6126_v3 = vpop.f32.mrf.mxu0  ;;  %v6063_v44 = vadd.f32 %v6062_v61, %v6061_v50 }
 0x1b1   : > { %v6127_v17 = vadd.f32 %v6126_v3, %v6125_v24  ;;  %v6064_v57 = vpop.f32.mrf.mxu1 }
 0x1b2   : > { %v6128_v20 = vpop.f32.mrf.mxu0  ;;  %v7944_v19 = vadd.f32 %v6063_v44, %v7868_v11 }
 0x1b3   : > { %v6750_v1 = vld [vmem:[#allocation3 + $0x454] ss:$36 sps:$4 sm:$0xff]   ;;  %v7941_v12 = vadd.f32 %v6127_v17, %v7775_v23  ;;  %v6065_v43 = vpop.f32.mrf.mxu1 }
 0x1b4   : > { %5059 = vmatprep.mubr.bf16.mxu1 %v6750_v1  ;;  %v6129_v15 = vpop.f32.mrf.mxu0  ;;  %v6066_v10 = vadd.f32 %v6065_v43, %v6064_v57 }
 0x1b5   : > { %5060 = vmatmul.mubr.bf16.gmra.mxu1 %v6748_v6  ;;  %v6130_v34 = vadd.f32 %v6129_v15, %v6128_v20  ;;  %v6067_v26 = vpop.f32.mrf.mxu1 }
 0x1b6   : > { %v6131_v25 = vpop.f32.mrf.mxu0  ;;  %v7950_v27 = vadd.f32 %v6066_v10, %v7886_v9 }
 0x1b7   : > { %v7947_v31 = vadd.f32 %v6130_v34, %v7786_v62  ;;  %v6068_v23 = vpop.f32.mrf.mxu1 }
 0x1b8   : > { %v6132_v63 = vpop.f32.mrf.mxu0  ;;  %v6069_v45 = vadd.f32 %v6068_v23, %v6067_v26 }
 0x1b9   : > { %v6133_v8 = vadd.f32 %v6132_v63, %v6131_v25  ;;  %v6070_v58 = vpop.f32.mrf.mxu1 }
 0x1ba   : > { %v6134_v55 = vpop.f32.mrf.mxu0  ;;  %v7956_v47 = vadd.f32 %v6069_v45, %v7892_v39 }
 0x1bb   : > { %v7953_v46 = vadd.f32 %v6133_v8, %v7798_v14  ;;  %v6071_v22 = vpop.f32.mrf.mxu1 }
 0x1bc   : > { %v6135_v11 = vpop.f32.mrf.mxu0  ;;  %v6072_v21 = vadd.f32 %v6071_v22, %v6070_v58 }
 0x1bd   : > { %v6136_v49 = vadd.f32 %v6135_v11, %v6134_v55  ;;  %v6073_v16 = vpop.f32.mrf.mxu1 }
 0x1be   : > { %v6137_v62 = vpop.f32.mrf.mxu0  ;;  %v7962_v6 = vadd.f32 %v6072_v21, %v7903_v51 }
 0x1bf   : > { %v7959_v48 = vadd.f32 %v6136_v49, %v7805_v7  ;;  %v6074_v39 = vpop.f32.mrf.mxu1 }
 0x1c0   : > { %v6138_v9 = vpop.f32.mrf.mxu0  ;;  %v6075_v50 = vadd.f32 %v6074_v39, %v6073_v16 }
 0x1c1   : > { %v6139_v24 = vadd.f32 %v6138_v9, %v6137_v62  ;;  %v6076_v7 = vpop.f32.mrf.mxu1 }
 0x1c2   : > { %v6140_v1 = vpop.f32.mrf.mxu0  ;;  %v7968_v61 = vadd.f32 %v6075_v50, %v7914_v0 }
 0x1c3   : > { %v7965_v14 = vadd.f32 %v6139_v24, %v7815_v36  ;;  %v6077_v57 = vpop.f32.mrf.mxu1 }
 0x1c4   : > { %v6141_v3 = vpop.f32.mrf.mxu0  ;;  %v6078_v51 = vadd.f32 %v6077_v57, %v6076_v7 }
 0x1c5   : > { %v6142_v17 = vadd.f32 %v6141_v3, %v6140_v1  ;;  %v6079_v43 = vpop.f32.mrf.mxu1 }
 0x1c6   : > { %v6143_v20 = vpop.f32.mrf.mxu0  ;;  %v7974_v25 = vadd.f32 %v6078_v51, %v7609_v52 }
 0x1c7   : > { %v7971_v44 = vadd.f32 %v6142_v17, %v7828_v38  ;;  %v6080_v26 = vpop.f32.mrf.mxu1 }
 0x1c8   : > { %v6144_v15 = vpop.f32.mrf.mxu0  ;;  %v6081_v63 = vadd.f32 %v6080_v26, %v6079_v43 }
 0x1c9   : > { %v6145_v34 = vadd.f32 %v6144_v15, %v6143_v20  ;;  %v6082_v45 = vpop.f32.mrf.mxu1 }
 0x1ca   : > { %v6146_v36 = vpop.f32.mrf.mxu0  ;;  %v7980_v38 = vadd.f32 %v6081_v63, %v7619_v5 }
 0x1cb   : > { %v7977_v10 = vadd.f32 %v6145_v34, %v7836_v32  ;;  %v6083_v58 = vpop.f32.mrf.mxu1 }
 0x1cc   : > { %v6147_v0 = vpop.f32.mrf.mxu0  ;;  %v6084_v52 = vadd.f32 %v6083_v58, %v6082_v45 }
 0x1cd   : > { %v6148_v8 = vadd.f32 %v6147_v0, %v6146_v36  ;;  %v6085_v32 = vpop.f32.mrf.mxu1 }
 0x1ce   : > { %v6149_v23 = vpop.f32.mrf.mxu0  ;;  %v7989_v9 = vadd.f32 %v6084_v52, %v7633_v42 }
 0x1cf   : > { %v7983_v55 = vadd.f32 %v6148_v8, %v7851_v28  ;;  %v6086_v21 = vpop.f32.mrf.mxu1 }
 0x1d0   : > { %v6150_v11 = vpop.f32.mrf.mxu0  ;;  %v6087_v5 = vadd.f32 %v6086_v21, %v6085_v32 }
 0x1d1   : > { %v6151_v49 = vadd.f32 %v6150_v11, %v6149_v23  ;;  %v6088_v1 = vpop.f32.mrf.mxu1 }
 0x1d2   : > { %v6152_v22 = vpop.f32.mrf.mxu0  ;;  %v7992_v39 = vadd.f32 %v6087_v5, %v7643_v2 }
 0x1d3   : > { %v7986_v62 = vadd.f32 %v6151_v49, %v7864_v59  ;;  %v6089_v3 = vpop.f32.mrf.mxu1 }
 0x1d4   : > { %v6153_v24 = vpop.f32.mrf.mxu0  ;;  %v6090_v17 = vadd.f32 %v6089_v3, %v6088_v1 }
 0x1d5   : > { %v6154_v16 = vadd.f32 %v6153_v24, %v6152_v22  ;;  %v6091_v20 = vpop.f32.mrf.mxu1 }
 0x1d6   : > { %v6155_v28 = vpop.f32.mrf.mxu0  ;;  %v7998_v42 = vadd.f32 %v6090_v17, %v7677_v4 }
 0x1d7   : > { %v7995_v50 = vadd.f32 %v6154_v16, %v7873_v53  ;;  %v6092_v51 = vpop.f32.mrf.mxu1 }
 0x1d8   : > { %v6156_v59 = vpop.f32.mrf.mxu0  ;;  %v6093_v34 = vadd.f32 %v6092_v51, %v6091_v20 }
 0x1d9   : > { %v6157_v7 = vadd.f32 %v6156_v59, %v6155_v28  ;;  %v6094_v0 = vpop.f32.mrf.mxu1 }
 0x1da   : > { %v6158_v15 = vpop.f32.mrf.mxu0  ;;  %v8004_v36 = vadd.f32 %v6093_v34, %v7691_v35 }
 0x1db   : > { %v8001_v57 = vadd.f32 %v6157_v7, %v7882_v29  ;;  %v6095_v4 = vpop.f32.mrf.mxu1 }
 0x1dc   : > { %v6159_v43 = vpop.f32.mrf.mxu0  ;;  %v6096_v23 = vadd.f32 %v6095_v4, %v6094_v0 }
 0x1dd   : > { %v6160_v2 = vadd.f32 %v6159_v43, %v6158_v15  ;;  %v6097_v45 = vpop.f32.mrf.mxu1 }
 0x1de   : > { %v6161_v53 = vpop.f32.mrf.mxu0  ;;  %v8013_v49 = vadd.f32 %v6096_v23, %v7713_v18 }
 0x1df   : > { %v8007_v26 = vadd.f32 %v6160_v2, %v7899_v56  ;;  %v6098_v58 = vpop.f32.mrf.mxu1 }
 0x1e0   : > { %v6162_v63 = vpop.f32.mrf.mxu0  ;;  %v6099_v52 = vadd.f32 %v6098_v58, %v6097_v45 }
 0x1e1   : > { %v6163_v8 = vadd.f32 %v6162_v63, %v6161_v53 }
 0x1e2   : > { %v6164_v11 = vpop.f32.mrf.mxu0  ;;  %v8016_v56 = vadd.f32 %v6099_v52, %v7723_v41  ;;  %v8021_v16 = vpop.f32.mrf.mxu1 }
 0x1e3   : > { %v8010_v29 = vadd.f32 %v6163_v8, %v7908_v13 }
 0x1e4   : > { %v6165_v35 = vpop.f32.mrf.mxu0  ;;  %v8026_v28 = vpop.f32.mrf.mxu1 }
 0x1e5   : > { %v6166_v32 = vadd.f32 %v6165_v35, %v6164_v11 }
 0x1e6   : > { %v6167_v22 = vpop.f32.mrf.mxu0  ;;  %v8028_v17 = vpop.f32.mrf.mxu1 }
 0x1e7   : > { %v8019_v21 = vadd.f32 %v6166_v32, %v7919_v40 }
 0x1e8   : > { %v6168_v24 = vpop.f32.mrf.mxu0  ;;  %v8033_v7 = vpop.f32.mrf.mxu1 }
 0x1e9   : > { %v6169_v5 = vadd.f32 %v6168_v24, %v6167_v22 }
 0x1ea   : > { %v6170_v13 = vpop.f32.mrf.mxu0 }
 0x1eb   : > { %v8024_v1 = vadd.f32 %v6169_v5, %v7929_v60  ;;  %v8035_v51 = vpop.f32.mrf.mxu1 }
 0x1ec   : > { %v6171_v18 = vpop.f32.mrf.mxu0 }
 0x1ed   : > { %8316 = vst [vmem:[#allocation7_spill] sm:$0xff] %v8024_v1  ;;  %v6172_v3 = vadd.f32 %v6171_v18, %v6170_v13  ;;  %v8040_v43 = vpop.f32.mrf.mxu1 }
 0x1ee   : > { %v6173_v59 = vpop.f32.mrf.mxu0 }
 0x1ef   : > { %v8031_v41 = vadd.f32 %v6172_v3, %v7938_v33  ;;  %v8042_v0 = vpop.f32.mrf.mxu1 }
 0x1f0   : > { %v6174_v40 = vpop.f32.mrf.mxu0 }
 0x1f1   : > { %v6175_v20 = vadd.f32 %v6174_v40, %v6173_v59  ;;  %v8047_v8 = vpop.f32.mrf.mxu1 }
 0x1f2   : > { %v6176_v15 = vpop.f32.mrf.mxu0 }
 0x1f3   : > { %v8038_v60 = vadd.f32 %v6175_v20, %v7944_v19 }
 0x1f4   : > { %v6177_v34 = vpop.f32.mrf.mxu0  ;;  %v8049_v45 = vpop.f32.mrf.mxu1 }
 0x1f5   : > { %8317 = vst [vmem:[#allocation8_spill] sm:$0xff] %v8038_v60  ;;  %v6178_v2 = vadd.f32 %v6177_v34, %v6176_v15 }
 0x1f6   : > { %v6179_v53 = vpop.f32.mrf.mxu0  ;;  %v8054_v58 = vpop.f32.mrf.mxu1 }
 0x1f7   : > { %v8045_v33 = vadd.f32 %v6178_v2, %v7950_v27 }
 0x1f8   : > { %v6180_v63 = vpop.f32.mrf.mxu0  ;;  %v8056_v32 = vpop.f32.mrf.mxu1 }
 0x1f9   : > { %8318 = vst [vmem:[#allocation9_spill] sm:$0xff] %v8045_v33  ;;  %v6181_v4 = vadd.f32 %v6180_v63, %v6179_v53 }
 0x1fa   : > { %v6182_v23 = vpop.f32.mrf.mxu0  ;;  %v8061_v24 = vpop.f32.mrf.mxu1 }
 0x1fb   : > { %v8052_v19 = vadd.f32 %v6181_v4, %v7956_v47 }
 0x1fc   : > { %v6183_v11 = vpop.f32.mrf.mxu0 }
 0x1fd   : > { %8319 = vst [vmem:[#allocation10_spill] sm:$0xff] %v8052_v19  ;;  %v6184_v35 = vadd.f32 %v6183_v11, %v6182_v23 }
 0x1fe   : > { %v6185_v52 = vpop.f32.mrf.mxu0 }
 0x1ff   : > { %v8059_v27 = vadd.f32 %v6184_v35, %v7962_v6  ;;  %v8066_v47 = vpop.f32.mrf.mxu1 }
 0x200   : > { %v6186_v22 = vpop.f32.mrf.mxu0 }
 0x201   : > { %8320 = vst [vmem:[#allocation11_spill] sm:$0xff] %v8059_v27  ;;  %v6187_v5 = vadd.f32 %v6186_v22, %v6185_v52  ;;  %v8068_v40 = vpop.f32.mrf.mxu1 }
 0x202   : > { %v6188_v13 = vpop.f32.mrf.mxu0 }
 0x203   : > { %v8064_v18 = vadd.f32 %v6187_v5, %v7968_v61  ;;  %v8073_v6 = vpop.f32.mrf.mxu1 }
 0x204   : > { %v6189_v3 = vpop.f32.mrf.mxu0 }
 0x205   : > { %8321 = vst [vmem:[#allocation12_spill] sm:$0xff] %v8064_v18  ;;  %v6190_v59 = vadd.f32 %v6189_v3, %v6188_v13  ;;  %v8075_v53 = vpop.f32.mrf.mxu1 }
 0x206   : > { %v6191_v20 = vpop.f32.mrf.mxu0 }
 0x207   : > { %v8071_v15 = vadd.f32 %v6190_v59, %v7974_v25 }
 0x208   : > { %v6192_v34 = vpop.f32.mrf.mxu0 }
 0x209   : > { %8322 = vst [vmem:[#allocation13_spill] sm:$0xff] %v8071_v15  ;;  %v6193_v2 = vadd.f32 %v6192_v34, %v6191_v20  ;;  %v8080_v4 = vpop.f32.mrf.mxu1 }
 0x20a   : > { %v6194_v63 = vpop.f32.mrf.mxu0 }
 0x20b   : > { %v8078_v61 = vadd.f32 %v6193_v2, %v7980_v38  ;;  %v8082_v35 = vpop.f32.mrf.mxu1 }
 0x20c   : > { %v6195_v23 = vpop.f32.mrf.mxu0 }
 0x20d   : > { %8323 = vst [vmem:[#allocation14_spill] sm:$0xff] %v8078_v61  ;;  %v6196_v11 = vadd.f32 %v6195_v23, %v6194_v63  ;;  %v8087_v22 = vpop.f32.mrf.mxu1 }
 0x20e   : > { %v6197_v52 = vpop.f32.mrf.mxu0 }
 0x20f   : > { %v8085_v25 = vadd.f32 %v6196_v11, %v7989_v9  ;;  %v8089_v3 = vpop.f32.mrf.mxu1 }
 0x210   : > { %v6198_v5 = vpop.f32.mrf.mxu0 }
 0x211   : > { %8324 = vst [vmem:[#allocation15_spill] sm:$0xff] %v8085_v25  ;;  %v6199_v13 = vadd.f32 %v6198_v5, %v6197_v52 }
 0x213   : > { %v8092_v59 = vadd.f32 %v6199_v13, %v7992_v39  ;;  %v8094_v38 = vpop.f32.mrf.mxu1 }
 0x215   : > { %8325 = vst [vmem:[#allocation16_spill] sm:$0xff] %v8092_v59  ;;  %v8096_v20 = vpop.f32.mrf.mxu1 }
 0x217   : > { %v8098_v34 = vpop.f32.mrf.mxu1 }
 0x219   : > { %v8100_v2 = vpop.f32.mrf.mxu1 }
 0x21e   : > { %v8102_v63 = vpop.f32.mrf.mxu1 }
 0x220   : > { %v8104_v9 = vpop.f32.mrf.mxu1 }
 0x222   : > { %v6200_v23 = vpop.f32.mrf.mxu0  ;;  %v8106_v11 = vpop.f32.mrf.mxu1 }
 0x224   : > { %v6201_v52 = vpop.f32.mrf.mxu0  ;;  %v8108_v5 = vpop.f32.mrf.mxu1 }
 0x225   : > { %v6202_v39 = vadd.f32 %v6201_v52, %v6200_v23  ;;  %v6236_v52 = vadd.f32 %v8040_v43, %v8035_v51 }
 0x226   : > { %v6203_v13 = vpop.f32.mrf.mxu0  ;;  %v8110_v61 = vpop.f32.mrf.mxu1 }
 0x227   : > { %v8113_v59 = vadd.f32 %v6202_v39, %v7998_v42 }
 0x228   : > { %v6204_v15 = vpop.f32.mrf.mxu0  ;;  %v8115_v25 = vpop.f32.mrf.mxu1 }
 0x229   : > { %8326 = vst [vmem:[#allocation17_spill] sm:$0xff] %v8113_v59  ;;  %v6205_v19 = vadd.f32 %v6204_v15, %v6203_v13  ;;  %v6230_v15 = vadd.f32 %v8026_v28, %v8021_v16  ;;  %v6233_v16 = vadd.f32 %v8033_v7, %v8028_v17 }
 0x22a   : > { %v6206_v18 = vpop.f32.mrf.mxu0  ;;  %v8117_v33 = vpop.f32.mrf.mxu1 }
 0x22b   : > { %v8120_v27 = vadd.f32 %v6205_v19, %v8004_v36 }
 0x22c   : > { %v6207_v1 = vpop.f32.mrf.mxu0  ;;  %v8123_v23 = vpop.f32.mrf.mxu1 }
 0x22d   : > { %8327 = vst [vmem:[#allocation18_spill] sm:$0xff] %v8120_v27  ;;  %v6208_v42 = vadd.f32 %v6207_v1, %v6206_v18  ;;  %v6239_v27 = vadd.f32 %v8047_v8, %v8042_v0  ;;  %v4950_v1 = vadd.f32 %v6236_v52, %v7935_v37  ;;  %v4942_v18 = vadd.f32 %v6230_v15, %v7926_v30 }
 0x22e   : > { %v6209_v39 = vpop.f32.mrf.mxu0  ;;  %v8127_v59 = vpop.f32.mrf.mxu1  ;;  %v6248_v0 = vadd.f32 %v8068_v40, %v8066_v47  ;;  %v6242_v30 = vadd.f32 %v8054_v58, %v8049_v45  ;;  %v6251_v40 = vadd.f32 %v8075_v53, %v8073_v6  ;;  %v6245_v45 = vadd.f32 %v8061_v24, %v8056_v32 }
 0x22f   : > { %v8132_v13 = vadd.f32 %v6208_v42, %v8013_v49  ;;  %v6260_v6 = vadd.f32 %v8096_v20, %v8094_v38  ;;  %v6254_v32 = vadd.f32 %v8082_v35, %v8080_v4  ;;  %v6263_v38 = vadd.f32 %v8100_v2, %v8098_v34 }
 0x230   : > { %v6210_v36 = vpop.f32.mrf.mxu0  ;;  %v8136_v19 = vpop.f32.mrf.mxu1  ;;  %v6257_v4 = vadd.f32 %v8089_v3, %v8087_v22  ;;  %v6272_v34 = vadd.f32 %v8115_v25, %v8110_v61  ;;  %v6266_v22 = vadd.f32 %v8104_v9, %v8102_v63 }
 0x231   : > { %8328 = vst [vmem:[#allocation19_spill] sm:$0xff] %v8132_v13  ;;  %v6211_v60 = vadd.f32 %v6210_v36, %v6209_v39  ;;  %v4966_v39 = vadd.f32 %v6248_v0, %v7959_v48  ;;  %v4969_v48 = vadd.f32 %v6251_v40, %v7965_v14  ;;  %v4982_v14 = vadd.f32 %v6260_v6, %v7983_v55 }
 0x232   : > { %v6366_v51 = vpop.f32.mrf.mxu0  ;;  %v8141_v43 = vpop.f32.mrf.mxu1  ;;  %v4985_v55 = vadd.f32 %v6263_v38, %v7986_v62  ;;  %v4998_v25 = vadd.f32 %v6272_v34, %v8007_v26  ;;  %v4990_v9 = vadd.f32 %v6266_v22, %v7995_v50 }
 0x233   : > { %v8146_v49 = vadd.f32 %v6211_v60, %v8016_v56  ;;  %v5111_v28 = vadd.f32 %v6366_v51, %v4950_v1  ;;  %v4953_v56 = vadd.f32 %v6239_v27, %v7941_v12  ;;  %v4945_v60 = vadd.f32 %v6233_v16, %v7932_v54 }
 0x234   : > { %v5102_v42 = vpop.f32.mrf.mxu0  ;;  %v8149_v13 = vpop.f32.mrf.mxu1  ;;  %v4958_v54 = vadd.f32 %v6242_v30, %v7947_v31  ;;  %v4961_v31 = vadd.f32 %v6245_v45, %v7953_v46  ;;  %v4974_v46 = vadd.f32 %v6254_v32, %v7971_v44  ;;  %v4977_v44 = vadd.f32 %v6257_v4, %v7977_v10 }
 0x235   : > { %5231 = vst [vmem:[%s8153_s26 + $0x10] sm:$0xff] %v5111_v28  ;;  %v5103_v37 = vadd.f32 %v5102_v42, %v4942_v18 }
 0x236   : > { %v6367_v17 = vpop.f32.mrf.mxu0 }
 0x237   : > { %5229 = vst [vmem:[%s8153_s26] sm:$0xff] %v5103_v37  ;;  %v5114_v7 = vadd.f32 %v6367_v17, %v4953_v56 }
 0x238   : > { %v5105_v47 = vpop.f32.mrf.mxu0 }
 0x239   : > { %5232 = vst [vmem:[%s8153_s26 + $0x18] sm:$0xff] %v5114_v7  ;;  %v5106_v52 = vadd.f32 %v5105_v47, %v4945_v60  ;;  %v6275_v7 = vadd.f32 %v8123_v23, %v8117_v33  ;;  %v6269_v47 = vadd.f32 %v8108_v5, %v8106_v11 }
 0x23a   : > { %v6282_v8 = vpop.f32.mrf.mxu1  ;;  %v6370_v27 = vpop.f32.mrf.mxu0 }
 0x23b   : > { %5230 = vst [vmem:[%s8153_s26 + $0x8] sm:$0xff] %v5106_v52  ;;  %v5127_v58 = vadd.f32 %v6370_v27, %v4966_v39  ;;  %v5001_v23 = vadd.f32 %v6275_v7, %v8010_v29  ;;  %v6278_v27 = vadd.f32 %v8136_v19, %v8127_v59  ;;  %v4993_v5 = vadd.f32 %v6269_v47, %v8001_v57 }
 0x23c   : > { %v6283_v12 = vpop.f32.mrf.mxu1  ;;  %v5118_v36 = vpop.f32.mrf.mxu0 }
 0x23d   : > { %5235 = vst [vmem:[%s8153_s26 + $0x30] sm:$0xff] %v5127_v58  ;;  %v5119_v53 = vadd.f32 %v5118_v36, %v4958_v54  ;;  %v6284_v52 = vadd.f32 %v6283_v12, %v6282_v8  ;;  %v6281_v36 = vadd.f32 %v8149_v13, %v8141_v43  ;;  %v5006_v19 = vadd.f32 %v6278_v27, %v8019_v21  ;;  %v8330_v13 = vld [vmem:[#allocation7_spill] sm:$0xff] }
 0x23e   : > { %v6285_v15 = vpop.f32.mrf.mxu1  ;;  %v6371_v51 = vpop.f32.mrf.mxu0 }
 0x23f   : > { %5233 = vst [vmem:[%s8153_s26 + $0x20] sm:$0xff] %v5119_v53  ;;  %v5130_v24 = vadd.f32 %v6371_v51, %v4969_v48  ;;  %v5014_v12 = vadd.f32 %v6284_v52, %v8031_v41  ;;  %v8329_v48 = vld [vmem:[#allocation8_spill] sm:$0xff]  ;;  %v5009_v43 = vadd.f32 %v6281_v36, %v8330_v13  ;;  %v8336_v52 = vld [vmem:[#allocation13_spill] sm:$0xff] }
 0x240   : > { %v6286_v1 = vpop.f32.mrf.mxu1  ;;  %v5121_v16 = vpop.f32.mrf.mxu0 }
 0x241   : > { %5236 = vst [vmem:[%s8153_s26 + $0x38] sm:$0xff] %v5130_v24  ;;  %v5122_v20 = vadd.f32 %v5121_v16, %v4961_v31  ;;  %v6287_v58 = vadd.f32 %v6286_v1, %v6285_v15 }
 0x242   : > { %v6374_v18 = vpop.f32.mrf.mxu0 }
 0x243   : > { %5234 = vst [vmem:[%s8153_s26 + $0x28] sm:$0xff] %v5122_v20  ;;  %v5143_v35 = vadd.f32 %v6374_v18, %v4982_v14  ;;  %v5017_v1 = vadd.f32 %v6287_v58, %v8329_v48  ;;  %v8331_v20 = vld [vmem:[#allocation11_spill] sm:$0xff] }
 0x244   : > { %v5134_v0 = vpop.f32.mrf.mxu0 }
 0x245   : > { %v8177_v28 = vpop.f32.mrf.mxu1  ;;  %5239 = vst [vmem:[%s8153_s26 + $0x50] sm:$0xff] %v5143_v35  ;;  %v5135_v2 = vadd.f32 %v5134_v0, %v4974_v46 }
 0x246   : > { %v6375_v56 = vpop.f32.mrf.mxu0 }
 0x247   : > { %v6289_v42 = vpop.f32.mrf.mxu1  ;;  %5237 = vst [vmem:[%s8153_s26 + $0x40] sm:$0xff] %v5135_v2  ;;  %v5146_v3 = vadd.f32 %v6375_v56, %v4985_v55  ;;  %v8333_v55 = vld [vmem:[#allocation12_spill] sm:$0xff] }
 0x248   : > { %v5137_v30 = vpop.f32.mrf.mxu0  ;;  %v6290_v32 = vadd.f32 %v6289_v42, %v8177_v28  ;;  %v8332_v28 = vld [vmem:[#allocation9_spill] sm:$0xff] }
 0x249   : > { %v8187_v37 = vpop.f32.mrf.mxu1  ;;  %5240 = vst [vmem:[%s8153_s26 + $0x58] sm:$0xff] %v5146_v3  ;;  %v5138_v61 = vadd.f32 %v5137_v30, %v4977_v44 }
 0x24a   : > { %v6378_v60 = vpop.f32.mrf.mxu0  ;;  %v5022_v42 = vadd.f32 %v6290_v32, %v8332_v28 }
 0x24b   : > { %v6292_v17 = vpop.f32.mrf.mxu1  ;;  %5238 = vst [vmem:[%s8153_s26 + $0x48] sm:$0xff] %v5138_v61  ;;  %v5159_v63 = vadd.f32 %v6378_v60, %v4998_v25  ;;  %v8334_v61 = vld [vmem:[#allocation10_spill] sm:$0xff] }
 0x24c   : > { %v5150_v40 = vpop.f32.mrf.mxu0  ;;  %v6293_v35 = vadd.f32 %v6292_v17, %v8187_v37  ;;  %v8335_v17 = vld [vmem:[#allocation15_spill] sm:$0xff] }
 0x24d   : > { %5243 = vst [vmem:[%s8153_s26 + $0x70] sm:$0xff] %v5159_v63  ;;  %v5151_v33 = vadd.f32 %v5150_v40, %v4990_v9 }
 0x24e   : > { %v6294_v62 = vpop.f32.mrf.mxu1  ;;  %v6379_v39 = vpop.f32.mrf.mxu0  ;;  %v5025_v37 = vadd.f32 %v6293_v35, %v8334_v61 }
 0x24f   : > { %5241 = vst [vmem:[%s8153_s26 + $0x60] sm:$0xff] %v5151_v33  ;;  %v5162_v11 = vadd.f32 %v6379_v39, %v5001_v23  ;;  %v8337_v23 = vld [vmem:[#allocation16_spill] sm:$0xff] }
 0x250   : > { %v6295_v10 = vpop.f32.mrf.mxu1  ;;  %v5153_v45 = vpop.f32.mrf.mxu0 }
 0x251   : > { %5244 = vst [vmem:[%s8153_s26 + $0x78] sm:$0xff] %v5162_v11  ;;  %v5154_v8 = vadd.f32 %v5153_v45, %v4993_v5  ;;  %v6296_v53 = vadd.f32 %v6295_v10, %v6294_v62 }
 0x252   : > { %v6297_v26 = vpop.f32.mrf.mxu1 }
 0x253   : > { %v6382_v29 = vpop.f32.mrf.mxu0  ;;  %5242 = vst [vmem:[%s8153_s26 + $0x68] sm:$0xff] %v5154_v8  ;;  %v5030_v14 = vadd.f32 %v6296_v53, %v8331_v20  ;;  %v8338_v8 = vld [vmem:[#allocation14_spill] sm:$0xff] }
 0x254   : > { %v6298_v50 = vpop.f32.mrf.mxu1  ;;  %v5175_v59 = vadd.f32 %v6382_v29, %v5014_v12 }
 0x255   : > { %v5166_v6 = vpop.f32.mrf.mxu0  ;;  %v6299_v21 = vadd.f32 %v6298_v50, %v6297_v26 }
 0x256   : > { %5247 = vst [vmem:[%s8153_s26 + $0x90] sm:$0xff] %v5175_v59  ;;  %v5167_v15 = vadd.f32 %v5166_v6, %v5006_v19  ;;  %v8339_v19 = vld [vmem:[#allocation17_spill] sm:$0xff] }
 0x257   : > { %v6383_v41 = vpop.f32.mrf.mxu0  ;;  %v5033_v56 = vadd.f32 %v6299_v21, %v8333_v55  ;;  %v8341_v21 = vld [vmem:[#allocation19_spill] sm:$0xff] }
 0x258   : > { %5245 = vst [vmem:[%s8153_s26 + $0x80] sm:$0xff] %v5167_v15  ;;  %v5178_v24 = vadd.f32 %v6383_v41, %v5017_v1  ;;  %v8340_v1 = vld [vmem:[#allocation18_spill] sm:$0xff] }
 0x259   : > { %v5169_v31 = vpop.f32.mrf.mxu0 }
 0x25a   : > { %v6300_v54 = vpop.f32.mrf.mxu1  ;;  %5248 = vst [vmem:[%s8153_s26 + $0x98] sm:$0xff] %v5178_v24  ;;  %v5170_v38 = vadd.f32 %v5169_v31, %v5009_v43 }
 0x25c   : > { %v6301_v57 = vpop.f32.mrf.mxu1  ;;  %5246 = vst [vmem:[%s8153_s26 + $0x88] sm:$0xff] %v5170_v38 }
 0x25d   : > { %v6302_v30 = vadd.f32 %v6301_v57, %v6300_v54 }
 0x25e   : > { %v6303_v51 = vpop.f32.mrf.mxu1  ;;  %v6386_v18 = vpop.f32.mrf.mxu0 }
 0x25f   : > { %v5191_v46 = vadd.f32 %v6386_v18, %v5030_v14  ;;  %v5038_v33 = vadd.f32 %v6302_v30, %v8336_v52 }
 0x260   : > { %v6304_v16 = vpop.f32.mrf.mxu1  ;;  %v5182_v0 = vpop.f32.mrf.mxu0 }
 0x261   : > { %5251 = vst [vmem:[%s8153_s26 + $0xb0] sm:$0xff] %v5191_v46  ;;  %v5183_v2 = vadd.f32 %v5182_v0, %v5022_v42  ;;  %v6305_v10 = vadd.f32 %v6304_v16, %v6303_v51 }
 0x262   : > { %v6306_v4 = vpop.f32.mrf.mxu1  ;;  %v6387_v3 = vpop.f32.mrf.mxu0 }
 0x263   : > { %5249 = vst [vmem:[%s8153_s26 + $0xa0] sm:$0xff] %v5183_v2  ;;  %v5194_v7 = vadd.f32 %v6387_v3, %v5033_v56  ;;  %v5041_v12 = vadd.f32 %v6305_v10, %v8338_v8 }
 0x264   : > { %v6307_v34 = vpop.f32.mrf.mxu1  ;;  %v5185_v62 = vpop.f32.mrf.mxu0 }
 0x265   : > { %v6308_v22 = vadd.f32 %v6307_v34, %v6306_v4  ;;  %5252 = vst [vmem:[%s8153_s26 + $0xb8] sm:$0xff] %v5194_v7  ;;  %v5186_v47 = vadd.f32 %v5185_v62, %v5025_v37 }
 0x266   : > { %v6309_v44 = vpop.f32.mrf.mxu1 }
 0x267   : > { %v5046_v25 = vadd.f32 %v6308_v22, %v8335_v17  ;;  %5250 = vst [vmem:[%s8153_s26 + $0xa8] sm:$0xff] %v5186_v47 }
 0x268   : > { %v6310_v60 = vpop.f32.mrf.mxu1  ;;  %v6390_v9 = vpop.f32.mrf.mxu0 }
 0x269   : > { %v6311_v63 = vadd.f32 %v6310_v60, %v6309_v44  ;;  %v5207_v40 = vadd.f32 %v6390_v9, %v5046_v25 }
 0x26a   : > { %v5198_v27 = vpop.f32.mrf.mxu0 }
 0x26b   : > { %v5049_v26 = vadd.f32 %v6311_v63, %v8337_v23  ;;  %v6312_v39 = vpop.f32.mrf.mxu1  ;;  %5255 = vst [vmem:[%s8153_s26 + $0xd0] sm:$0xff] %v5207_v40  ;;  %v5199_v11 = vadd.f32 %v5198_v27, %v5038_v33 }
 0x26c   : > { %v6391_v50 = vpop.f32.mrf.mxu0 }
 0x26d   : > { %v6313_v5 = vpop.f32.mrf.mxu1  ;;  %5253 = vst [vmem:[%s8153_s26 + $0xc0] sm:$0xff] %v5199_v11  ;;  %v5210_v58 = vadd.f32 %v6391_v50, %v5049_v26 }
 0x26e   : > { %v6314_v45 = vadd.f32 %v6313_v5, %v6312_v39  ;;  %v5201_v54 = vpop.f32.mrf.mxu0 }
 0x26f   : > { %v6315_v29 = vpop.f32.mrf.mxu1  ;;  %5256 = vst [vmem:[%s8153_s26 + $0xd8] sm:$0xff] %v5210_v58  ;;  %v5202_v36 = vadd.f32 %v5201_v54, %v5041_v12 }
 0x270   : > { %v5054_v6 = vadd.f32 %v6314_v45, %v8339_v19  ;;  %v6394_v57 = vpop.f32.mrf.mxu0 }
 0x271   : > { %v6316_v59 = vpop.f32.mrf.mxu1  ;;  %5254 = vst [vmem:[%s8153_s26 + $0xc8] sm:$0xff] %v5202_v36 }
 0x272   : > { %v6317_v53 = vadd.f32 %v6316_v59, %v6315_v29  ;;  %v5214_v15 = vpop.f32.mrf.mxu0 }
 0x273   : > { %v5215_v48 = vadd.f32 %v5214_v15, %v5054_v6 }
 0x274   : > { %v5057_v41 = vadd.f32 %v6317_v53, %v8340_v1  ;;  %v6395_v32 = vpop.f32.mrf.mxu0 }
 0x275   : > { %v6318_v51 = vpop.f32.mrf.mxu1  ;;  %5257 = vst [vmem:[%s8153_s26 + $0xe0] sm:$0xff] %v5215_v48 }
 0x276   : > { %v5217_v13 = vpop.f32.mrf.mxu0 }
 0x277   : > { %v6319_v24 = vpop.f32.mrf.mxu1  ;;  %v5218_v31 = vadd.f32 %v5217_v13, %v5057_v41 }
 0x278   : > { %v6320_v43 = vadd.f32 %v6319_v24, %v6318_v51 }
 0x279   : > { %v6321_v16 = vpop.f32.mrf.mxu1  ;;  %5258 = vst [vmem:[%s8153_s26 + $0xe8] sm:$0xff] %v5218_v31 }
 0x27a   : > { %v5062_v38 = vadd.f32 %v6320_v43, %v8341_v21 }
 0x27b   : > { %v6322_v20 = vpop.f32.mrf.mxu1 }
 0x27c   : > { %v5223_v14 = vadd.f32 %v6394_v57, %v5062_v38  ;;  %v6323_v18 = vadd.f32 %v6322_v20, %v6321_v16 }
 0x27e   : > { %5259 = vst [vmem:[%s8153_s26 + $0xf0] sm:$0xff] %v5223_v14  ;;  %v5065_v4 = vadd.f32 %v6323_v18, %v8146_v49 }
 0x280   : > { %v5226_v35 = vadd.f32 %v6395_v32, %v5065_v4 }
 0x282   : > { %5260 = vst [vmem:[%s8153_s26 + $0xf8] sm:$0xff] %v5226_v35 }
 0x283   : > { %6770 = shalt.err (!%p6767_p5)
}
 0x284   : > { %s6771_s12 = scalar_lea.hbm %s8253_s7, 4096  ;;  %s6775_s22 = scalar_lea.hbm %s8309_s4, 8192 }
 0x285   : > { %p6772_p6 = scmp.ne.s32.totalorder %s8253_s7, %s6771_s12  ;;  %p6776_p10 = scmp.lt.s32.totalorder %s8253_s7, %s8309_s4 }
 0x286   : > { %p6777_p11 = scmp.lt.s32.totalorder %s6775_s22, %s6771_s12 }
 0x287   : > { %p6773_p7 = pnand %p6772_p6, %p6904_p4 }
 0x288   : > { %p6778_p12 = por %p6777_p11, %p6776_p10 }
 0x289   : > { %p6774_p9 = pneg %p6773_p7 }
 0x28b   : > { %p6779_p13 = pnand %p6778_p12, %p6774_p9 }
 0x28d   : > { %6782 = shalt.err (!%p6779_p13)
}
 0x28e   : > { %s6837_s26 = smov 128   ;;  %s6838_s29 = smov 8  }
 0x28f   : > { %6413 = dma.vmem_to_hbm [thread:$0]  (%p6904_p4), %s8255_s30, 4096, %s8253_s7, %s8260_s8, %s6837_s26, %s6837_s26, %s6838_s29  }
 0x290 PF: > { %p6419_p0 = scmp.ge.s32.totalorder %s6833_s20, 2  ;;  %s5293_s5 = sand.u32 1, %s6813_s15  }
 0x291   : > { %s5294_s6 = scalar_lea.sflag [#allocation5], %s5293_s5 }
 0x292   : > { %p6416_p1 = pnand %p6419_p0, %p6911_p8 }
 0x294   : > { %p6417_p2 = pneg %p6416_p1 }
 0x296   : > { %6808 = dma.done.wait (%p6417_p2), %s5294_s6, 4096  }
 0x297   : > { %6810 = vsyncadd (%p6417_p2), %s5294_s6, 4294963200  ;;  %s17_s20 = sadd.s32 1, %s6833_s20   ;;  %s8342_s15 = smov %s6817_s16 }
 0x298   : > { %p14_p3 = scmp.ge.s32.totalorder %s17_s20, 4   ;;  %s8343_s16 = smov %s6821_s17 }
 0x299   : > { %s8344_s17 = smov %s6917_s28  ;;  %s8345_s18 = smov %s6829_s19 }
 0x29a   : > { %s8346_s19 = smov %s8348_s23  ;;  %16 = sbr.rel (!%p14_p3) target bundleno = 4 (0x4), region = 74 }
 0x29f   :  { %5299 = vsyncpa [#allocation5], 1 }
 0x2a0   :  { %5301 = vsyncpa [#allocation5 + $0x1], 1 }

</bundles_post_ra>
